<compile_context>
chip_gen: v5e
topology: v5e:2x2
jax: 0.10.0
libtpu: 0.0.40
codegen_flags: <defaults>
</compile_context>

<pallas_src>
import jax
import jax.numpy as jnp
from jax.experimental import pallas as pl
from jax.experimental.pallas import tpu as pltpu


def _conv1x1_kernel(w_ref, x_ref, o_ref):
    # w_ref: [co_blk, Cin] (bf16)   x_ref: [1, Cin, HW] (f32)   o_ref: [1, co_blk, HW] (f32)
    x = x_ref[0].astype(w_ref.dtype)
    o_ref[0] = jnp.dot(
        w_ref[...], x, preferred_element_type=jnp.float32
    ).astype(o_ref.dtype)


def prepare_weight(weight_oihw, compute_dtype=jnp.bfloat16):
    """One-time parameter prep: [Cout, Cin, 1, 1] -> [Cout, Cin] in the compute dtype."""
    Cout, Cin, kh, kw = weight_oihw.shape
    assert (kh, kw) == (1, 1), "only 1x1 kernels supported"
    return weight_oihw.reshape(Cout, Cin).astype(compute_dtype)


def _multi_tensorcore_chip():
    """True only on chips with >1 TensorCore per device (v7x; v4/v5p megacore).

    On single-TC chips (v5e/v6e) splitting Cout would only add per-step overhead.
    """
    try:
        kind = jax.devices()[0].device_kind.lower()
    except Exception:
        return False
    if "7" in kind:          # v7x: 2 TensorCores per chip
        return True
    if "v4" in kind:         # v4 megacore
        return True
    if "v5" in kind and "lite" not in kind and "5e" not in kind:
        return True          # v5p megacore (excludes v5e / "v5 lite")
    return False


def conv2d_1x1(x_nchw, w_oc):
    """1x1 stride-1 conv, no bias.

    x_nchw: [N, Cin, H, W] (f32)
    w_oc:   [Cout, Cin]    (already prepared via prepare_weight)
    returns [N, Cout, H, W] in x_nchw.dtype
    """
    N, Cin, H, W = x_nchw.shape
    Cout, Cin_w = w_oc.shape
    assert Cin == Cin_w
    HW = H * W

    # Split Cout across cores only where a second TensorCore actually exists.
    n_co = 2 if (_multi_tensorcore_chip() and Cout % 2 == 0 and (Cout // 2) % 8 == 0) else 1
    co_blk = Cout // n_co

    # Pure reshape (no data movement): NCHW -> [N, Cin, HW]
    x3 = x_nchw.reshape(N, Cin, HW)

    cost = pl.CostEstimate(
        flops=2 * N * Cout * Cin * HW,
        transcendentals=0,
        bytes_accessed=(
            Cout * Cin * w_oc.dtype.itemsize            # weight read (bf16)
            + N * Cin * HW * x_nchw.dtype.itemsize      # activation read (f32)
            + N * Cout * HW * x_nchw.dtype.itemsize     # output write (f32)
        ),
    )

    y3 = pl.pallas_call(
        _conv1x1_kernel,
        out_shape=jax.ShapeDtypeStruct((N, Cout, HW), x_nchw.dtype),
        grid_spec=pltpu.PrefetchScalarGridSpec(
            num_scalar_prefetch=0,
            grid=(N, n_co),
            in_specs=[
                # Weight: one Cout block per grid step along the (parallel) co axis.
                pl.BlockSpec((co_blk, Cin), lambda n, co: (co, 0)),
                # Whole [Cin, HW] slab for batch n; constant over co => fetched once.
                pl.BlockSpec((1, Cin, HW), lambda n, co: (n, 0, 0)),
            ],
            out_specs=pl.BlockSpec((1, co_blk, HW), lambda n, co: (n, co, 0)),
        ),
        compiler_params=pltpu.CompilerParams(
            dimension_semantics=("parallel", "parallel"),
        ),
        cost_estimate=cost,
    )(w_oc, x3)

    # Pure reshape back: [N, Cout, HW] -> [N, Cout, H, W]
    return y3.reshape(N, Cout, H, W)


if __name__ == "__main__":
    # Shapes implied by the module: x379 = [1, 2304, 7, 7], Conv2d(2304, 384, 1x1)
    N, Cin, Cout, H, W = 1, 2304, 384, 7, 7

    key = jax.random.PRNGKey(0)
    kx, kw = jax.random.split(key)
    x = jax.random.normal(kx, (N, Cin, H, W), dtype=jnp.float32)
    w = jax.random.normal(kw, (Cout, Cin, 1, 1), dtype=jnp.float32) * 0.02

    # One-time weight preparation (reshape + bf16 cast), as in real param prep.
    w_prepared = prepare_weight(w)

    y = jax.block_until_ready(conv2d_1x1(x, w_prepared))
    assert y.shape == (N, Cout, H, W)

    # Tight check against a reference using the same bf16 operand rounding
    # (same math as the kernel: bf16 inputs, f32 accumulation).
    w_b = w.reshape(Cout, Cin).astype(jnp.bfloat16).astype(jnp.float32)
    x_b = x.reshape(N, Cin, H * W).astype(jnp.bfloat16).astype(jnp.float32)
    y_ref_b = jnp.einsum("oc,ncp->nop", w_b, x_b).reshape(N, Cout, H, W)
    assert jnp.allclose(y, y_ref_b, atol=2e-3, rtol=2e-3)

    # Loose sanity check against the full-precision f32 conv math
    # (bf16 rounding of the operands bounds the difference well below this).
    y_ref = jnp.einsum(
        "oc,ncp->nop", w.reshape(Cout, Cin), x.reshape(N, Cin, H * W)
    ).reshape(N, Cout, H, W)
    assert jnp.allclose(y, y_ref, atol=5e-2, rtol=5e-2)

    print("KERNEL_OK")
</pallas_src>

<mosaic_0001>
module attributes {stable_mosaic.version = 11 : i64} {
  func.func @_conv1x1_kernel(%arg0: i32, %arg1: i32, %arg2: memref<384x2304xbf16, #tpu.memory_space<vmem>>, %arg3: memref<1x2304x49xf32, #tpu.memory_space<vmem>>, %arg4: memref<1x384x49xf32, #tpu.memory_space<vmem>>) attributes {dimension_semantics = [#tpu.dimension_semantics<parallel>, #tpu.dimension_semantics<parallel>], iteration_bounds = array<i64: 1, 1>, scalar_prefetch = 0 : i64, scratch_operands = 0 : i64, tpu.core_type = #tpu.core_type<tc>, window_params = [{transform_indices = @transform_0, window_bounds = array<i64: 384, 2304>}, {transform_indices = @transform_1, window_bounds = array<i64: 1, 2304, 49>}, {transform_indices = @transform_2, window_bounds = array<i64: 1, 384, 49>}]} {
    %c0 = arith.constant 0 : index
    %c0_0 = arith.constant 0 : index
    %c0_1 = arith.constant 0 : index
    %0 = vector.load %arg3[%c0, %c0_0, %c0_1] : memref<1x2304x49xf32, #tpu.memory_space<vmem>>, vector<1x2304x49xf32>
    %1 = vector.shape_cast %0 : vector<1x2304x49xf32> to vector<2304x49xf32>
    %2 = arith.truncf %1 : vector<2304x49xf32> to vector<2304x49xbf16>
    %c0_2 = arith.constant 0 : index
    %c0_3 = arith.constant 0 : index
    %3 = vector.load %arg2[%c0_2, %c0_3] : memref<384x2304xbf16, #tpu.memory_space<vmem>>, vector<384x2304xbf16>
    %cst = arith.constant dense<0.000000e+00> : vector<384x49xf32>
    %4 = tpu.matmul %3, %2, %cst {dimension_numbers = #tpu.dot_dimension_numbers<[1], [0], [0], [1], [0, 0, 1, 1], [], []>} : vector<384x2304xbf16>, vector<2304x49xbf16>, vector<384x49xf32> -> vector<384x49xf32>
    %c0_4 = arith.constant 0 : index
    %c0_5 = arith.constant 0 : index
    %c0_6 = arith.constant 0 : index
    %5 = vector.load %arg4[%c0_4, %c0_5, %c0_6] : memref<1x384x49xf32, #tpu.memory_space<vmem>>, vector<1x384x49xf32>
    %6 = vector.shape_cast %5 : vector<1x384x49xf32> to vector<384x49xf32>
    %7 = vector.shape_cast %4 : vector<384x49xf32> to vector<1x384x49xf32>
    tpu.vector_store %arg4[%c0_4, %c0_5, %c0_6], %7 {strides = array<i32>} : memref<1x384x49xf32, #tpu.memory_space<vmem>>, vector<1x384x49xf32>,
    return
  }
  func.func @transform_0(%arg0: i32, %arg1: i32) -> (i32, i32) {
    %c0_i32 = arith.constant 0 : i32
    %c0_i32_0 = arith.constant 0 : i32
    return %arg1, %c0_i32 : i32, i32
  }
  func.func @transform_1(%arg0: i32, %arg1: i32) -> (i32, i32, i32) {
    %c0_i32 = arith.constant 0 : i32
    %c0_i32_0 = arith.constant 0 : i32
    %c0_i32_1 = arith.constant 0 : i32
    return %arg0, %c0_i32, %c0_i32_0 : i32, i32, i32
  }
  func.func @transform_2(%arg0: i32, %arg1: i32) -> (i32, i32, i32) {
    %c0_i32 = arith.constant 0 : i32
    %c0_i32_0 = arith.constant 0 : i32
    return %arg0, %arg1, %c0_i32 : i32, i32, i32
  }
}

</mosaic_0001>

<bundles_post_ra>
// kernel: tpu_custom_call.1
= control target key start
LH: loop header
LB: loop body
LE: loop exit
PB: predicated region body
PF: predicated region fallthrough
CT: control target
= control target key end

     0   :  { %7 = vsyncpa [#allocation3], 0  ;;  %s7632_s12 = smov [#allocation2]   ;;  %s7633_s14 = smov 1152   ;;  %s9285_s0 = inlined_call_operand.hbm [shape: bf16[384,2304], index: 0, kind: input, shape index: {}]   ;;  %s9286_s1 = inlined_call_operand.vmem [shape: f32[1,2304,49], index: 1, kind: input, shape index: {}]   ;;  %s9287_s2 = inlined_call_operand.vmem [shape: f32[1,384,49], index: 2, kind: output, shape index: {}]  }
   0x1   :  { %s12_s11 = sshll.u32 %s9285_s0, 4  ;;  %s14_s13 = sshll.u32 %s7632_s12, 4  ;;  %s13_s11 = int_to_ptr.hbm [resolvable:$true] %s12_s11  ;;  %s15_s13 = int_to_ptr.vmem [resolvable:$true] %s14_s13 }
   0x2   :  { %s7634_s15 = smov 72  }
   0x3   :  { %20 = dma.hbm_to_vmem [thread:$0]  %s13_s11, 55296, %s15_s13, [#allocation3], %s7633_s14, %s7633_s14, %s7634_s15  }
   0x4   :  { %7630 = dma.done.wait [#allocation3], 55296  }
   0x5   :  { %7631 = vsyncadd [#allocation3], 4294912000  ;;  %v41_v0 = vld [vmem:[%s9286_s1 + $0x70] sm:$0xff]  ;;  %v42_v1 = vld [vmem:[%s9286_s1 + $0x78] sm:$0xff]  ;;  %vm5373_vm0 = vcmask 400384  }
   0x6   :  { %v57_v2 = vld [vmem:[%s9286_s1 + $0xf0] sm:$0xff]  ;;  %v322_v3 = vpack.c.bf16 %v42_v1, %v41_v0  ;;  %v58_v4 = vld [vmem:[%s9286_s1 + $0xf8] sm:$0xff]  ;;  %v39_v5 = vld [vmem:[%s9286_s1 + $0x60] sm:$0xff] }
   0x7   :  { %v40_v6 = vld [vmem:[%s9286_s1 + $0x68] sm:$0xff]  ;;  %v330_v7 = vpack.c.bf16 %v58_v4, %v57_v2  ;;  %v55_v8 = vld [vmem:[%s9286_s1 + $0xe0] sm:$0xff]  ;;  %v37_v12 = vld [vmem:[%s9286_s1 + $0x50] sm:$0xff] }
   0x8   :  { %v56_v9 = vld [vmem:[%s9286_s1 + $0xe8] sm:$0xff]  ;;  %7587 = vmatpush.bf16.msra.mxu2 %v322_v3  ;;  %3051 = vmatpush.bf16.msra.mxu0 %v322_v3  ;;  %v321_v10 = vpack.c.bf16 %v40_v6, %v39_v5  ;;  %v38_v13 = vld [vmem:[%s9286_s1 + $0x58] sm:$0xff]  ;;  %v53_v14 = vld [vmem:[%s9286_s1 + $0xd0] sm:$0xff] }
   0x9   :  { %7595 = vmatpush.bf16.msra.mxu3 %v330_v7  ;;  %3180 = vmatpush.bf16.msra.mxu1 %v330_v7  ;;  %v329_v11 = vpack.c.bf16 %v56_v9, %v55_v8  ;;  %v54_v15 = vld [vmem:[%s9286_s1 + $0xd8] sm:$0xff]  ;;  %v320_v16 = vpack.c.bf16 %v38_v13, %v37_v12  ;;  %v35_v18 = vld [vmem:[%s9286_s1 + $0x40] sm:$0xff]  ;;  %v36_v19 = vld [vmem:[%s9286_s1 + $0x48] sm:$0xff] }
   0xa   :  { %v328_v17 = vpack.c.bf16 %v54_v15, %v53_v14  ;;  %v51_v20 = vld [vmem:[%s9286_s1 + $0xc0] sm:$0xff]  ;;  %v52_v21 = vld [vmem:[%s9286_s1 + $0xc8] sm:$0xff]  ;;  %v319_v22 = vpack.c.bf16 %v36_v19, %v35_v18  ;;  %v33_v24 = vld [vmem:[%s9286_s1 + $0x30] sm:$0xff] }
   0xb   :  { %v327_v23 = vpack.c.bf16 %v52_v21, %v51_v20  ;;  %v34_v25 = vld [vmem:[%s9286_s1 + $0x38] sm:$0xff]  ;;  %v49_v26 = vld [vmem:[%s9286_s1 + $0xb0] sm:$0xff]  ;;  %v31_v30 = vld [vmem:[%s9286_s1 + $0x20] sm:$0xff] }
   0xc   :  { %7588 = vmatpush.bf16.msra.mxu2 %v321_v10  ;;  %3052 = vmatpush.bf16.msra.mxu0 %v321_v10  ;;  %v50_v27 = vld [vmem:[%s9286_s1 + $0xb8] sm:$0xff]  ;;  %v318_v28 = vpack.c.bf16 %v34_v25, %v33_v24  ;;  %v32_v31 = vld [vmem:[%s9286_s1 + $0x28] sm:$0xff]  ;;  %v47_v32 = vld [vmem:[%s9286_s1 + $0xa0] sm:$0xff] }
   0xd   :  { %7596 = vmatpush.bf16.msra.mxu3 %v329_v11  ;;  %3181 = vmatpush.bf16.msra.mxu1 %v329_v11  ;;  %v326_v29 = vpack.c.bf16 %v50_v27, %v49_v26  ;;  %v48_v33 = vld [vmem:[%s9286_s1 + $0xa8] sm:$0xff]  ;;  %v317_v34 = vpack.c.bf16 %v32_v31, %v31_v30  ;;  %v29_v36 = vld [vmem:[%s9286_s1 + $0x10] sm:$0xff]  ;;  %v30_v37 = vld [vmem:[%s9286_s1 + $0x18] sm:$0xff] }
   0xe   :  { %v325_v35 = vpack.c.bf16 %v48_v33, %v47_v32  ;;  %v45_v38 = vld [vmem:[%s9286_s1 + $0x90] sm:$0xff]  ;;  %v46_v39 = vld [vmem:[%s9286_s1 + $0x98] sm:$0xff]  ;;  %v316_v40 = vpack.c.bf16 %v30_v37, %v29_v36  ;;  %v27_v41 = vld [vmem:[%s9286_s1] sm:$0xff] }
   0xf   :  { %v324_v42 = vpack.c.bf16 %v46_v39, %v45_v38  ;;  %v28_v43 = vld [vmem:[%s9286_s1 + $0x8] sm:$0xff]  ;;  %v43_v44 = vld [vmem:[%s9286_s1 + $0x80] sm:$0xff]  ;;  %v73_v48 = vld [vmem:[%s9286_s1 + $0x170] sm:$0xff] }
  0x10   :  { %7589 = vmatpush.bf16.msra.mxu2 %v320_v16  ;;  %3053 = vmatpush.bf16.msra.mxu0 %v320_v16  ;;  %v44_v45 = vld [vmem:[%s9286_s1 + $0x88] sm:$0xff]  ;;  %v6293_v46 = vld [vmem:[#allocation2 + $0x6c0] sm:$0xf]  ;;  %v7371_v49 = vld [vmem:[#allocation2 + $0x6c4] sm:$0xf]  ;;  %v315_v54 = vpack.c.bf16 %v28_v43, %v27_v41 }
  0x11   :  { %7597 = vmatpush.bf16.msra.mxu3 %v328_v17  ;;  %3182 = vmatpush.bf16.msra.mxu1 %v328_v17  ;;  %v7380_v47 = vld [vmem:[#allocation2 + $0x704] sm:$0xf0]  ;;  %v6295_v50 = vld [vmem:[#allocation2 + $0x708] sm:$0xf0]  ;;  %v74_v51 = vld [vmem:[%s9286_s1 + $0x178] sm:$0xff]  ;;  %v323_v58 = vpack.c.bf16 %v44_v45, %v43_v44 }
  0x12   :  { %v89_v52 = vld [vmem:[%s9286_s1 + $0x1f0] sm:$0xff]  ;;  %v90_v53 = vld [vmem:[%s9286_s1 + $0x1f8] sm:$0xff]  ;;  %v5429_v55 = vld [vmem:[#allocation2] sm:$0xf]  ;;  %v338_v62 = vpack.c.bf16 %v74_v51, %v73_v48  ;;  %v6294_v3 = vor.u32 %v7380_v47, %v6293_v46  ;;  %v6298_v8 = vor.u32 %v7371_v49, %v6295_v50 }
  0x13   :  { %v7164_v56 = vld [vmem:[#allocation2 + $0x44] sm:$0xf0]  ;;  %v7155_v57 = vld [vmem:[#allocation2 + $0x4] sm:$0xf]  ;;  %v5431_v59 = vld [vmem:[#allocation2 + $0x48] sm:$0xf0]  ;;  %v346_v63 = vpack.c.bf16 %v90_v53, %v89_v52 }
  0x14   :  { %7590 = vmatpush.bf16.msra.mxu2 %v319_v22  ;;  %3054 = vmatpush.bf16.msra.mxu0 %v319_v22  ;;  %v105_v60 = vld [vmem:[%s9286_s1 + $0x270] sm:$0xff]  ;;  %v106_v61 = vld [vmem:[%s9286_s1 + $0x278] sm:$0xff]  ;;  %v71_v2 = vld [vmem:[%s9286_s1 + $0x160] sm:$0xff]  ;;  %v5430_v4 = vor.u32 %v7164_v56, %v5429_v55  ;;  %v5434_v9 = vor.u32 %v7155_v57, %v5431_v59 }
  0x15   :  { %7598 = vmatpush.bf16.msra.mxu3 %v327_v23  ;;  %3183 = vmatpush.bf16.msra.mxu1 %v327_v23  ;;  %v121_v0 = vld [vmem:[%s9286_s1 + $0x2f0] sm:$0xff]  ;;  %v122_v1 = vld [vmem:[%s9286_s1 + $0x2f8] sm:$0xff]  ;;  %v72_v5 = vld [vmem:[%s9286_s1 + $0x168] sm:$0xff]  ;;  %v354_v10 = vpack.c.bf16 %v106_v61, %v105_v60 }
  0x16   :  { %v87_v6 = vld [vmem:[%s9286_s1 + $0x1e0] sm:$0xff]  ;;  %v88_v7 = vld [vmem:[%s9286_s1 + $0x1e8] sm:$0xff]  ;;  %v362_v11 = vpack.c.bf16 %v122_v1, %v121_v0  ;;  %v337_v12 = vpack.c.bf16 %v72_v5, %v71_v2  ;;  %v6365_v20 = vld [vmem:[#allocation2 + $0x750] sm:$0xf] }
  0x17   :  { %v345_v13 = vpack.c.bf16 %v88_v7, %v87_v6  ;;  %v103_v14 = vld [vmem:[%s9286_s1 + $0x260] sm:$0xff]  ;;  %v104_v15 = vld [vmem:[%s9286_s1 + $0x268] sm:$0xff]  ;;  %v7398_v21 = vld [vmem:[#allocation2 + $0x794] sm:$0xf0] }
  0x18   :  { %7591 = vmatpush.bf16.msra.mxu2 %v318_v28  ;;  %3055 = vmatpush.bf16.msra.mxu0 %v318_v28  ;;  %v353_v16 = vpack.c.bf16 %v104_v15, %v103_v14  ;;  %v119_v17 = vld [vmem:[%s9286_s1 + $0x2e0] sm:$0xff]  ;;  %v120_v18 = vld [vmem:[%s9286_s1 + $0x2e8] sm:$0xff]  ;;  %v7389_v22 = vld [vmem:[#allocation2 + $0x754] sm:$0xf]  ;;  %v6366_v28 = vor.u32 %v7398_v21, %v6365_v20 }
  0x19   :  { %7599 = vmatpush.bf16.msra.mxu3 %v326_v29  ;;  %3184 = vmatpush.bf16.msra.mxu1 %v326_v29  ;;  %v361_v19 = vpack.c.bf16 %v120_v18, %v119_v17  ;;  %v5501_v23 = vld [vmem:[#allocation2 + $0x90] sm:$0xf]  ;;  %v7182_v24 = vld [vmem:[#allocation2 + $0xd4] sm:$0xf0]  ;;  %v6367_v25 = vld [vmem:[#allocation2 + $0x798] sm:$0xf0] }
  0x1a   :  { %v7173_v26 = vld [vmem:[#allocation2 + $0x94] sm:$0xf]  ;;  %v5503_v27 = vld [vmem:[#allocation2 + $0xd8] sm:$0xf0]  ;;  %v5502_v29 = vor.u32 %v7182_v24, %v5501_v23  ;;  %v6370_v30 = vor.u32 %v7389_v22, %v6367_v25  ;;  %v6437_v44 = vld [vmem:[#allocation2 + $0x7e0] sm:$0xf] }
  0x1b   :  { %v5506_v31 = vor.u32 %v7173_v26, %v5503_v27  ;;  %v69_v32 = vld [vmem:[%s9286_s1 + $0x150] sm:$0xff]  ;;  %v70_v33 = vld [vmem:[%s9286_s1 + $0x158] sm:$0xff]  ;;  %v7416_v45 = vld [vmem:[#allocation2 + $0x824] sm:$0xf0] }
  0x1c   :  { %7592 = vmatpush.bf16.msra.mxu2 %v317_v34  ;;  %3056 = vmatpush.bf16.msra.mxu0 %v317_v34  ;;  %v336_v34 = vpack.c.bf16 %v70_v33, %v69_v32  ;;  %v86_v36 = vld [vmem:[%s9286_s1 + $0x1d8] sm:$0xff]  ;;  %v101_v37 = vld [vmem:[%s9286_s1 + $0x250] sm:$0xff]  ;;  %v7407_v46 = vld [vmem:[#allocation2 + $0x7e4] sm:$0xf]  ;;  %v6438_v52 = vor.u32 %v7416_v45, %v6437_v44 }
  0x1d   :  { %7600 = vmatpush.bf16.msra.mxu3 %v325_v35  ;;  %3185 = vmatpush.bf16.msra.mxu1 %v325_v35  ;;  %v85_v35 = vld [vmem:[%s9286_s1 + $0x1d0] sm:$0xff]  ;;  %v102_v39 = vld [vmem:[%s9286_s1 + $0x258] sm:$0xff]  ;;  %v5573_v47 = vld [vmem:[#allocation2 + $0x120] sm:$0xf] }
  0x1e   :  { %v344_v38 = vpack.c.bf16 %v86_v36, %v85_v35  ;;  %v118_v41 = vld [vmem:[%s9286_s1 + $0x2d8] sm:$0xff]  ;;  %v7200_v48 = vld [vmem:[#allocation2 + $0x164] sm:$0xf0]  ;;  %v6439_v49 = vld [vmem:[#allocation2 + $0x828] sm:$0xf0] }
  0x1f   :  { %v7191_v50 = vld [vmem:[#allocation2 + $0x124] sm:$0xf]  ;;  %v5575_v51 = vld [vmem:[#allocation2 + $0x168] sm:$0xf0]  ;;  %v5574_v53 = vor.u32 %v7200_v48, %v5573_v47  ;;  %v7425_v0 = vld [vmem:[#allocation2 + $0x874] sm:$0xf] }
  0x20   :  { %7593 = vmatpush.bf16.msra.mxu2 %v316_v40  ;;  %3057 = vmatpush.bf16.msra.mxu0 %v316_v40  ;;  %v117_v40 = vld [vmem:[%s9286_s1 + $0x2d0] sm:$0xff]  ;;  %v5578_v55 = vor.u32 %v7191_v50, %v5575_v51  ;;  %v67_v56 = vld [vmem:[%s9286_s1 + $0x140] sm:$0xff]  ;;  %v68_v57 = vld [vmem:[%s9286_s1 + $0x148] sm:$0xff] }
  0x21   :  { %7601 = vmatpush.bf16.msra.mxu3 %v324_v42  ;;  %3186 = vmatpush.bf16.msra.mxu1 %v324_v42  ;;  %v352_v42 = vpack.c.bf16 %v102_v39, %v101_v37  ;;  %v360_v43 = vpack.c.bf16 %v118_v41, %v117_v40  ;;  %v83_v59 = vld [vmem:[%s9286_s1 + $0x1c0] sm:$0xff]  ;;  %v84_v60 = vld [vmem:[%s9286_s1 + $0x1c8] sm:$0xff]  ;;  %v5645_v1 = vld [vmem:[#allocation2 + $0x1b0] sm:$0xf] }
  0x22   :  { %v343_v61 = vpack.c.bf16 %v84_v60, %v83_v59  ;;  %v7218_v2 = vld [vmem:[#allocation2 + $0x1f4] sm:$0xf0]  ;;  %v5647_v5 = vld [vmem:[#allocation2 + $0x1f8] sm:$0xf0]  ;;  %v116_v14 = vld [vmem:[%s9286_s1 + $0x2c8] sm:$0xff] }
  0x23   :  { %v5646_v7 = vor.u32 %v7218_v2, %v5645_v1  ;;  %v7452_v17 = vld [vmem:[#allocation2 + $0x944] sm:$0xf0]  ;;  %v7443_v18 = vld [vmem:[#allocation2 + $0x904] sm:$0xf]  ;;  %v6583_v21 = vld [vmem:[#allocation2 + $0x948] sm:$0xf0] }
  0x24   :  { %7594 = vmatpush.bf16.msra.mxu2 %v315_v54  ;;  %3058 = vmatpush.bf16.msra.mxu0 %v315_v54  ;;  %v6442_v54 = vor.u32 %v7407_v46, %v6439_v49  ;;  %v7236_v20 = vld [vmem:[#allocation2 + $0x284] sm:$0xf0]  ;;  %v7227_v22 = vld [vmem:[#allocation2 + $0x244] sm:$0xf]  ;;  %v5719_v23 = vld [vmem:[#allocation2 + $0x288] sm:$0xf0]  ;;  %v6586_v26 = vor.u32 %v7443_v18, %v6583_v21 }
  0x25   :  { %7602 = vmatpush.bf16.msra.mxu3 %v323_v58  ;;  %3187 = vmatpush.bf16.msra.mxu1 %v323_v58  ;;  %v335_v58 = vpack.c.bf16 %v68_v57, %v67_v56  ;;  %v5722_v27 = vor.u32 %v7227_v22, %v5719_v23  ;;  %v82_v32 = vld [vmem:[%s9286_s1 + $0x1b8] sm:$0xff]  ;;  %v97_v33 = vld [vmem:[%s9286_s1 + $0x230] sm:$0xff]  ;;  %v80_v56 = vld [vmem:[%s9286_s1 + $0x1a8] sm:$0xff] }
  0x26   :  { %v98_v35 = vld [vmem:[%s9286_s1 + $0x238] sm:$0xff]  ;;  %v113_v36 = vld [vmem:[%s9286_s1 + $0x2b0] sm:$0xff]  ;;  %v7488_v59 = vld [vmem:[#allocation2 + $0xa64] sm:$0xf0] }
  0x27   :  { %3119 = vmatmul.bf16.vlgmr.msra.gmra.mxu2 %v6294_v3  ;;  %3059 = vmatmul.bf16.vlgmr.msra.gmra.mxu0 %v5430_v4  ;;  %v6511_v3 = vld [vmem:[#allocation2 + $0x8b8] sm:$0xf0]  ;;  %v7209_v4 = vld [vmem:[#allocation2 + $0x1b4] sm:$0xf]  ;;  %v6653_v40 = vld [vmem:[#allocation2 + $0x990] sm:$0xf] }
  0x28   :  { %3309 = vmatpush.bf16.msrb.mxu2 %v338_v62  ;;  %3248 = vmatmul.bf16.vlgmr.msra.gmra.mxu3 %v6298_v8  ;;  %v6509_v62 = vld [vmem:[#allocation2 + $0x870] sm:$0xf]  ;;  %v6514_v8 = vor.u32 %v7425_v0, %v6511_v3  ;;  %v114_v37 = vld [vmem:[%s9286_s1 + $0x2b8] sm:$0xff]  ;;  %v7245_v46 = vld [vmem:[#allocation2 + $0x2d4] sm:$0xf] }
  0x29   :  { %3438 = vmatpush.bf16.msrb.mxu3 %v346_v63  ;;  %3188 = vmatmul.bf16.vlgmr.msra.gmra.mxu1 %v5434_v9  ;;  %v7434_v63 = vld [vmem:[#allocation2 + $0x8b4] sm:$0xf0]  ;;  %v5650_v9 = vor.u32 %v7209_v4, %v5647_v5  ;;  %v358_v39 = vpack.c.bf16 %v114_v37, %v113_v36  ;;  %v6655_v45 = vld [vmem:[#allocation2 + $0x9d8] sm:$0xf0]  ;;  %v7479_v60 = vld [vmem:[#allocation2 + $0xa24] sm:$0xf] }
  0x2a   :  { %3567 = vmatpush.bf16.msrb.mxu0 %v354_v10  ;;  %3696 = vmatpush.bf16.msrb.mxu1 %v362_v11  ;;  %v6510_v6 = vor.u32 %v7434_v63, %v6509_v62  ;;  %v99_v10 = vld [vmem:[%s9286_s1 + $0x240] sm:$0xff]  ;;  %v100_v11 = vld [vmem:[%s9286_s1 + $0x248] sm:$0xff]  ;;  %v7470_v41 = vld [vmem:[#allocation2 + $0x9d4] sm:$0xf0] }
  0x2b   :  { %v7254_v44 = vld [vmem:[#allocation2 + $0x314] sm:$0xf0]  ;;  %v5791_v47 = vld [vmem:[#allocation2 + $0x318] sm:$0xf0]  ;;  %v6654_v48 = vor.u32 %v7470_v41, %v6653_v40  ;;  %v7272_v62 = vld [vmem:[#allocation2 + $0x3a4] sm:$0xf0] }
  0x2c   :  { %3310 = vmatpush.bf16.msrb.mxu2 %v337_v12  ;;  %v351_v12 = vpack.c.bf16 %v100_v11, %v99_v10  ;;  %v5794_v51 = vor.u32 %v7245_v46, %v5791_v47  ;;  %v6727_v63 = vld [vmem:[#allocation2 + $0xa68] sm:$0xf0]  ;;  %v7263_v0 = vld [vmem:[#allocation2 + $0x364] sm:$0xf]  ;;  %v7281_v18 = vld [vmem:[#allocation2 + $0x3f4] sm:$0xf] }
  0x2d   :  { %3439 = vmatpush.bf16.msrb.mxu3 %v345_v13  ;;  %v115_v13 = vld [vmem:[%s9286_s1 + $0x2c0] sm:$0xff]  ;;  %v5863_v1 = vld [vmem:[#allocation2 + $0x3a8] sm:$0xf0]  ;;  %v6730_v4 = vor.u32 %v7479_v60, %v6727_v63  ;;  %v7308_v37 = vld [vmem:[#allocation2 + $0x4c4] sm:$0xf0] }
  0x2e   :  { %3568 = vmatpush.bf16.msrb.mxu0 %v353_v16  ;;  %3697 = vmatpush.bf16.msrb.mxu1 %v361_v19  ;;  %v359_v15 = vpack.c.bf16 %v116_v14, %v115_v13  ;;  %v6581_v16 = vld [vmem:[#allocation2 + $0x900] sm:$0xf]  ;;  %v5866_v5 = vor.u32 %v7263_v0, %v5863_v1  ;;  %v112_v10 = vld [vmem:[%s9286_s1 + $0x2a8] sm:$0xff]  ;;  %v7506_v13 = vld [vmem:[#allocation2 + $0xaf4] sm:$0xf0] }
  0x2f   :  { %v5717_v19 = vld [vmem:[#allocation2 + $0x240] sm:$0xf]  ;;  %v6582_v24 = vor.u32 %v7452_v17, %v6581_v16  ;;  %v7497_v14 = vld [vmem:[#allocation2 + $0xab4] sm:$0xf]  ;;  %v7290_v16 = vld [vmem:[#allocation2 + $0x434] sm:$0xf0] }
  0x30   :  { %3311 = vmatpush.bf16.msrb.mxu2 %v336_v34  ;;  %v5718_v25 = vor.u32 %v7236_v20, %v5717_v19  ;;  %v6799_v17 = vld [vmem:[#allocation2 + $0xaf8] sm:$0xf0]  ;;  %v6005_v36 = vld [vmem:[#allocation2 + $0x480] sm:$0xf]  ;;  %v6007_v40 = vld [vmem:[#allocation2 + $0x4c8] sm:$0xf0] }
  0x31   :  { %3440 = vmatpush.bf16.msrb.mxu3 %v344_v38  ;;  %v350_v38 = vpack.c.bf16 %v98_v35, %v97_v33  ;;  %v5935_v19 = vld [vmem:[#allocation2 + $0x438] sm:$0xf0]  ;;  %v6802_v22 = vor.u32 %v7497_v14, %v6799_v17  ;;  %v7524_v33 = vld [vmem:[#allocation2 + $0xb84] sm:$0xf0]  ;;  %v7515_v35 = vld [vmem:[#allocation2 + $0xb44] sm:$0xf] }
  0x32   :  { %3569 = vmatpush.bf16.msrb.mxu0 %v352_v42  ;;  %3698 = vmatpush.bf16.msrb.mxu1 %v360_v43  ;;  %v7461_v42 = vld [vmem:[#allocation2 + $0x994] sm:$0xf]  ;;  %v5789_v43 = vld [vmem:[#allocation2 + $0x2d0] sm:$0xf]  ;;  %v5938_v23 = vor.u32 %v7281_v18, %v5935_v19  ;;  %v110_v47 = vld [vmem:[%s9286_s1 + $0x298] sm:$0xff] }
  0x33   :  { %v5790_v49 = vor.u32 %v7254_v44, %v5789_v43  ;;  %v6658_v50 = vor.u32 %v7461_v42, %v6655_v45  ;;  %v6006_v42 = vor.u32 %v7308_v37, %v6005_v36  ;;  %v109_v46 = vld [vmem:[%s9286_s1 + $0x290] sm:$0xff]  ;;  %v76_v63 = vld [vmem:[%s9286_s1 + $0x188] sm:$0xff]  ;;  %v91_v17 = vld [vmem:[%s9286_s1 + $0x200] sm:$0xff] }
  0x34   :  { %3312 = vmatpush.bf16.msrb.mxu2 %v335_v58  ;;  %v6725_v58 = vld [vmem:[#allocation2 + $0xa20] sm:$0xf]  ;;  %v6941_v60 = vld [vmem:[#allocation2 + $0xbd0] sm:$0xf]  ;;  %v7533_v0 = vld [vmem:[#allocation2 + $0xbd4] sm:$0xf] }
  0x35   :  { %3441 = vmatpush.bf16.msrb.mxu3 %v343_v61  ;;  %v5861_v61 = vld [vmem:[#allocation2 + $0x360] sm:$0xf]  ;;  %v6726_v2 = vor.u32 %v7488_v59, %v6725_v58  ;;  %v60_v58 = vld [vmem:[%s9286_s1 + $0x108] sm:$0xff]  ;;  %v6077_v1 = vld [vmem:[#allocation2 + $0x510] sm:$0xf] }
  0x36   :  { %3570 = vmatpush.bf16.msrb.mxu0 %v351_v12  ;;  %3699 = vmatpush.bf16.msrb.mxu1 %v359_v15  ;;  %v5862_v3 = vor.u32 %v7272_v62, %v5861_v61  ;;  %v6797_v12 = vld [vmem:[#allocation2 + $0xab0] sm:$0xf]  ;;  %v75_v59 = vld [vmem:[%s9286_s1 + $0x180] sm:$0xff]  ;;  %v7542_v61 = vld [vmem:[#allocation2 + $0xc14] sm:$0xf0] }
  0x37   :  { %3124 = vmatmul.bf16.gmra.mxu2 %v6366_v28  ;;  %3064 = vmatmul.bf16.gmra.mxu0 %v5502_v29  ;;  %v65_v28 = vld [vmem:[%s9286_s1 + $0x130] sm:$0xff]  ;;  %v66_v29 = vld [vmem:[%s9286_s1 + $0x138] sm:$0xff]  ;;  %v6798_v20 = vor.u32 %v7506_v13, %v6797_v12  ;;  %v92_v18 = vld [vmem:[%s9286_s1 + $0x208] sm:$0xff] }
  0x38   :  { %3253 = vmatmul.bf16.gmra.mxu3 %v6370_v30  ;;  %v334_v30 = vpack.c.bf16 %v66_v29, %v65_v28  ;;  %v5933_v15 = vld [vmem:[#allocation2 + $0x3f0] sm:$0xf]  ;;  %v78_v28 = vld [vmem:[%s9286_s1 + $0x198] sm:$0xff]  ;;  %v347_v19 = vpack.c.bf16 %v92_v18, %v91_v17  ;;  %v6151_v36 = vld [vmem:[#allocation2 + $0x5e8] sm:$0xf0] }
  0x39   :  { %3193 = vmatmul.bf16.gmra.mxu1 %v5506_v31  ;;  %v81_v31 = vld [vmem:[%s9286_s1 + $0x1b0] sm:$0xff]  ;;  %v5934_v21 = vor.u32 %v7290_v16, %v5933_v15 }
  0x3a   :  { %v342_v34 = vpack.c.bf16 %v82_v32, %v81_v31  ;;  %3313 = vmatpush.bf16.msrb.mxu2 %v334_v30  ;;  %3571 = vmatpush.bf16.msrb.mxu0 %v350_v38  ;;  %v93_v30 = vld [vmem:[%s9286_s1 + $0x210] sm:$0xff]  ;;  %v94_v31 = vld [vmem:[%s9286_s1 + $0x218] sm:$0xff]  ;;  %v6869_v32 = vld [vmem:[#allocation2 + $0xb40] sm:$0xf] }
  0x3b   :  { %3700 = vmatpush.bf16.msrb.mxu1 %v358_v39  ;;  %v6871_v38 = vld [vmem:[#allocation2 + $0xb88] sm:$0xf0]  ;;  %v7299_v39 = vld [vmem:[#allocation2 + $0x484] sm:$0xf]  ;;  %v6870_v41 = vor.u32 %v7524_v33, %v6869_v32  ;;  %v6149_v32 = vld [vmem:[#allocation2 + $0x5a0] sm:$0xf] }
  0x3c   :  { %3442 = vmatpush.bf16.msrb.mxu3 %v342_v34  ;;  %v348_v34 = vpack.c.bf16 %v94_v31, %v93_v30  ;;  %v6874_v44 = vor.u32 %v7515_v35, %v6871_v38  ;;  %v6010_v45 = vor.u32 %v7299_v39, %v6007_v40  ;;  %v7560_v30 = vld [vmem:[#allocation2 + $0xca4] sm:$0xf0]  ;;  %v7551_v31 = vld [vmem:[#allocation2 + $0xc64] sm:$0xf] }
  0x3d   :  { %v7344_v33 = vld [vmem:[#allocation2 + $0x5e4] sm:$0xf0]  ;;  %v7335_v35 = vld [vmem:[#allocation2 + $0x5a4] sm:$0xf] }
  0x3e   :  { %v6150_v40 = vor.u32 %v7344_v33, %v6149_v32  ;;  %v5437_v32 = vld [vmem:[#allocation2 + $0x8] sm:$0xf]  ;;  %v7165_v33 = vld [vmem:[#allocation2 + $0x4c] sm:$0xf0] }
  0x47   :  { %3129 = vmatmul.bf16.gmra.mxu2 %v6438_v52  ;;  %3069 = vmatmul.bf16.gmra.mxu0 %v5574_v53  ;;  %v63_v52 = vld [vmem:[%s9286_s1 + $0x120] sm:$0xff]  ;;  %v64_v53 = vld [vmem:[%s9286_s1 + $0x128] sm:$0xff] }
  0x48   :  { %3258 = vmatmul.bf16.gmra.mxu3 %v6442_v54  ;;  %v333_v54 = vpack.c.bf16 %v64_v53, %v63_v52 }
  0x49   :  { %3198 = vmatmul.bf16.gmra.mxu1 %v5578_v55  ;;  %v79_v55 = vld [vmem:[%s9286_s1 + $0x1a0] sm:$0xff] }
  0x4a   :  { %v341_v57 = vpack.c.bf16 %v80_v56, %v79_v55  ;;  %3314 = vmatpush.bf16.msrb.mxu2 %v333_v54 }
  0x4c   :  { %3443 = vmatpush.bf16.msrb.mxu3 %v341_v57  ;;  %v59_v57 = vld [vmem:[%s9286_s1 + $0x100] sm:$0xff] }
  0x4d   :  { %v331_v62 = vpack.c.bf16 %v60_v58, %v59_v57 }
  0x57   :  { %3134 = vmatmul.bf16.gmra.mxu2 %v6510_v6  ;;  %3074 = vmatmul.bf16.gmra.mxu0 %v5646_v7  ;;  %v95_v6 = vld [vmem:[%s9286_s1 + $0x220] sm:$0xff]  ;;  %v96_v7 = vld [vmem:[%s9286_s1 + $0x228] sm:$0xff] }
  0x58   :  { %3263 = vmatmul.bf16.gmra.mxu3 %v6514_v8  ;;  %v349_v8 = vpack.c.bf16 %v96_v7, %v95_v6  ;;  %v6079_v6 = vld [vmem:[#allocation2 + $0x558] sm:$0xf0] }
  0x59   :  { %3203 = vmatmul.bf16.gmra.mxu1 %v5650_v9  ;;  %v111_v9 = vld [vmem:[%s9286_s1 + $0x2a0] sm:$0xff] }
  0x5a   :  { %3572 = vmatpush.bf16.msrb.mxu0 %v349_v8  ;;  %v357_v11 = vpack.c.bf16 %v112_v10, %v111_v9  ;;  %v6942_v9 = vor.u32 %v7542_v61, %v6941_v60 }
  0x5c   :  { %3701 = vmatpush.bf16.msrb.mxu1 %v357_v11 }
  0x5e   :  { %3573 = vmatpush.bf16.msrb.mxu0 %v348_v34  ;;  %v7015_v34 = vld [vmem:[#allocation2 + $0xca8] sm:$0xf0] }
  0x62   :  { %3574 = vmatpush.bf16.msrb.mxu0 %v347_v19  ;;  %v185_v19 = vld [vmem:[%s9286_s1 + $0x4f0] sm:$0xff] }
  0x67   :  { %3139 = vmatmul.bf16.gmra.mxu2 %v6582_v24  ;;  %3079 = vmatmul.bf16.gmra.mxu0 %v5718_v25  ;;  %v61_v24 = vld [vmem:[%s9286_s1 + $0x110] sm:$0xff]  ;;  %v62_v25 = vld [vmem:[%s9286_s1 + $0x118] sm:$0xff] }
  0x68   :  { %3268 = vmatmul.bf16.gmra.mxu3 %v6586_v26  ;;  %v332_v26 = vpack.c.bf16 %v62_v25, %v61_v24  ;;  %v107_v24 = vld [vmem:[%s9286_s1 + $0x280] sm:$0xff]  ;;  %v108_v25 = vld [vmem:[%s9286_s1 + $0x288] sm:$0xff] }
  0x69   :  { %3208 = vmatmul.bf16.gmra.mxu1 %v5722_v27  ;;  %v77_v27 = vld [vmem:[%s9286_s1 + $0x190] sm:$0xff] }
  0x6a   :  { %v340_v29 = vpack.c.bf16 %v78_v28, %v77_v27  ;;  %3315 = vmatpush.bf16.msrb.mxu2 %v332_v26  ;;  %v355_v27 = vpack.c.bf16 %v108_v25, %v107_v24 }
  0x6c   :  { %3444 = vmatpush.bf16.msrb.mxu3 %v340_v29  ;;  %v7013_v29 = vld [vmem:[#allocation2 + $0xc60] sm:$0xf] }
  0x6d   :  { %v7014_v39 = vor.u32 %v7560_v30, %v7013_v29 }
  0x6e   :  { %3316 = vmatpush.bf16.msrb.mxu2 %v331_v62  ;;  %v169_v62 = vld [vmem:[%s9286_s1 + $0x470] sm:$0xff] }
  0x77   :  { %3144 = vmatmul.bf16.gmra.mxu2 %v6654_v48  ;;  %3084 = vmatmul.bf16.gmra.mxu0 %v5790_v49  ;;  %v356_v49 = vpack.c.bf16 %v110_v47, %v109_v46  ;;  %v137_v47 = vld [vmem:[%s9286_s1 + $0x370] sm:$0xff] }
  0x78   :  { %3273 = vmatmul.bf16.gmra.mxu3 %v6658_v50 }
  0x79   :  { %3213 = vmatmul.bf16.gmra.mxu1 %v5794_v51 }
  0x7a   :  { %3702 = vmatpush.bf16.msrb.mxu1 %v356_v49  ;;  %v153_v49 = vld [vmem:[%s9286_s1 + $0x3f0] sm:$0xff] }
  0x7e   :  { %3703 = vmatpush.bf16.msrb.mxu1 %v355_v27 }
  0x87   :  { %3149 = vmatmul.bf16.gmra.mxu2 %v6726_v2  ;;  %3089 = vmatmul.bf16.gmra.mxu0 %v5862_v3  ;;  %v7326_v2 = vld [vmem:[#allocation2 + $0x554] sm:$0xf0]  ;;  %v339_v3 = vpack.c.bf16 %v76_v63, %v75_v59 }
  0x88   :  { %3278 = vmatmul.bf16.gmra.mxu3 %v6730_v4  ;;  %v6943_v4 = vld [vmem:[#allocation2 + $0xc18] sm:$0xf0]  ;;  %v6078_v10 = vor.u32 %v7326_v2, %v6077_v1  ;;  %v7578_v1 = vld [vmem:[#allocation2 + $0xd34] sm:$0xf0] }
  0x89   :  { %3218 = vmatmul.bf16.gmra.mxu1 %v5866_v5  ;;  %v7317_v5 = vld [vmem:[#allocation2 + $0x514] sm:$0xf]  ;;  %3445 = vmatpush.bf16.msrb.mxu3 %v339_v3  ;;  %v6946_v13 = vor.u32 %v7533_v0, %v6943_v4  ;;  %v170_v63 = vld [vmem:[%s9286_s1 + $0x478] sm:$0xff]  ;;  %v7085_v0 = vld [vmem:[#allocation2 + $0xcf0] sm:$0xf] }
  0x8a   :  { %v6082_v14 = vor.u32 %v7317_v5, %v6079_v6  ;;  %v386_v2 = vpack.c.bf16 %v170_v63, %v169_v62  ;;  %v7569_v3 = vld [vmem:[#allocation2 + $0xcf4] sm:$0xf]  ;;  %v6221_v4 = vld [vmem:[#allocation2 + $0x630] sm:$0xf]  ;;  %v7362_v5 = vld [vmem:[#allocation2 + $0x674] sm:$0xf0] }
  0x8b   :  { %v7087_v6 = vld [vmem:[#allocation2 + $0xd38] sm:$0xf0]  ;;  %v5509_v63 = vld [vmem:[#allocation2 + $0x98] sm:$0xf] }
  0x8c   :  { %4083 = vmatpush.bf16.msra.mxu0 %v386_v2  ;;  %v7090_v17 = vor.u32 %v7569_v3, %v7087_v6  ;;  %v5517_v2 = vld [vmem:[#allocation2 + $0xa0] sm:$0xf]  ;;  %v7184_v3 = vld [vmem:[#allocation2 + $0xe4] sm:$0xf0]  ;;  %v5519_v6 = vld [vmem:[#allocation2 + $0xe8] sm:$0xf0] }
  0x97   :  { %3154 = vmatmul.bf16.gmra.mxu2 %v6798_v20  ;;  %3094 = vmatmul.bf16.gmra.mxu0 %v5934_v21 }
  0x98   :  { %3283 = vmatmul.bf16.gmra.mxu3 %v6802_v22 }
  0x99   :  { %3223 = vmatmul.bf16.gmra.mxu1 %v5938_v23 }
  0xa4   :  { %v3060_v43 = vpop.f32.mrf.mxu0 }
  0xa6   :  { %v3189_v48 = vpop.f32.mrf.mxu1 }
  0xa7   :  { %v7917_v50 = vadd.f32 %v3189_v48, %v3060_v43  ;;  %3159 = vmatmul.bf16.gmra.mxu2 %v6870_v41  ;;  %3099 = vmatmul.bf16.gmra.mxu0 %v6006_v42  ;;  %v7018_v43 = vor.u32 %v7551_v31, %v7015_v34  ;;  %v138_v48 = vld [vmem:[%s9286_s1 + $0x378] sm:$0xff]  ;;  %v7156_v34 = vld [vmem:[#allocation2 + $0xc] sm:$0xf] }
  0xa8   :  { %3288 = vmatmul.bf16.gmra.mxu3 %v6874_v44  ;;  %v6154_v44 = vor.u32 %v7335_v35, %v6151_v36  ;;  %v5445_v35 = vld [vmem:[#allocation2 + $0x10] sm:$0xf]  ;;  %v7166_v36 = vld [vmem:[#allocation2 + $0x54] sm:$0xf0] }
  0xa9   :  { %3228 = vmatmul.bf16.gmra.mxu1 %v6010_v45 }
  0xaa   :  { %v3120_v51 = vpop.f32.mrf.mxu2 }
  0xab   :  { %v3249_v52 = vpop.f32.mrf.mxu3 }
  0xac   :  { %v7919_v53 = vadd.f32 %v3249_v52, %v3120_v51  ;;  %v3062_v54 = vpop.f32.mrf.mxu0  ;;  %v370_v51 = vpack.c.bf16 %v138_v48, %v137_v47  ;;  %v154_v52 = vld [vmem:[%s9286_s1 + $0x3f8] sm:$0xff] }
  0xae   :  { %v3191_v55 = vpop.f32.mrf.mxu1  ;;  %3825 = vmatpush.bf16.msra.mxu2 %v370_v51 }
  0xaf   :  { %v7921_v56 = vadd.f32 %v3191_v55, %v3062_v54  ;;  %v378_v55 = vpack.c.bf16 %v154_v52, %v153_v49 }
  0xb1   :  { %3954 = vmatpush.bf16.msra.mxu3 %v378_v55 }
  0xb2   :  { %v3122_v7 = vpop.f32.mrf.mxu2 }
  0xb3   :  { %v3251_v8 = vpop.f32.mrf.mxu3 }
  0xb4   :  { %v7935_v11 = vadd.f32 %v3251_v8, %v3122_v7  ;;  %v3065_v12 = vpop.f32.mrf.mxu0  ;;  %v7353_v7 = vld [vmem:[#allocation2 + $0x634] sm:$0xf]  ;;  %v6223_v8 = vld [vmem:[#allocation2 + $0x678] sm:$0xf0] }
  0xb5   :  { %v6226_v18 = vor.u32 %v7353_v7, %v6223_v8 }
  0xb6   :  { %v3194_v15 = vpop.f32.mrf.mxu1 }
  0xb7   :  { %v7937_v16 = vadd.f32 %v3194_v15, %v3065_v12  ;;  %3164 = vmatmul.bf16.gmra.mxu2 %v6942_v9  ;;  %3104 = vmatmul.bf16.gmra.mxu0 %v6078_v10  ;;  %v7086_v12 = vor.u32 %v7578_v1, %v7085_v0  ;;  %v7183_v0 = vld [vmem:[#allocation2 + $0xdc] sm:$0xf0]  ;;  %v7174_v1 = vld [vmem:[#allocation2 + $0x9c] sm:$0xf] }
  0xb8   :  { %3293 = vmatmul.bf16.gmra.mxu3 %v6946_v13  ;;  %v6222_v13 = vor.u32 %v7362_v5, %v6221_v4  ;;  %v5511_v4 = vld [vmem:[#allocation2 + $0xe0] sm:$0xf0] }
  0xb9   :  { %3233 = vmatmul.bf16.gmra.mxu1 %v6082_v14  ;;  %v7175_v5 = vld [vmem:[#allocation2 + $0xa4] sm:$0xf] }
  0xba   :  { %v3125_v20 = vpop.f32.mrf.mxu2 }
  0xbb   :  { %v3254_v21 = vpop.f32.mrf.mxu3 }
  0xbc   :  { %v7945_v22 = vadd.f32 %v3254_v21, %v3125_v20  ;;  %v3067_v23 = vpop.f32.mrf.mxu0  ;;  %v186_v20 = vld [vmem:[%s9286_s1 + $0x4f8] sm:$0xff] }
  0xbe   :  { %v3196_v26 = vpop.f32.mrf.mxu1 }
  0xbf   :  { %v7953_v28 = vadd.f32 %v3196_v26, %v3067_v23  ;;  %v394_v23 = vpack.c.bf16 %v186_v20, %v185_v19  ;;  %v135_v20 = vld [vmem:[%s9286_s1 + $0x360] sm:$0xff] }
  0xc1   :  { %4212 = vmatpush.bf16.msra.mxu1 %v394_v23  ;;  %v151_v23 = vld [vmem:[%s9286_s1 + $0x3e0] sm:$0xff] }
  0xc2   :  { %v3127_v37 = vpop.f32.mrf.mxu2 }
  0xc3   :  { %v3256_v38 = vpop.f32.mrf.mxu3 }
  0xc4   :  { %v7955_v41 = vadd.f32 %v3256_v38, %v3127_v37  ;;  %v3070_v42 = vpop.f32.mrf.mxu0  ;;  %v5439_v37 = vld [vmem:[#allocation2 + $0x50] sm:$0xf0] }
  0xc5   :  { %v7157_v38 = vld [vmem:[#allocation2 + $0x14] sm:$0xf]  ;;  %v5442_v48 = vor.u32 %v7156_v34, %v5439_v37  ;;  %v167_v37 = vld [vmem:[%s9286_s1 + $0x460] sm:$0xff] }
  0xc6   :  { %v3199_v45 = vpop.f32.mrf.mxu1 }
  0xc7   :  { %v7957_v46 = vadd.f32 %v3199_v45, %v3070_v42  ;;  %3169 = vmatmul.bf16.gmra.mxu2 %v7014_v39  ;;  %3109 = vmatmul.bf16.gmra.mxu0 %v6150_v40  ;;  %v5447_v39 = vld [vmem:[#allocation2 + $0x58] sm:$0xf0] }
  0xc8   :  { %3298 = vmatmul.bf16.gmra.mxu3 %v7018_v43  ;;  %v5438_v43 = vor.u32 %v7165_v33, %v5437_v32  ;;  %v5450_v49 = vor.u32 %v7157_v38, %v5447_v39  ;;  %v168_v38 = vld [vmem:[%s9286_s1 + $0x468] sm:$0xff] }
  0xc9   :  { %3238 = vmatmul.bf16.gmra.mxu1 %v6154_v44  ;;  %v5446_v44 = vor.u32 %v7166_v36, %v5445_v35  ;;  %v5581_v39 = vld [vmem:[#allocation2 + $0x128] sm:$0xf] }
  0xca   :  { %v3130_v54 = vpop.f32.mrf.mxu2 }
  0xcb   :  { %v3259_v57 = vpop.f32.mrf.mxu3 }
  0xcc   :  { %v7971_v58 = vadd.f32 %v3259_v57, %v3130_v54  ;;  %v3072_v59 = vpop.f32.mrf.mxu0 }
  0xce   :  { %v3201_v60 = vpop.f32.mrf.mxu1 }
  0xcf   :  { %v7973_v61 = vadd.f32 %v3201_v60, %v3072_v59 }
  0xd2   :  { %v3132_v9 = vpop.f32.mrf.mxu2 }
  0xd3   :  { %v3261_v10 = vpop.f32.mrf.mxu3 }
  0xd4   :  { %v7981_v14 = vadd.f32 %v3261_v10, %v3132_v9  ;;  %v3075_v15 = vpop.f32.mrf.mxu0  ;;  %v5510_v9 = vor.u32 %v7183_v0, %v5509_v63  ;;  %v5518_v10 = vor.u32 %v7184_v3, %v5517_v2  ;;  %v183_v3 = vld [vmem:[%s9286_s1 + $0x4e0] sm:$0xff] }
  0xd6   :  { %v3204_v21 = vpop.f32.mrf.mxu1 }
  0xd7   :  { %v7989_v24 = vadd.f32 %v3204_v21, %v3075_v15  ;;  %3174 = vmatmul.bf16.gmra.mxu2 %v7086_v12  ;;  %3114 = vmatmul.bf16.gmra.mxu0 %v6222_v13  ;;  %v5514_v15 = vor.u32 %v7174_v1, %v5511_v4  ;;  %v136_v21 = vld [vmem:[%s9286_s1 + $0x368] sm:$0xff] }
  0xd8   :  { %3303 = vmatmul.bf16.gmra.mxu3 %v7090_v17  ;;  %v5522_v17 = vor.u32 %v7175_v5, %v5519_v6  ;;  %v184_v4 = vld [vmem:[%s9286_s1 + $0x4e8] sm:$0xff] }
  0xd9   :  { %3243 = vmatmul.bf16.gmra.mxu1 %v6226_v18  ;;  %v393_v6 = vpack.c.bf16 %v184_v4, %v183_v3  ;;  %v5727_v3 = vld [vmem:[#allocation2 + $0x290] sm:$0xf0] }
  0xda   :  { %v3135_v25 = vpop.f32.mrf.mxu2  ;;  %v7229_v4 = vld [vmem:[#allocation2 + $0x254] sm:$0xf] }
  0xdb   :  { %v3264_v26 = vpop.f32.mrf.mxu3  ;;  %4213 = vmatpush.bf16.msra.mxu1 %v393_v6 }
  0xdc   :  { %v7991_v27 = vadd.f32 %v3264_v26, %v3135_v25  ;;  %v3077_v29 = vpop.f32.mrf.mxu0  ;;  %v369_v25 = vpack.c.bf16 %v136_v21, %v135_v20  ;;  %v152_v26 = vld [vmem:[%s9286_s1 + $0x3e8] sm:$0xff]  ;;  %v7219_v20 = vld [vmem:[#allocation2 + $0x1fc] sm:$0xf0]  ;;  %v7210_v21 = vld [vmem:[#allocation2 + $0x1bc] sm:$0xf] }
  0xde   :  { %v3206_v30 = vpop.f32.mrf.mxu1  ;;  %3826 = vmatpush.bf16.msra.mxu2 %v369_v25  ;;  %v7220_v25 = vld [vmem:[#allocation2 + $0x204] sm:$0xf0] }
  0xdf   :  { %v7993_v31 = vadd.f32 %v3206_v30, %v3077_v29  ;;  %v377_v30 = vpack.c.bf16 %v152_v26, %v151_v23  ;;  %v5661_v23 = vld [vmem:[#allocation2 + $0x1c0] sm:$0xf]  ;;  %v5655_v26 = vld [vmem:[#allocation2 + $0x200] sm:$0xf0] }
  0xe1   :  { %3955 = vmatpush.bf16.msra.mxu3 %v377_v30  ;;  %v5663_v30 = vld [vmem:[#allocation2 + $0x208] sm:$0xf0] }
  0xe2   :  { %v3137_v40 = vpop.f32.mrf.mxu2 }
  0xe3   :  { %v3266_v42 = vpop.f32.mrf.mxu3 }
  0xe4   :  { %v7995_v45 = vadd.f32 %v3266_v42, %v3137_v40  ;;  %v3080_v47 = vpop.f32.mrf.mxu0  ;;  %v7201_v40 = vld [vmem:[#allocation2 + $0x16c] sm:$0xf0]  ;;  %v385_v42 = vpack.c.bf16 %v168_v38, %v167_v37  ;;  %v5662_v37 = vor.u32 %v7220_v25, %v5661_v23 }
  0xe6   :  { %v3209_v51 = vpop.f32.mrf.mxu1  ;;  %4084 = vmatpush.bf16.msra.mxu0 %v385_v42 }
  0xe7   :  { %v7997_v52 = vadd.f32 %v3209_v51, %v3080_v47  ;;  %3317 = vmatmul.bf16.vlgmr.msrb.gmra.mxu2 %v5438_v43  ;;  %3575 = vmatmul.bf16.vlgmr.msrb.gmra.mxu0 %v5446_v44  ;;  %v7192_v43 = vld [vmem:[#allocation2 + $0x12c] sm:$0xf]  ;;  %v5589_v44 = vld [vmem:[#allocation2 + $0x130] sm:$0xf]  ;;  %v7202_v47 = vld [vmem:[#allocation2 + $0x174] sm:$0xf0] }
  0xe8   :  { %3446 = vmatmul.bf16.vlgmr.msrb.gmra.mxu3 %v5442_v48  ;;  %v5583_v48 = vld [vmem:[#allocation2 + $0x170] sm:$0xf0]  ;;  %v5591_v51 = vld [vmem:[#allocation2 + $0x178] sm:$0xf0] }
  0xe9   :  { %3704 = vmatmul.bf16.vlgmr.msrb.gmra.mxu1 %v5450_v49  ;;  %v7193_v49 = vld [vmem:[#allocation2 + $0x134] sm:$0xf]  ;;  %v5586_v1 = vor.u32 %v7192_v43, %v5583_v48 }
  0xea   :  { %v3140_v54 = vpop.f32.mrf.mxu2  ;;  %v5594_v2 = vor.u32 %v7193_v49, %v5591_v51 }
  0xeb   :  { %v3269_v55 = vpop.f32.mrf.mxu3 }
  0xec   :  { %v7999_v57 = vadd.f32 %v3269_v55, %v3140_v54  ;;  %v3082_v59 = vpop.f32.mrf.mxu0 }
  0xee   :  { %v3211_v60 = vpop.f32.mrf.mxu1 }
  0xef   :  { %v8001_v62 = vadd.f32 %v3211_v60, %v3082_v59  ;;  %v5582_v59 = vor.u32 %v7201_v40, %v5581_v39  ;;  %v5590_v60 = vor.u32 %v7202_v47, %v5589_v44  ;;  %v5658_v40 = vor.u32 %v7210_v21, %v5655_v26  ;;  %v133_v26 = vld [vmem:[%s9286_s1 + $0x350] sm:$0xff] }
  0xf2   :  { %v3142_v7 = vpop.f32.mrf.mxu2 }
  0xf3   :  { %v3271_v8 = vpop.f32.mrf.mxu3 }
  0xf4   :  { %v8003_v12 = vadd.f32 %v3271_v8, %v3142_v7  ;;  %v3085_v13 = vpop.f32.mrf.mxu0 }
  0xf6   :  { %v3214_v18 = vpop.f32.mrf.mxu1 }
  0xf7   :  { %v8005_v19 = vadd.f32 %v3214_v18, %v3085_v13  ;;  %3322 = vmatmul.bf16.gmra.mxu2 %v5510_v9  ;;  %3580 = vmatmul.bf16.gmra.mxu0 %v5518_v10  ;;  %v5653_v18 = vld [vmem:[#allocation2 + $0x1b8] sm:$0xf] }
  0xf8   :  { %3451 = vmatmul.bf16.gmra.mxu3 %v5514_v15 }
  0xf9   :  { %3709 = vmatmul.bf16.gmra.mxu1 %v5522_v17 }
  0xfa   :  { %v3145_v29 = vpop.f32.mrf.mxu2 }
  0xfb   :  { %v3274_v32 = vpop.f32.mrf.mxu3 }
  0xfc   :  { %v8019_v33 = vadd.f32 %v3274_v32, %v3145_v29  ;;  %v3087_v34 = vpop.f32.mrf.mxu0  ;;  %v7211_v29 = vld [vmem:[#allocation2 + $0x1c4] sm:$0xf] }
  0xfd   :  { %v5666_v42 = vor.u32 %v7211_v29, %v5663_v30  ;;  %v134_v29 = vld [vmem:[%s9286_s1 + $0x358] sm:$0xff]  ;;  %v149_v30 = vld [vmem:[%s9286_s1 + $0x3d0] sm:$0xff] }
  0xfe   :  { %v3216_v35 = vpop.f32.mrf.mxu1 }
  0xff   :  { %v8021_v36 = vadd.f32 %v3216_v35, %v3087_v34  ;;  %v5654_v35 = vor.u32 %v7219_v20, %v5653_v18 }
 0x102   :  { %v3147_v54 = vpop.f32.mrf.mxu2 }
 0x103   :  { %v3276_v55 = vpop.f32.mrf.mxu3 }
 0x104   :  { %v8029_v63 = vadd.f32 %v3276_v55, %v3147_v54  ;;  %v3090_v0 = vpop.f32.mrf.mxu0 }
 0x106   :  { %v3219_v5 = vpop.f32.mrf.mxu1 }
 0x107   :  { %v8037_v7 = vadd.f32 %v3219_v5, %v3090_v0  ;;  %3327 = vmatmul.bf16.gmra.mxu2 %v5582_v59  ;;  %3585 = vmatmul.bf16.gmra.mxu0 %v5590_v60  ;;  %v5725_v59 = vld [vmem:[#allocation2 + $0x248] sm:$0xf]  ;;  %v7237_v60 = vld [vmem:[#allocation2 + $0x28c] sm:$0xf0]  ;;  %v7228_v0 = vld [vmem:[#allocation2 + $0x24c] sm:$0xf] }
 0x108   :  { %3456 = vmatmul.bf16.gmra.mxu3 %v5586_v1  ;;  %v5733_v1 = vld [vmem:[#allocation2 + $0x250] sm:$0xf]  ;;  %v5735_v5 = vld [vmem:[#allocation2 + $0x298] sm:$0xf0]  ;;  %v5730_v20 = vor.u32 %v7228_v0, %v5727_v3  ;;  %v5799_v3 = vld [vmem:[#allocation2 + $0x320] sm:$0xf0] }
 0x109   :  { %3714 = vmatmul.bf16.gmra.mxu1 %v5594_v2  ;;  %v7238_v2 = vld [vmem:[#allocation2 + $0x294] sm:$0xf0]  ;;  %v5738_v21 = vor.u32 %v7229_v4, %v5735_v5  ;;  %v7246_v0 = vld [vmem:[#allocation2 + $0x2dc] sm:$0xf]  ;;  %v7247_v4 = vld [vmem:[#allocation2 + $0x2e4] sm:$0xf] }
 0x10a   :  { %v3150_v8 = vpop.f32.mrf.mxu2  ;;  %v5807_v5 = vld [vmem:[#allocation2 + $0x328] sm:$0xf0] }
 0x10b   :  { %v3279_v9 = vpop.f32.mrf.mxu3 }
 0x10c   :  { %v8039_v10 = vadd.f32 %v3279_v9, %v3150_v8  ;;  %v3092_v13 = vpop.f32.mrf.mxu0  ;;  %v5726_v9 = vor.u32 %v7237_v60, %v5725_v59  ;;  %v7255_v59 = vld [vmem:[#allocation2 + $0x31c] sm:$0xf0] }
 0x10e   :  { %v3221_v15 = vpop.f32.mrf.mxu1 }
 0x10f   :  { %v8041_v17 = vadd.f32 %v3221_v15, %v3092_v13  ;;  %v5734_v13 = vor.u32 %v7238_v2, %v5733_v1  ;;  %v5805_v1 = vld [vmem:[#allocation2 + $0x2e0] sm:$0xf]  ;;  %v7256_v2 = vld [vmem:[#allocation2 + $0x324] sm:$0xf0] }
 0x112   :  { %v3152_v32 = vpop.f32.mrf.mxu2 }
 0x113   :  { %v3281_v34 = vpop.f32.mrf.mxu3 }
 0x114   :  { %v8043_v38 = vadd.f32 %v3281_v34, %v3152_v32  ;;  %v3095_v39 = vpop.f32.mrf.mxu0  ;;  %v368_v32 = vpack.c.bf16 %v134_v29, %v133_v26  ;;  %v150_v34 = vld [vmem:[%s9286_s1 + $0x3d8] sm:$0xff]  ;;  %v181_v26 = vld [vmem:[%s9286_s1 + $0x4d0] sm:$0xff] }
 0x115   :  { %v182_v29 = vld [vmem:[%s9286_s1 + $0x4d8] sm:$0xff] }
 0x116   :  { %v3224_v43 = vpop.f32.mrf.mxu1  ;;  %3827 = vmatpush.bf16.msra.mxu2 %v368_v32  ;;  %v392_v32 = vpack.c.bf16 %v182_v29, %v181_v26 }
 0x117   :  { %v8045_v44 = vadd.f32 %v3224_v43, %v3095_v39  ;;  %3332 = vmatmul.bf16.gmra.mxu2 %v5654_v35  ;;  %3590 = vmatmul.bf16.gmra.mxu0 %v5662_v37  ;;  %v376_v37 = vpack.c.bf16 %v150_v34, %v149_v30 }
 0x118   :  { %3461 = vmatmul.bf16.gmra.mxu3 %v5658_v40  ;;  %4214 = vmatpush.bf16.msra.mxu1 %v392_v32 }
 0x119   :  { %3719 = vmatmul.bf16.gmra.mxu1 %v5666_v42  ;;  %3956 = vmatpush.bf16.msra.mxu3 %v376_v37 }
 0x11a   :  { %v3155_v47 = vpop.f32.mrf.mxu2 }
 0x11b   :  { %v3284_v48 = vpop.f32.mrf.mxu3 }
 0x11c   :  { %v8047_v49 = vadd.f32 %v3284_v48, %v3155_v47  ;;  %v3097_v51 = vpop.f32.mrf.mxu0  ;;  %v165_v48 = vld [vmem:[%s9286_s1 + $0x450] sm:$0xff] }
 0x11e   :  { %v3226_v54 = vpop.f32.mrf.mxu1 }
 0x11f   :  { %v8049_v55 = vadd.f32 %v3226_v54, %v3097_v51  ;;  %v166_v51 = vld [vmem:[%s9286_s1 + $0x458] sm:$0xff] }
 0x120   :  { %v5797_v54 = vld [vmem:[#allocation2 + $0x2d8] sm:$0xf]  ;;  %v384_v60 = vpack.c.bf16 %v166_v51, %v165_v48  ;;  %v5869_v51 = vld [vmem:[#allocation2 + $0x368] sm:$0xf] }
 0x122   :  { %v3157_v6 = vpop.f32.mrf.mxu2  ;;  %4085 = vmatpush.bf16.msra.mxu0 %v384_v60  ;;  %v5877_v60 = vld [vmem:[#allocation2 + $0x370] sm:$0xf] }
 0x123   :  { %v3286_v8 = vpop.f32.mrf.mxu3 }
 0x124   :  { %v8051_v15 = vadd.f32 %v3286_v8, %v3157_v6  ;;  %v3100_v18 = vpop.f32.mrf.mxu0 }
 0x126   :  { %v3229_v23 = vpop.f32.mrf.mxu1 }
 0x127   :  { %v8053_v25 = vadd.f32 %v3229_v23, %v3100_v18  ;;  %3337 = vmatmul.bf16.gmra.mxu2 %v5726_v9  ;;  %3595 = vmatmul.bf16.gmra.mxu0 %v5734_v13  ;;  %v5798_v9 = vor.u32 %v7255_v59, %v5797_v54  ;;  %v5806_v13 = vor.u32 %v7256_v2, %v5805_v1  ;;  %v7273_v54 = vld [vmem:[#allocation2 + $0x3ac] sm:$0xf0]  ;;  %v7264_v59 = vld [vmem:[#allocation2 + $0x36c] sm:$0xf]  ;;  %v5871_v1 = vld [vmem:[#allocation2 + $0x3b0] sm:$0xf0] }
 0x128   :  { %3466 = vmatmul.bf16.gmra.mxu3 %v5730_v20  ;;  %v5810_v23 = vor.u32 %v7247_v4, %v5807_v5  ;;  %v7265_v2 = vld [vmem:[#allocation2 + $0x374] sm:$0xf] }
 0x129   :  { %3724 = vmatmul.bf16.gmra.mxu1 %v5738_v21  ;;  %v5802_v21 = vor.u32 %v7246_v0, %v5799_v3  ;;  %v7274_v0 = vld [vmem:[#allocation2 + $0x3b4] sm:$0xf0]  ;;  %v5879_v3 = vld [vmem:[#allocation2 + $0x3b8] sm:$0xf0] }
 0x12a   :  { %v3160_v35 = vpop.f32.mrf.mxu2 }
 0x12b   :  { %v3289_v39 = vpop.f32.mrf.mxu3 }
 0x12c   :  { %v8067_v40 = vadd.f32 %v3289_v39, %v3160_v35  ;;  %v3102_v42 = vpop.f32.mrf.mxu0 }
 0x12e   :  { %9288 = vst [vmem:[#allocation5_spill] sm:$0xff] %v8067_v40  ;;  %v3231_v43 = vpop.f32.mrf.mxu1 }
 0x12f   :  { %v8069_v47 = vadd.f32 %v3231_v43, %v3102_v42 }
 0x132   :  { %v3162_v6 = vpop.f32.mrf.mxu2 }
 0x133   :  { %v3291_v8 = vpop.f32.mrf.mxu3 }
 0x134   :  { %v8077_v18 = vadd.f32 %v3291_v8, %v3162_v6  ;;  %v3105_v20 = vpop.f32.mrf.mxu0  ;;  %v5870_v6 = vor.u32 %v7273_v54, %v5869_v51  ;;  %v5878_v8 = vor.u32 %v7274_v0, %v5877_v60  ;;  %v7291_v51 = vld [vmem:[#allocation2 + $0x43c] sm:$0xf0]  ;;  %v7282_v54 = vld [vmem:[#allocation2 + $0x3fc] sm:$0xf]  ;;  %v7292_v60 = vld [vmem:[#allocation2 + $0x444] sm:$0xf0] }
 0x135   :  { %v5943_v0 = vld [vmem:[#allocation2 + $0x440] sm:$0xf0] }
 0x136   :  { %9289 = vst [vmem:[#allocation6_spill] sm:$0xff] %v8077_v18  ;;  %v3234_v30 = vpop.f32.mrf.mxu1 }
 0x137   :  { %v8085_v34 = vadd.f32 %v3234_v30, %v3105_v20  ;;  %3342 = vmatmul.bf16.gmra.mxu2 %v5798_v9  ;;  %3600 = vmatmul.bf16.gmra.mxu0 %v5806_v13  ;;  %v5874_v20 = vor.u32 %v7264_v59, %v5871_v1  ;;  %v5949_v59 = vld [vmem:[#allocation2 + $0x400] sm:$0xf]  ;;  %v7283_v1 = vld [vmem:[#allocation2 + $0x404] sm:$0xf] }
 0x138   :  { %3471 = vmatmul.bf16.gmra.mxu3 %v5802_v21  ;;  %v5882_v21 = vor.u32 %v7265_v2, %v5879_v3  ;;  %v5951_v2 = vld [vmem:[#allocation2 + $0x448] sm:$0xf0] }
 0x139   :  { %3729 = vmatmul.bf16.gmra.mxu1 %v5810_v23 }
 0x13a   :  { %v3165_v35 = vpop.f32.mrf.mxu2 }
 0x13b   :  { %v3294_v37 = vpop.f32.mrf.mxu3 }
 0x13c   :  { %v8087_v39 = vadd.f32 %v3294_v37, %v3165_v35  ;;  %v3107_v42 = vpop.f32.mrf.mxu0 }
 0x13e   :  { %9290 = vst [vmem:[#allocation7_spill] sm:$0xff] %v8087_v39  ;;  %v3236_v43 = vpop.f32.mrf.mxu1  ;;  %v6095_v39 = vld [vmem:[#allocation2 + $0x568] sm:$0xf0] }
 0x13f   :  { %v8089_v48 = vadd.f32 %v3236_v43, %v3107_v42  ;;  %v5941_v43 = vld [vmem:[#allocation2 + $0x3f8] sm:$0xf] }
 0x142   :  { %v3167_v4 = vpop.f32.mrf.mxu2 }
 0x143   :  { %v3296_v5 = vpop.f32.mrf.mxu3 }
 0x144   :  { %v8091_v9 = vadd.f32 %v3296_v5, %v3167_v4  ;;  %v3110_v13 = vpop.f32.mrf.mxu0  ;;  %v5942_v5 = vor.u32 %v7291_v51, %v5941_v43  ;;  %v148_v51 = vld [vmem:[%s9286_s1 + $0x3c8] sm:$0xff] }
 0x146   :  { %9291 = vst [vmem:[#allocation8_spill] sm:$0xff] %v8091_v9  ;;  %v3239_v23 = vpop.f32.mrf.mxu1  ;;  %v7319_v9 = vld [vmem:[#allocation2 + $0x524] sm:$0xf] }
 0x147   :  { %v8093_v26 = vadd.f32 %v3239_v23, %v3110_v13  ;;  %3347 = vmatmul.bf16.gmra.mxu2 %v5870_v6  ;;  %3605 = vmatmul.bf16.gmra.mxu0 %v5878_v8  ;;  %v5950_v6 = vor.u32 %v7292_v60, %v5949_v59 }
 0x148   :  { %3476 = vmatmul.bf16.gmra.mxu3 %v5874_v20  ;;  %v5946_v20 = vor.u32 %v7282_v54, %v5943_v0 }
 0x149   :  { %3734 = vmatmul.bf16.gmra.mxu1 %v5882_v21  ;;  %v5954_v21 = vor.u32 %v7283_v1, %v5951_v2 }
 0x14a   :  { %v3170_v29 = vpop.f32.mrf.mxu2 }
 0x14b   :  { %v3299_v30 = vpop.f32.mrf.mxu3 }
 0x14c   :  { %v8095_v32 = vadd.f32 %v3299_v30, %v3170_v29  ;;  %v3112_v35 = vpop.f32.mrf.mxu0  ;;  %v131_v30 = vld [vmem:[%s9286_s1 + $0x340] sm:$0xff] }
 0x14e   :  { %9292 = vst [vmem:[#allocation9_spill] sm:$0xff] %v8095_v32  ;;  %v3241_v37 = vpop.f32.mrf.mxu1 }
 0x14f   :  { %v8097_v42 = vadd.f32 %v3241_v37, %v3112_v35  ;;  %v132_v35 = vld [vmem:[%s9286_s1 + $0x348] sm:$0xff]  ;;  %v147_v37 = vld [vmem:[%s9286_s1 + $0x3c0] sm:$0xff] }
 0x150   :  { %v367_v43 = vpack.c.bf16 %v132_v35, %v131_v30  ;;  %v375_v59 = vpack.c.bf16 %v148_v51, %v147_v37  ;;  %v6015_v35 = vld [vmem:[#allocation2 + $0x4d0] sm:$0xf0] }
 0x151   :  { %v7301_v37 = vld [vmem:[#allocation2 + $0x494] sm:$0xf] }
 0x152   :  { %v3172_v3 = vpop.f32.mrf.mxu2  ;;  %3828 = vmatpush.bf16.msra.mxu2 %v367_v43  ;;  %3957 = vmatpush.bf16.msra.mxu3 %v375_v59  ;;  %v6023_v43 = vld [vmem:[#allocation2 + $0x4d8] sm:$0xf0] }
 0x153   :  { %v3301_v4 = vpop.f32.mrf.mxu3 }
 0x154   :  { %v8099_v8 = vadd.f32 %v3301_v4, %v3172_v3  ;;  %v3115_v13 = vpop.f32.mrf.mxu0  ;;  %v6013_v4 = vld [vmem:[#allocation2 + $0x488] sm:$0xf] }
 0x156   :  { %9293 = vst [vmem:[#allocation10_spill] sm:$0xff] %v8099_v8  ;;  %v3244_v23 = vpop.f32.mrf.mxu1  ;;  %v6026_v8 = vor.u32 %v7301_v37, %v6023_v43  ;;  %v6085_v43 = vld [vmem:[#allocation2 + $0x518] sm:$0xf] }
 0x157   :  { %v8101_v29 = vadd.f32 %v3244_v23, %v3115_v13  ;;  %3352 = vmatmul.bf16.gmra.mxu2 %v5942_v5  ;;  %3610 = vmatmul.bf16.gmra.mxu0 %v5950_v6  ;;  %v7309_v5 = vld [vmem:[#allocation2 + $0x4cc] sm:$0xf0]  ;;  %v163_v6 = vld [vmem:[%s9286_s1 + $0x440] sm:$0xff]  ;;  %v164_v13 = vld [vmem:[%s9286_s1 + $0x448] sm:$0xff] }
 0x158   :  { %3481 = vmatmul.bf16.gmra.mxu3 %v5946_v20  ;;  %v7300_v20 = vld [vmem:[#allocation2 + $0x48c] sm:$0xf]  ;;  %v7310_v23 = vld [vmem:[#allocation2 + $0x4d4] sm:$0xf0]  ;;  %v383_v30 = vpack.c.bf16 %v164_v13, %v163_v6  ;;  %v6014_v59 = vor.u32 %v7309_v5, %v6013_v4  ;;  %v179_v6 = vld [vmem:[%s9286_s1 + $0x4c0] sm:$0xff] }
 0x159   :  { %3739 = vmatmul.bf16.gmra.mxu1 %v5954_v21  ;;  %v6021_v21 = vld [vmem:[#allocation2 + $0x490] sm:$0xf]  ;;  %v180_v13 = vld [vmem:[%s9286_s1 + $0x4c8] sm:$0xff] }
 0x15a   :  { %v3175_v54 = vpop.f32.mrf.mxu2  ;;  %4086 = vmatpush.bf16.msra.mxu0 %v383_v30  ;;  %v391_v4 = vpack.c.bf16 %v180_v13, %v179_v6 }
 0x15b   :  { %v3304_v60 = vpop.f32.mrf.mxu3 }
 0x15c   :  { %v8115_v0 = vadd.f32 %v3304_v60, %v3175_v54  ;;  %v3117_v1 = vpop.f32.mrf.mxu0  ;;  %v6022_v60 = vor.u32 %v7310_v23, %v6021_v21  ;;  %4215 = vmatpush.bf16.msra.mxu1 %v391_v4 }
 0x15e   :  { %9294 = vst [vmem:[#allocation11_spill] sm:$0xff] %v8115_v0  ;;  %v3246_v2 = vpop.f32.mrf.mxu1  ;;  %v6018_v0 = vor.u32 %v7300_v20, %v6015_v35 }
 0x15f   :  { %v8117_v3 = vadd.f32 %v3246_v2, %v3117_v1 }
 0x162   :  { %v3177_v51 = vpop.f32.mrf.mxu2 }
 0x163   :  { %v3306_v54 = vpop.f32.mrf.mxu3 }
 0x164   :  { %v8125_v1 = vadd.f32 %v3306_v54, %v3177_v51  ;;  %v3576_v2 = vpop.f32.mrf.mxu0  ;;  %v7327_v51 = vld [vmem:[#allocation2 + $0x55c] sm:$0xf0]  ;;  %v7318_v54 = vld [vmem:[#allocation2 + $0x51c] sm:$0xf] }
 0x166   :  { %9295 = vst [vmem:[#allocation12_spill] sm:$0xff] %v8125_v1  ;;  %v3705_v32 = vpop.f32.mrf.mxu1  ;;  %v6087_v1 = vld [vmem:[#allocation2 + $0x560] sm:$0xf0] }
 0x167   :  { %3357 = vmatmul.bf16.gmra.mxu2 %v6014_v59  ;;  %3615 = vmatmul.bf16.gmra.mxu0 %v6022_v60  ;;  %v6093_v59 = vld [vmem:[#allocation2 + $0x520] sm:$0xf]  ;;  %v7328_v60 = vld [vmem:[#allocation2 + $0x564] sm:$0xf0] }
 0x168   :  { %3486 = vmatmul.bf16.gmra.mxu3 %v6018_v0  ;;  %v6094_v4 = vor.u32 %v7328_v60, %v6093_v59  ;;  %v6157_v59 = vld [vmem:[#allocation2 + $0x5a8] sm:$0xf]  ;;  %v7337_v60 = vld [vmem:[#allocation2 + $0x5b4] sm:$0xf] }
 0x169   :  { %3744 = vmatmul.bf16.gmra.mxu1 %v6026_v8 }
 0x16a   :  { %v3318_v5 = vpop.f32.mrf.mxu2 }
 0x16b   :  { %v3319_v21 = vadd.f32 %v3318_v5, %v7917_v50  ;;  %v3447_v20 = vpop.f32.mrf.mxu3  ;;  %v6086_v50 = vor.u32 %v7327_v51, %v6085_v43 }
 0x16c   :  { %v3578_v23 = vpop.f32.mrf.mxu0 }
 0x16d   :  { %v3448_v30 = vadd.f32 %v3447_v20, %v3319_v21  ;;  %v6090_v21 = vor.u32 %v7318_v54, %v6087_v1  ;;  %v6098_v20 = vor.u32 %v7319_v9, %v6095_v39  ;;  %v7345_v1 = vld [vmem:[#allocation2 + $0x5ec] sm:$0xf0]  ;;  %v7336_v39 = vld [vmem:[#allocation2 + $0x5ac] sm:$0xf]  ;;  %v7346_v54 = vld [vmem:[#allocation2 + $0x5f4] sm:$0xf0] }
 0x16e   :  { %v3707_v35 = vpop.f32.mrf.mxu1  ;;  %v6165_v9 = vld [vmem:[#allocation2 + $0x5b0] sm:$0xf] }
 0x16f   :  { %v3577_v37 = vadd.f32 %v3576_v2, %v3448_v30 }
 0x171   :  { %v8134_v0 = vadd.f32 %v3705_v32, %v3577_v37 }
 0x172   :  { %v3320_v8 = vpop.f32.mrf.mxu2 }
 0x173   :  { %9296 = vst [vmem:[#allocation13_spill] sm:$0xff] %v8134_v0  ;;  %v3321_v6 = vadd.f32 %v3320_v8, %v7921_v56  ;;  %v3449_v13 = vpop.f32.mrf.mxu3 }
 0x174   :  { %v3581_v5 = vpop.f32.mrf.mxu0 }
 0x175   :  { %v3450_v2 = vadd.f32 %v3449_v13, %v3321_v6  ;;  %v6167_v6 = vld [vmem:[#allocation2 + $0x5f8] sm:$0xf0] }
 0x176   :  { %v3710_v30 = vpop.f32.mrf.mxu1 }
 0x177   :  { %v3579_v18 = vadd.f32 %v3578_v23, %v3450_v2  ;;  %3362 = vmatmul.bf16.gmra.mxu2 %v6086_v50  ;;  %3620 = vmatmul.bf16.gmra.mxu0 %v6094_v4  ;;  %v6159_v23 = vld [vmem:[#allocation2 + $0x5f0] sm:$0xf0]  ;;  %v6166_v4 = vor.u32 %v7346_v54, %v6165_v9 }
 0x178   :  { %3491 = vmatmul.bf16.gmra.mxu3 %v6090_v21 }
 0x179   :  { %3749 = vmatmul.bf16.gmra.mxu1 %v6098_v20  ;;  %v8137_v40 = vadd.f32 %v3707_v35, %v3579_v18  ;;  %v6170_v20 = vor.u32 %v7337_v60, %v6167_v6  ;;  %v6229_v6 = vld [vmem:[#allocation2 + $0x638] sm:$0xf] }
 0x17a   :  { %v3323_v32 = vpop.f32.mrf.mxu2 }
 0x17b   :  { %v3324_v37 = vadd.f32 %v3323_v32, %v7937_v16  ;;  %v3452_v0 = vpop.f32.mrf.mxu3  ;;  %v6158_v16 = vor.u32 %v7345_v1, %v6157_v59 }
 0x17c   :  { %v3583_v56 = vpop.f32.mrf.mxu0 }
 0x17d   :  { %v3453_v8 = vadd.f32 %v3452_v0, %v3324_v37  ;;  %v6162_v0 = vor.u32 %v7336_v39, %v6159_v23  ;;  %v145_v37 = vld [vmem:[%s9286_s1 + $0x3b0] sm:$0xff] }
 0x17e   :  { %v3712_v43 = vpop.f32.mrf.mxu1 }
 0x17f   :  { %v3582_v51 = vadd.f32 %v3581_v5, %v3453_v8 }
 0x181   :  { %v8140_v13 = vadd.f32 %v3710_v30, %v3582_v51  ;;  %v129_v30 = vld [vmem:[%s9286_s1 + $0x330] sm:$0xff] }
 0x182   :  { %v3325_v18 = vpop.f32.mrf.mxu2 }
 0x183   :  { %v3326_v35 = vadd.f32 %v3325_v18, %v7953_v28  ;;  %v3454_v50 = vpop.f32.mrf.mxu3  ;;  %v130_v28 = vld [vmem:[%s9286_s1 + $0x338] sm:$0xff] }
 0x184   :  { %v3586_v21 = vpop.f32.mrf.mxu0  ;;  %v366_v8 = vpack.c.bf16 %v130_v28, %v129_v30 }
 0x185   :  { %v3455_v5 = vadd.f32 %v3454_v50, %v3326_v35  ;;  %v7363_v35 = vld [vmem:[#allocation2 + $0x67c] sm:$0xf0]  ;;  %v161_v50 = vld [vmem:[%s9286_s1 + $0x430] sm:$0xff] }
 0x186   :  { %v3715_v2 = vpop.f32.mrf.mxu1  ;;  %3829 = vmatpush.bf16.msra.mxu2 %v366_v8  ;;  %v6230_v8 = vor.u32 %v7363_v35, %v6229_v6 }
 0x187   :  { %v3584_v32 = vadd.f32 %v3583_v56, %v3455_v5  ;;  %3367 = vmatmul.bf16.gmra.mxu2 %v6158_v16  ;;  %3625 = vmatmul.bf16.gmra.mxu0 %v6166_v4  ;;  %v146_v56 = vld [vmem:[%s9286_s1 + $0x3b8] sm:$0xff]  ;;  %v6237_v4 = vld [vmem:[#allocation2 + $0x640] sm:$0xf]  ;;  %v7355_v5 = vld [vmem:[#allocation2 + $0x644] sm:$0xf] }
 0x188   :  { %3496 = vmatmul.bf16.gmra.mxu3 %v6162_v0  ;;  %v374_v1 = vpack.c.bf16 %v146_v56, %v145_v37  ;;  %v7354_v16 = vld [vmem:[#allocation2 + $0x63c] sm:$0xf] }
 0x189   :  { %3754 = vmatmul.bf16.gmra.mxu1 %v6170_v20  ;;  %v8155_v51 = vadd.f32 %v3712_v43, %v3584_v32  ;;  %v162_v43 = vld [vmem:[%s9286_s1 + $0x438] sm:$0xff]  ;;  %v6231_v20 = vld [vmem:[#allocation2 + $0x680] sm:$0xf0]  ;;  %v6239_v32 = vld [vmem:[#allocation2 + $0x688] sm:$0xf0] }
 0x18a   :  { %v3328_v59 = vpop.f32.mrf.mxu2  ;;  %3958 = vmatpush.bf16.msra.mxu3 %v374_v1  ;;  %v382_v0 = vpack.c.bf16 %v162_v43, %v161_v50  ;;  %v6234_v1 = vor.u32 %v7354_v16, %v6231_v20  ;;  %v7381_v20 = vld [vmem:[#allocation2 + $0x70c] sm:$0xf0] }
 0x18b   :  { %9297 = vst [vmem:[#allocation14_spill] sm:$0xff] %v8155_v51  ;;  %v3329_v39 = vadd.f32 %v3328_v59, %v7957_v46  ;;  %v3457_v9 = vpop.f32.mrf.mxu3  ;;  %v7364_v46 = vld [vmem:[#allocation2 + $0x684] sm:$0xf0] }
 0x18c   :  { %v3588_v54 = vpop.f32.mrf.mxu0  ;;  %4087 = vmatpush.bf16.msra.mxu0 %v382_v0  ;;  %v6238_v56 = vor.u32 %v7364_v46, %v6237_v4  ;;  %v6301_v0 = vld [vmem:[#allocation2 + $0x6c8] sm:$0xf] }
 0x18d   :  { %v3458_v23 = vadd.f32 %v3457_v9, %v3329_v39  ;;  %v6242_v39 = vor.u32 %v7355_v5, %v6239_v32  ;;  %v7372_v5 = vld [vmem:[#allocation2 + $0x6cc] sm:$0xf]  ;;  %v6309_v32 = vld [vmem:[#allocation2 + $0x6d0] sm:$0xf] }
 0x18e   :  { %v3717_v60 = vpop.f32.mrf.mxu1 }
 0x18f   :  { %v3587_v18 = vadd.f32 %v3586_v21, %v3458_v23 }
 0x191   :  { %v8164_v30 = vadd.f32 %v3715_v2, %v3587_v18  ;;  %v177_v2 = vld [vmem:[%s9286_s1 + $0x4b0] sm:$0xff]  ;;  %v178_v18 = vld [vmem:[%s9286_s1 + $0x4b8] sm:$0xff] }
 0x192   :  { %v3330_v28 = vpop.f32.mrf.mxu2 }
 0x193   :  { %v3331_v21 = vadd.f32 %v3330_v28, %v7973_v61  ;;  %v3459_v37 = vpop.f32.mrf.mxu3  ;;  %v390_v61 = vpack.c.bf16 %v178_v18, %v177_v2  ;;  %v7382_v28 = vld [vmem:[#allocation2 + $0x714] sm:$0xf0] }
 0x194   :  { %v3591_v59 = vpop.f32.mrf.mxu0 }
 0x195   :  { %v3460_v9 = vadd.f32 %v3459_v37, %v3331_v21  ;;  %4216 = vmatpush.bf16.msra.mxu1 %v390_v61  ;;  %v6303_v21 = vld [vmem:[#allocation2 + $0x710] sm:$0xf0] }
 0x196   :  { %v3720_v23 = vpop.f32.mrf.mxu1  ;;  %v7373_v37 = vld [vmem:[#allocation2 + $0x6d4] sm:$0xf]  ;;  %v6306_v2 = vor.u32 %v7372_v5, %v6303_v21  ;;  %v7399_v5 = vld [vmem:[#allocation2 + $0x79c] sm:$0xf0] }
 0x197   :  { %v3589_v51 = vadd.f32 %v3588_v54, %v3460_v9  ;;  %3372 = vmatmul.bf16.gmra.mxu2 %v6230_v8  ;;  %3630 = vmatmul.bf16.gmra.mxu0 %v6238_v56  ;;  %v6311_v8 = vld [vmem:[#allocation2 + $0x718] sm:$0xf0]  ;;  %v6381_v21 = vld [vmem:[#allocation2 + $0x760] sm:$0xf] }
 0x198   :  { %3501 = vmatmul.bf16.gmra.mxu3 %v6234_v1  ;;  %v6314_v18 = vor.u32 %v7373_v37, %v6311_v8  ;;  %v7400_v37 = vld [vmem:[#allocation2 + $0x7a4] sm:$0xf0]  ;;  %v7391_v8 = vld [vmem:[#allocation2 + $0x764] sm:$0xf] }
 0x199   :  { %3759 = vmatmul.bf16.gmra.mxu1 %v6242_v39  ;;  %v8173_v6 = vadd.f32 %v3717_v60, %v3589_v51  ;;  %v6310_v39 = vor.u32 %v7382_v28, %v6309_v32  ;;  %v6373_v32 = vld [vmem:[#allocation2 + $0x758] sm:$0xf]  ;;  %v7390_v28 = vld [vmem:[#allocation2 + $0x75c] sm:$0xf] }
 0x19a   :  { %v3333_v35 = vpop.f32.mrf.mxu2 }
 0x19b   :  { %v3334_v50 = vadd.f32 %v3333_v35, %v7989_v24  ;;  %v3462_v54 = vpop.f32.mrf.mxu3  ;;  %v6302_v24 = vor.u32 %v7381_v20, %v6301_v0 }
 0x19c   :  { %v3593_v43 = vpop.f32.mrf.mxu0 }
 0x19d   :  { %v3463_v16 = vadd.f32 %v3462_v54, %v3334_v50 }
 0x19e   :  { %v3722_v4 = vpop.f32.mrf.mxu1 }
 0x19f   :  { %v3592_v46 = vadd.f32 %v3591_v59, %v3463_v16 }
 0x1a1   :  { %v8176_v56 = vadd.f32 %v3720_v23, %v3592_v46 }
 0x1a2   :  { %v3335_v51 = vpop.f32.mrf.mxu2 }
 0x1a3   :  { %v3336_v60 = vadd.f32 %v3335_v51, %v7993_v31  ;;  %v3464_v1 = vpop.f32.mrf.mxu3  ;;  %v6383_v51 = vld [vmem:[#allocation2 + $0x7a8] sm:$0xf0] }
 0x1a4   :  { %v3596_v9 = vpop.f32.mrf.mxu0 }
 0x1a5   :  { %v3465_v59 = vadd.f32 %v3464_v1, %v3336_v60 }
 0x1a6   :  { %v3725_v61 = vpop.f32.mrf.mxu1 }
 0x1a7   :  { %v3594_v35 = vadd.f32 %v3593_v43, %v3465_v59  ;;  %3377 = vmatmul.bf16.gmra.mxu2 %v6302_v24  ;;  %3635 = vmatmul.bf16.gmra.mxu0 %v6310_v39  ;;  %v6375_v43 = vld [vmem:[#allocation2 + $0x7a0] sm:$0xf0]  ;;  %v6382_v39 = vor.u32 %v7400_v37, %v6381_v21  ;;  %v6386_v59 = vor.u32 %v7391_v8, %v6383_v51  ;;  %v6445_v8 = vld [vmem:[#allocation2 + $0x7e8] sm:$0xf] }
 0x1a8   :  { %3506 = vmatmul.bf16.gmra.mxu3 %v6306_v2 }
 0x1a9   :  { %3764 = vmatmul.bf16.gmra.mxu1 %v6314_v18  ;;  %v8179_v50 = vadd.f32 %v3722_v4, %v3594_v35  ;;  %v6378_v18 = vor.u32 %v7390_v28, %v6375_v43 }
 0x1aa   :  { %v3338_v23 = vpop.f32.mrf.mxu2 }
 0x1ab   :  { %v3339_v54 = vadd.f32 %v3338_v23, %v7997_v52  ;;  %v3467_v16 = vpop.f32.mrf.mxu3  ;;  %v6374_v52 = vor.u32 %v7399_v5, %v6373_v32 }
 0x1ac   :  { %v3598_v31 = vpop.f32.mrf.mxu0 }
 0x1ad   :  { %v3468_v46 = vadd.f32 %v3467_v16, %v3339_v54  ;;  %v143_v54 = vld [vmem:[%s9286_s1 + $0x3a0] sm:$0xff] }
 0x1ae   :  { %v3727_v0 = vpop.f32.mrf.mxu1 }
 0x1af   :  { %v3597_v20 = vadd.f32 %v3596_v9, %v3468_v46 }
 0x1b1   :  { %v8182_v60 = vadd.f32 %v3725_v61, %v3597_v20  ;;  %v127_v61 = vld [vmem:[%s9286_s1 + $0x320] sm:$0xff] }
 0x1b2   :  { %v3340_v4 = vpop.f32.mrf.mxu2 }
 0x1b3   :  { %v3341_v1 = vadd.f32 %v3340_v4, %v8001_v62  ;;  %v3469_v24 = vpop.f32.mrf.mxu3  ;;  %v128_v62 = vld [vmem:[%s9286_s1 + $0x328] sm:$0xff]  ;;  %v7417_v4 = vld [vmem:[#allocation2 + $0x82c] sm:$0xf0] }
 0x1b4   :  { %v3601_v2 = vpop.f32.mrf.mxu0  ;;  %v365_v16 = vpack.c.bf16 %v128_v62, %v127_v61 }
 0x1b5   :  { %v3470_v9 = vadd.f32 %v3469_v24, %v3341_v1  ;;  %v159_v1 = vld [vmem:[%s9286_s1 + $0x420] sm:$0xff]  ;;  %v7408_v24 = vld [vmem:[#allocation2 + $0x7ec] sm:$0xf] }
 0x1b6   :  { %v3730_v35 = vpop.f32.mrf.mxu1  ;;  %3830 = vmatpush.bf16.msra.mxu2 %v365_v16 }
 0x1b7   :  { %v3599_v23 = vadd.f32 %v3598_v31, %v3470_v9  ;;  %3382 = vmatmul.bf16.gmra.mxu2 %v6374_v52  ;;  %3640 = vmatmul.bf16.gmra.mxu0 %v6382_v39  ;;  %v144_v31 = vld [vmem:[%s9286_s1 + $0x3a8] sm:$0xff]  ;;  %v6453_v52 = vld [vmem:[#allocation2 + $0x7f0] sm:$0xf]  ;;  %v6455_v9 = vld [vmem:[#allocation2 + $0x838] sm:$0xf0] }
 0x1b8   :  { %3511 = vmatmul.bf16.gmra.mxu3 %v6378_v18  ;;  %v373_v32 = vpack.c.bf16 %v144_v31, %v143_v54  ;;  %v6447_v18 = vld [vmem:[#allocation2 + $0x830] sm:$0xf0]  ;;  %v6446_v54 = vor.u32 %v7417_v4, %v6445_v8 }
 0x1b9   :  { %3769 = vmatmul.bf16.gmra.mxu1 %v6386_v59  ;;  %v8197_v46 = vadd.f32 %v3727_v0, %v3599_v23  ;;  %v160_v0 = vld [vmem:[%s9286_s1 + $0x428] sm:$0xff]  ;;  %v7409_v59 = vld [vmem:[#allocation2 + $0x7f4] sm:$0xf] }
 0x1ba   :  { %v3343_v20 = vpop.f32.mrf.mxu2  ;;  %3959 = vmatpush.bf16.msra.mxu3 %v373_v32  ;;  %v381_v39 = vpack.c.bf16 %v160_v0, %v159_v1  ;;  %v6458_v32 = vor.u32 %v7409_v59, %v6455_v9  ;;  %v7426_v59 = vld [vmem:[#allocation2 + $0x87c] sm:$0xf]  ;;  %v6525_v9 = vld [vmem:[#allocation2 + $0x880] sm:$0xf] }
 0x1bb   :  { %v3344_v5 = vadd.f32 %v3343_v20, %v8005_v19  ;;  %v3472_v28 = vpop.f32.mrf.mxu3  ;;  %v7418_v19 = vld [vmem:[#allocation2 + $0x834] sm:$0xf0]  ;;  %v6450_v20 = vor.u32 %v7408_v24, %v6447_v18  ;;  %v7435_v18 = vld [vmem:[#allocation2 + $0x8bc] sm:$0xf0] }
 0x1bc   :  { %v3603_v21 = vpop.f32.mrf.mxu0  ;;  %4088 = vmatpush.bf16.msra.mxu0 %v381_v39  ;;  %v6454_v16 = vor.u32 %v7418_v19, %v6453_v52  ;;  %v6517_v39 = vld [vmem:[#allocation2 + $0x878] sm:$0xf] }
 0x1bd   :  { %v3473_v37 = vadd.f32 %v3472_v28, %v3344_v5 }
 0x1be   :  { %v3732_v43 = vpop.f32.mrf.mxu1 }
 0x1bf   :  { %v3602_v51 = vadd.f32 %v3601_v2, %v3473_v37 }
 0x1c1   :  { %v8206_v23 = vadd.f32 %v3730_v35, %v3602_v51  ;;  %v175_v35 = vld [vmem:[%s9286_s1 + $0x4a0] sm:$0xff]  ;;  %v176_v51 = vld [vmem:[%s9286_s1 + $0x4a8] sm:$0xff] }
 0x1c2   :  { %v3345_v61 = vpop.f32.mrf.mxu2 }
 0x1c3   :  { %v3346_v2 = vadd.f32 %v3345_v61, %v8021_v36  ;;  %v3474_v62 = vpop.f32.mrf.mxu3  ;;  %v389_v36 = vpack.c.bf16 %v176_v51, %v175_v35  ;;  %v7436_v61 = vld [vmem:[#allocation2 + $0x8c4] sm:$0xf0] }
 0x1c4   :  { %v3606_v31 = vpop.f32.mrf.mxu0 }
 0x1c5   :  { %v3475_v5 = vadd.f32 %v3474_v62, %v3346_v2  ;;  %4217 = vmatpush.bf16.msra.mxu1 %v389_v36  ;;  %v6519_v2 = vld [vmem:[#allocation2 + $0x8c0] sm:$0xf0] }
 0x1c6   :  { %v3735_v28 = vpop.f32.mrf.mxu1  ;;  %v7427_v62 = vld [vmem:[#allocation2 + $0x884] sm:$0xf]  ;;  %v6522_v35 = vor.u32 %v7426_v59, %v6519_v2  ;;  %v7453_v59 = vld [vmem:[#allocation2 + $0x94c] sm:$0xf0] }
 0x1c7   :  { %v3604_v37 = vadd.f32 %v3603_v21, %v3475_v5  ;;  %3387 = vmatmul.bf16.gmra.mxu2 %v6446_v54  ;;  %3645 = vmatmul.bf16.gmra.mxu0 %v6454_v16  ;;  %v6527_v54 = vld [vmem:[#allocation2 + $0x8c8] sm:$0xf0]  ;;  %v6526_v5 = vor.u32 %v7436_v61, %v6525_v9  ;;  %v6589_v9 = vld [vmem:[#allocation2 + $0x908] sm:$0xf]  ;;  %v6597_v2 = vld [vmem:[#allocation2 + $0x910] sm:$0xf] }
 0x1c8   :  { %3516 = vmatmul.bf16.gmra.mxu3 %v6450_v20  ;;  %v6530_v51 = vor.u32 %v7427_v62, %v6527_v54  ;;  %v7444_v61 = vld [vmem:[#allocation2 + $0x90c] sm:$0xf]  ;;  %v7454_v62 = vld [vmem:[#allocation2 + $0x954] sm:$0xf0]  ;;  %v7445_v54 = vld [vmem:[#allocation2 + $0x914] sm:$0xf] }
 0x1c9   :  { %3774 = vmatmul.bf16.gmra.mxu1 %v6458_v32  ;;  %v8215_v8 = vadd.f32 %v3732_v43, %v3604_v37 }
 0x1ca   :  { %v3348_v4 = vpop.f32.mrf.mxu2 }
 0x1cb   :  { %v3349_v1 = vadd.f32 %v3348_v4, %v8037_v7  ;;  %v3477_v21 = vpop.f32.mrf.mxu3  ;;  %v6518_v7 = vor.u32 %v7435_v18, %v6517_v39 }
 0x1cc   :  { %v3608_v0 = vpop.f32.mrf.mxu0 }
 0x1cd   :  { %v3478_v24 = vadd.f32 %v3477_v21, %v3349_v1 }
 0x1ce   :  { %v3737_v52 = vpop.f32.mrf.mxu1 }
 0x1cf   :  { %v3607_v19 = vadd.f32 %v3606_v31, %v3478_v24 }
 0x1d1   :  { %v8218_v16 = vadd.f32 %v3735_v28, %v3607_v19 }
 0x1d2   :  { %v3350_v43 = vpop.f32.mrf.mxu2 }
 0x1d3   :  { %v3351_v20 = vadd.f32 %v3350_v43, %v8041_v17  ;;  %v3479_v32 = vpop.f32.mrf.mxu3  ;;  %v6599_v43 = vld [vmem:[#allocation2 + $0x958] sm:$0xf0] }
 0x1d4   :  { %v3611_v37 = vpop.f32.mrf.mxu0 }
 0x1d5   :  { %v3480_v31 = vadd.f32 %v3479_v32, %v3351_v20 }
 0x1d6   :  { %v3740_v36 = vpop.f32.mrf.mxu1 }
 0x1d7   :  { %v3609_v4 = vadd.f32 %v3608_v0, %v3480_v31  ;;  %3392 = vmatmul.bf16.gmra.mxu2 %v6518_v7  ;;  %3650 = vmatmul.bf16.gmra.mxu0 %v6526_v5  ;;  %v6591_v0 = vld [vmem:[#allocation2 + $0x950] sm:$0xf0]  ;;  %v6598_v5 = vor.u32 %v7454_v62, %v6597_v2  ;;  %v6602_v31 = vor.u32 %v7445_v54, %v6599_v43  ;;  %v6661_v54 = vld [vmem:[#allocation2 + $0x998] sm:$0xf] }
 0x1d8   :  { %3521 = vmatmul.bf16.gmra.mxu3 %v6522_v35 }
 0x1d9   :  { %3779 = vmatmul.bf16.gmra.mxu1 %v6530_v51  ;;  %v8221_v1 = vadd.f32 %v3737_v52, %v3609_v4  ;;  %v6594_v51 = vor.u32 %v7444_v61, %v6591_v0 }
 0x1da   :  { %v3353_v28 = vpop.f32.mrf.mxu2 }
 0x1db   :  { %v3354_v21 = vadd.f32 %v3353_v28, %v8045_v44  ;;  %v3482_v24 = vpop.f32.mrf.mxu3  ;;  %v6590_v44 = vor.u32 %v7453_v59, %v6589_v9 }
 0x1dc   :  { %v3613_v17 = vpop.f32.mrf.mxu0 }
 0x1dd   :  { %v3483_v19 = vadd.f32 %v3482_v24, %v3354_v21  ;;  %v141_v21 = vld [vmem:[%s9286_s1 + $0x390] sm:$0xff] }
 0x1de   :  { %v3742_v39 = vpop.f32.mrf.mxu1 }
 0x1df   :  { %v3612_v18 = vadd.f32 %v3611_v37, %v3483_v19 }
 0x1e1   :  { %v8224_v20 = vadd.f32 %v3740_v36, %v3612_v18  ;;  %v125_v36 = vld [vmem:[%s9286_s1 + $0x310] sm:$0xff] }
 0x1e2   :  { %v3355_v52 = vpop.f32.mrf.mxu2 }
 0x1e3   :  { %v3356_v32 = vadd.f32 %v3355_v52, %v8049_v55  ;;  %v3484_v7 = vpop.f32.mrf.mxu3  ;;  %v126_v55 = vld [vmem:[%s9286_s1 + $0x318] sm:$0xff]  ;;  %v7471_v52 = vld [vmem:[#allocation2 + $0x9dc] sm:$0xf0] }
 0x1e4   :  { %v3616_v35 = vpop.f32.mrf.mxu0  ;;  %v364_v24 = vpack.c.bf16 %v126_v55, %v125_v36 }
 0x1e5   :  { %v3485_v37 = vadd.f32 %v3484_v7, %v3356_v32  ;;  %v157_v32 = vld [vmem:[%s9286_s1 + $0x410] sm:$0xff]  ;;  %v7462_v7 = vld [vmem:[#allocation2 + $0x99c] sm:$0xf] }
 0x1e6   :  { %v3745_v4 = vpop.f32.mrf.mxu1  ;;  %3831 = vmatpush.bf16.msra.mxu2 %v364_v24 }
 0x1e7   :  { %v3614_v28 = vadd.f32 %v3613_v17, %v3485_v37  ;;  %3397 = vmatmul.bf16.gmra.mxu2 %v6590_v44  ;;  %3655 = vmatmul.bf16.gmra.mxu0 %v6598_v5  ;;  %v142_v17 = vld [vmem:[%s9286_s1 + $0x398] sm:$0xff]  ;;  %v6669_v44 = vld [vmem:[#allocation2 + $0x9a0] sm:$0xf]  ;;  %v6671_v37 = vld [vmem:[#allocation2 + $0x9e8] sm:$0xf0] }
 0x1e8   :  { %3526 = vmatmul.bf16.gmra.mxu3 %v6594_v51  ;;  %v372_v9 = vpack.c.bf16 %v142_v17, %v141_v21  ;;  %v6663_v51 = vld [vmem:[#allocation2 + $0x9e0] sm:$0xf0]  ;;  %v6662_v21 = vor.u32 %v7471_v52, %v6661_v54 }
 0x1e9   :  { %3784 = vmatmul.bf16.gmra.mxu1 %v6602_v31  ;;  %v8239_v19 = vadd.f32 %v3742_v39, %v3614_v28  ;;  %v158_v39 = vld [vmem:[%s9286_s1 + $0x418] sm:$0xff]  ;;  %v7463_v31 = vld [vmem:[#allocation2 + $0x9a4] sm:$0xf] }
 0x1ea   :  { %v3358_v18 = vpop.f32.mrf.mxu2  ;;  %3960 = vmatpush.bf16.msra.mxu3 %v372_v9  ;;  %v380_v5 = vpack.c.bf16 %v158_v39, %v157_v32  ;;  %v6674_v9 = vor.u32 %v7463_v31, %v6671_v37  ;;  %v7480_v31 = vld [vmem:[#allocation2 + $0xa2c] sm:$0xf]  ;;  %v6741_v37 = vld [vmem:[#allocation2 + $0xa30] sm:$0xf] }
 0x1eb   :  { %v3359_v59 = vadd.f32 %v3358_v18, %v8053_v25  ;;  %v3487_v61 = vpop.f32.mrf.mxu3  ;;  %v7472_v25 = vld [vmem:[#allocation2 + $0x9e4] sm:$0xf0]  ;;  %v6666_v18 = vor.u32 %v7462_v7, %v6663_v51  ;;  %v7489_v51 = vld [vmem:[#allocation2 + $0xa6c] sm:$0xf0] }
 0x1ec   :  { %v3618_v2 = vpop.f32.mrf.mxu0  ;;  %4089 = vmatpush.bf16.msra.mxu0 %v380_v5  ;;  %v6670_v24 = vor.u32 %v7472_v25, %v6669_v44  ;;  %v6733_v5 = vld [vmem:[#allocation2 + $0xa28] sm:$0xf] }
 0x1ed   :  { %v3488_v62 = vadd.f32 %v3487_v61, %v3359_v59 }
 0x1ee   :  { %v3747_v0 = vpop.f32.mrf.mxu1 }
 0x1ef   :  { %v3617_v43 = vadd.f32 %v3616_v35, %v3488_v62 }
 0x1f1   :  { %v8248_v28 = vadd.f32 %v3745_v4, %v3617_v43  ;;  %v173_v4 = vld [vmem:[%s9286_s1 + $0x490] sm:$0xff]  ;;  %v174_v43 = vld [vmem:[%s9286_s1 + $0x498] sm:$0xff] }
 0x1f2   :  { %v3360_v36 = vpop.f32.mrf.mxu2 }
 0x1f3   :  { %v3361_v35 = vadd.f32 %v3360_v36, %v8069_v47  ;;  %v3489_v55 = vpop.f32.mrf.mxu3  ;;  %v388_v47 = vpack.c.bf16 %v174_v43, %v173_v4  ;;  %v7490_v36 = vld [vmem:[#allocation2 + $0xa74] sm:$0xf0] }
 0x1f4   :  { %v3621_v17 = vpop.f32.mrf.mxu0 }
 0x1f5   :  { %v3490_v59 = vadd.f32 %v3489_v55, %v3361_v35  ;;  %4218 = vmatpush.bf16.msra.mxu1 %v388_v47  ;;  %v6735_v35 = vld [vmem:[#allocation2 + $0xa70] sm:$0xf0] }
 0x1f6   :  { %v3750_v61 = vpop.f32.mrf.mxu1  ;;  %v7481_v55 = vld [vmem:[#allocation2 + $0xa34] sm:$0xf]  ;;  %v6738_v4 = vor.u32 %v7480_v31, %v6735_v35  ;;  %v7507_v31 = vld [vmem:[#allocation2 + $0xafc] sm:$0xf0] }
 0x1f7   :  { %v3619_v62 = vadd.f32 %v3618_v2, %v3490_v59  ;;  %3402 = vmatmul.bf16.gmra.mxu2 %v6662_v21  ;;  %3660 = vmatmul.bf16.gmra.mxu0 %v6670_v24  ;;  %v6743_v21 = vld [vmem:[#allocation2 + $0xa78] sm:$0xf0]  ;;  %v6742_v59 = vor.u32 %v7490_v36, %v6741_v37  ;;  %v6805_v37 = vld [vmem:[#allocation2 + $0xab8] sm:$0xf]  ;;  %v6813_v35 = vld [vmem:[#allocation2 + $0xac0] sm:$0xf] }
 0x1f8   :  { %3531 = vmatmul.bf16.gmra.mxu3 %v6666_v18  ;;  %v6746_v43 = vor.u32 %v7481_v55, %v6743_v21  ;;  %v7498_v36 = vld [vmem:[#allocation2 + $0xabc] sm:$0xf]  ;;  %v7508_v55 = vld [vmem:[#allocation2 + $0xb04] sm:$0xf0]  ;;  %v7499_v21 = vld [vmem:[#allocation2 + $0xac4] sm:$0xf] }
 0x1f9   :  { %3789 = vmatmul.bf16.gmra.mxu1 %v6674_v9  ;;  %v8257_v54 = vadd.f32 %v3747_v0, %v3619_v62 }
 0x1fa   :  { %v3363_v52 = vpop.f32.mrf.mxu2 }
 0x1fb   :  { %v3364_v32 = vadd.f32 %v3363_v52, %v8085_v34  ;;  %v3492_v2 = vpop.f32.mrf.mxu3  ;;  %v6734_v34 = vor.u32 %v7489_v51, %v6733_v5 }
 0x1fc   :  { %v3623_v39 = vpop.f32.mrf.mxu0 }
 0x1fd   :  { %v3493_v7 = vadd.f32 %v3492_v2, %v3364_v32 }
 0x1fe   :  { %v3752_v44 = vpop.f32.mrf.mxu1 }
 0x1ff   :  { %v3622_v25 = vadd.f32 %v3621_v17, %v3493_v7 }
 0x201   :  { %v8260_v24 = vadd.f32 %v3750_v61, %v3622_v25 }
 0x202   :  { %v3365_v0 = vpop.f32.mrf.mxu2 }
 0x203   :  { %v3366_v18 = vadd.f32 %v3365_v0, %v8089_v48  ;;  %v3494_v9 = vpop.f32.mrf.mxu3  ;;  %v6815_v0 = vld [vmem:[#allocation2 + $0xb08] sm:$0xf0] }
 0x204   :  { %v3626_v62 = vpop.f32.mrf.mxu0 }
 0x205   :  { %v3495_v17 = vadd.f32 %v3494_v9, %v3366_v18 }
 0x206   :  { %v3755_v47 = vpop.f32.mrf.mxu1 }
 0x207   :  { %v3624_v52 = vadd.f32 %v3623_v39, %v3495_v17  ;;  %3407 = vmatmul.bf16.gmra.mxu2 %v6734_v34  ;;  %3665 = vmatmul.bf16.gmra.mxu0 %v6742_v59  ;;  %v6807_v39 = vld [vmem:[#allocation2 + $0xb00] sm:$0xf0]  ;;  %v6814_v59 = vor.u32 %v7508_v55, %v6813_v35  ;;  %v6818_v17 = vor.u32 %v7499_v21, %v6815_v0  ;;  %v6877_v21 = vld [vmem:[#allocation2 + $0xb48] sm:$0xf] }
 0x208   :  { %3536 = vmatmul.bf16.gmra.mxu3 %v6738_v4 }
 0x209   :  { %3794 = vmatmul.bf16.gmra.mxu1 %v6746_v43  ;;  %v8263_v32 = vadd.f32 %v3752_v44, %v3624_v52  ;;  %v6810_v43 = vor.u32 %v7498_v36, %v6807_v39 }
 0x20a   :  { %v3368_v61 = vpop.f32.mrf.mxu2 }
 0x20b   :  { %v3369_v2 = vadd.f32 %v3368_v61, %v8093_v26  ;;  %v3497_v7 = vpop.f32.mrf.mxu3  ;;  %v6806_v26 = vor.u32 %v7507_v31, %v6805_v37 }
 0x20c   :  { %v3628_v48 = vpop.f32.mrf.mxu0 }
 0x20d   :  { %v3498_v25 = vadd.f32 %v3497_v7, %v3369_v2  ;;  %v139_v2 = vld [vmem:[%s9286_s1 + $0x380] sm:$0xff] }
 0x20e   :  { %v3757_v5 = vpop.f32.mrf.mxu1 }
 0x20f   :  { %v3627_v51 = vadd.f32 %v3626_v62, %v3498_v25 }
 0x211   :  { %v8266_v18 = vadd.f32 %v3755_v47, %v3627_v51  ;;  %v123_v47 = vld [vmem:[%s9286_s1 + $0x300] sm:$0xff] }
 0x212   :  { %v3370_v44 = vpop.f32.mrf.mxu2 }
 0x213   :  { %v3371_v9 = vadd.f32 %v3370_v44, %v8097_v42  ;;  %v3499_v34 = vpop.f32.mrf.mxu3  ;;  %v124_v42 = vld [vmem:[%s9286_s1 + $0x308] sm:$0xff]  ;;  %v7525_v44 = vld [vmem:[#allocation2 + $0xb8c] sm:$0xf0] }
 0x214   :  { %v3631_v4 = vpop.f32.mrf.mxu0  ;;  %v363_v7 = vpack.c.bf16 %v124_v42, %v123_v47 }
 0x215   :  { %v3500_v62 = vadd.f32 %v3499_v34, %v3371_v9  ;;  %v155_v9 = vld [vmem:[%s9286_s1 + $0x400] sm:$0xff]  ;;  %v7516_v34 = vld [vmem:[#allocation2 + $0xb4c] sm:$0xf] }
 0x216   :  { %v3760_v52 = vpop.f32.mrf.mxu1  ;;  %3832 = vmatpush.bf16.msra.mxu2 %v363_v7 }
 0x217   :  { %v3629_v61 = vadd.f32 %v3628_v48, %v3500_v62  ;;  %3412 = vmatmul.bf16.gmra.mxu2 %v6806_v26  ;;  %3670 = vmatmul.bf16.gmra.mxu0 %v6814_v59  ;;  %v140_v48 = vld [vmem:[%s9286_s1 + $0x388] sm:$0xff]  ;;  %v6885_v26 = vld [vmem:[#allocation2 + $0xb50] sm:$0xf]  ;;  %v6887_v62 = vld [vmem:[#allocation2 + $0xb98] sm:$0xf0] }
 0x218   :  { %3541 = vmatmul.bf16.gmra.mxu3 %v6810_v43  ;;  %v371_v37 = vpack.c.bf16 %v140_v48, %v139_v2  ;;  %v6879_v43 = vld [vmem:[#allocation2 + $0xb90] sm:$0xf0]  ;;  %v6878_v2 = vor.u32 %v7525_v44, %v6877_v21 }
 0x219   :  { %3799 = vmatmul.bf16.gmra.mxu1 %v6818_v17  ;;  %v8281_v25 = vadd.f32 %v3757_v5, %v3629_v61  ;;  %v156_v5 = vld [vmem:[%s9286_s1 + $0x408] sm:$0xff]  ;;  %v7517_v17 = vld [vmem:[#allocation2 + $0xb54] sm:$0xf] }
 0x21a   :  { %v3373_v51 = vpop.f32.mrf.mxu2  ;;  %3961 = vmatpush.bf16.msra.mxu3 %v371_v37  ;;  %v379_v59 = vpack.c.bf16 %v156_v5, %v155_v9  ;;  %v6890_v37 = vor.u32 %v7517_v17, %v6887_v62  ;;  %v7534_v17 = vld [vmem:[#allocation2 + $0xbdc] sm:$0xf]  ;;  %v6957_v62 = vld [vmem:[#allocation2 + $0xbe0] sm:$0xf] }
 0x21b   :  { %v3374_v31 = vadd.f32 %v3373_v51, %v8101_v29  ;;  %v3502_v36 = vpop.f32.mrf.mxu3  ;;  %v7526_v29 = vld [vmem:[#allocation2 + $0xb94] sm:$0xf0]  ;;  %v6882_v51 = vor.u32 %v7516_v34, %v6879_v43  ;;  %v7543_v43 = vld [vmem:[#allocation2 + $0xc1c] sm:$0xf0] }
 0x21c   :  { %v3633_v35 = vpop.f32.mrf.mxu0  ;;  %4090 = vmatpush.bf16.msra.mxu0 %v379_v59  ;;  %v6886_v7 = vor.u32 %v7526_v29, %v6885_v26  ;;  %v6949_v59 = vld [vmem:[#allocation2 + $0xbd8] sm:$0xf] }
 0x21d   :  { %v3503_v55 = vadd.f32 %v3502_v36, %v3374_v31 }
 0x21e   :  { %v3762_v39 = vpop.f32.mrf.mxu1 }
 0x21f   :  { %v3632_v0 = vadd.f32 %v3631_v4, %v3503_v55 }
 0x221   :  { %v8290_v61 = vadd.f32 %v3760_v52, %v3632_v0  ;;  %v171_v52 = vld [vmem:[%s9286_s1 + $0x480] sm:$0xff]  ;;  %v172_v0 = vld [vmem:[%s9286_s1 + $0x488] sm:$0xff] }
 0x222   :  { %v3375_v47 = vpop.f32.mrf.mxu2 }
 0x223   :  { %v3376_v4 = vadd.f32 %v3375_v47, %v8117_v3  ;;  %v3504_v42 = vpop.f32.mrf.mxu3  ;;  %v387_v3 = vpack.c.bf16 %v172_v0, %v171_v52  ;;  %v7544_v47 = vld [vmem:[#allocation2 + $0xc24] sm:$0xf0] }
 0x224   :  { %v3636_v48 = vpop.f32.mrf.mxu0 }
 0x225   :  { %v3505_v31 = vadd.f32 %v3504_v42, %v3376_v4  ;;  %4219 = vmatpush.bf16.msra.mxu1 %v387_v3  ;;  %v6951_v4 = vld [vmem:[#allocation2 + $0xc20] sm:$0xf0] }
 0x226   :  { %v3765_v36 = vpop.f32.mrf.mxu1  ;;  %v7535_v42 = vld [vmem:[#allocation2 + $0xbe4] sm:$0xf]  ;;  %v6954_v52 = vor.u32 %v7534_v17, %v6951_v4  ;;  %v7561_v17 = vld [vmem:[#allocation2 + $0xcac] sm:$0xf0] }
 0x227   :  { %v3634_v55 = vadd.f32 %v3633_v35, %v3505_v31  ;;  %3417 = vmatmul.bf16.gmra.mxu2 %v6878_v2  ;;  %3675 = vmatmul.bf16.gmra.mxu0 %v6886_v7  ;;  %v6959_v2 = vld [vmem:[#allocation2 + $0xc28] sm:$0xf0]  ;;  %v6958_v31 = vor.u32 %v7544_v47, %v6957_v62  ;;  %v7021_v62 = vld [vmem:[#allocation2 + $0xc68] sm:$0xf]  ;;  %v7029_v4 = vld [vmem:[#allocation2 + $0xc70] sm:$0xf] }
 0x228   :  { %3546 = vmatmul.bf16.gmra.mxu3 %v6882_v51  ;;  %v6962_v0 = vor.u32 %v7535_v42, %v6959_v2  ;;  %v7552_v47 = vld [vmem:[#allocation2 + $0xc6c] sm:$0xf]  ;;  %v7562_v42 = vld [vmem:[#allocation2 + $0xcb4] sm:$0xf0]  ;;  %v7553_v2 = vld [vmem:[#allocation2 + $0xc74] sm:$0xf] }
 0x229   :  { %3804 = vmatmul.bf16.gmra.mxu1 %v6890_v37  ;;  %v8299_v21 = vadd.f32 %v3762_v39, %v3634_v55 }
 0x22a   :  { %v3378_v44 = vpop.f32.mrf.mxu2 }
 0x22b   :  { %v3379_v9 = vadd.f32 %v3378_v44, %v7919_v53  ;;  %v3507_v35 = vpop.f32.mrf.mxu3  ;;  %v6950_v53 = vor.u32 %v7543_v43, %v6949_v59 }
 0x22c   :  { %v3638_v5 = vpop.f32.mrf.mxu0 }
 0x22d   :  { %v3508_v34 = vadd.f32 %v3507_v35, %v3379_v9 }
 0x22e   :  { %v3767_v26 = vpop.f32.mrf.mxu1 }
 0x22f   :  { %v3637_v29 = vadd.f32 %v3636_v48, %v3508_v34 }
 0x231   :  { %v8302_v7 = vadd.f32 %v3765_v36, %v3637_v29 }
 0x232   :  { %v3380_v39 = vpop.f32.mrf.mxu2 }
 0x233   :  { %v3381_v51 = vadd.f32 %v3380_v39, %v7935_v11  ;;  %v3509_v37 = vpop.f32.mrf.mxu3  ;;  %v7031_v39 = vld [vmem:[#allocation2 + $0xcb8] sm:$0xf0] }
 0x234   :  { %v3641_v55 = vpop.f32.mrf.mxu0 }
 0x235   :  { %v3510_v48 = vadd.f32 %v3509_v37, %v3381_v51 }
 0x236   :  { %v3770_v3 = vpop.f32.mrf.mxu1 }
 0x237   :  { %v3639_v44 = vadd.f32 %v3638_v5, %v3510_v48  ;;  %3422 = vmatmul.bf16.gmra.mxu2 %v6950_v53  ;;  %3680 = vmatmul.bf16.gmra.mxu0 %v6958_v31  ;;  %v7023_v5 = vld [vmem:[#allocation2 + $0xcb0] sm:$0xf0]  ;;  %v7030_v31 = vor.u32 %v7562_v42, %v7029_v4  ;;  %v7034_v48 = vor.u32 %v7553_v2, %v7031_v39  ;;  %v7093_v2 = vld [vmem:[#allocation2 + $0xcf8] sm:$0xf] }
 0x238   :  { %3551 = vmatmul.bf16.gmra.mxu3 %v6954_v52 }
 0x239   :  { %3809 = vmatmul.bf16.gmra.mxu1 %v6962_v0  ;;  %v8305_v9 = vadd.f32 %v3767_v26, %v3639_v44  ;;  %v7026_v0 = vor.u32 %v7552_v47, %v7023_v5 }
 0x23a   :  { %v3383_v36 = vpop.f32.mrf.mxu2 }
 0x23b   :  { %v3384_v35 = vadd.f32 %v3383_v36, %v7945_v22  ;;  %v3512_v34 = vpop.f32.mrf.mxu3  ;;  %v7022_v22 = vor.u32 %v7561_v17, %v7021_v62 }
 0x23c   :  { %v3643_v11 = vpop.f32.mrf.mxu0 }
 0x23d   :  { %v3513_v29 = vadd.f32 %v3512_v34, %v3384_v35  ;;  %v217_v35 = vld [vmem:[%s9286_s1 + $0x5f0] sm:$0xff] }
 0x23e   :  { %v3772_v59 = vpop.f32.mrf.mxu1 }
 0x23f   :  { %v3642_v43 = vadd.f32 %v3641_v55, %v3513_v29 }
 0x241   :  { %v8308_v51 = vadd.f32 %v3770_v3, %v3642_v43  ;;  %v201_v3 = vld [vmem:[%s9286_s1 + $0x570] sm:$0xff] }
 0x242   :  { %v3385_v26 = vpop.f32.mrf.mxu2 }
 0x243   :  { %v3386_v37 = vadd.f32 %v3385_v26, %v7955_v41  ;;  %v3514_v53 = vpop.f32.mrf.mxu3  ;;  %v202_v41 = vld [vmem:[%s9286_s1 + $0x578] sm:$0xff]  ;;  %v7579_v26 = vld [vmem:[#allocation2 + $0xd3c] sm:$0xf0] }
 0x244   :  { %v3646_v52 = vpop.f32.mrf.mxu0  ;;  %v402_v34 = vpack.c.bf16 %v202_v41, %v201_v3 }
 0x245   :  { %v3515_v55 = vadd.f32 %v3514_v53, %v3386_v37  ;;  %v233_v37 = vld [vmem:[%s9286_s1 + $0x670] sm:$0xff]  ;;  %v7570_v53 = vld [vmem:[#allocation2 + $0xcfc] sm:$0xf] }
 0x246   :  { %v3775_v44 = vpop.f32.mrf.mxu1  ;;  %4341 = vmatpush.bf16.msrb.mxu2 %v402_v34 }
 0x247   :  { %v3644_v36 = vadd.f32 %v3643_v11, %v3515_v55  ;;  %3427 = vmatmul.bf16.gmra.mxu2 %v7022_v22  ;;  %3685 = vmatmul.bf16.gmra.mxu0 %v7030_v31  ;;  %v218_v11 = vld [vmem:[%s9286_s1 + $0x5f8] sm:$0xff]  ;;  %v7101_v22 = vld [vmem:[#allocation2 + $0xd00] sm:$0xf]  ;;  %v7103_v55 = vld [vmem:[#allocation2 + $0xd48] sm:$0xf0] }
 0x248   :  { %3556 = vmatmul.bf16.gmra.mxu3 %v7026_v0  ;;  %v410_v62 = vpack.c.bf16 %v218_v11, %v217_v35  ;;  %v7095_v0 = vld [vmem:[#allocation2 + $0xd40] sm:$0xf0]  ;;  %v7094_v35 = vor.u32 %v7579_v26, %v7093_v2 }
 0x249   :  { %3814 = vmatmul.bf16.gmra.mxu1 %v7034_v48  ;;  %v8323_v29 = vadd.f32 %v3772_v59, %v3644_v36  ;;  %v234_v59 = vld [vmem:[%s9286_s1 + $0x678] sm:$0xff]  ;;  %v7571_v48 = vld [vmem:[#allocation2 + $0xd04] sm:$0xf] }
 0x24a   :  { %v3388_v43 = vpop.f32.mrf.mxu2  ;;  %4470 = vmatpush.bf16.msrb.mxu3 %v410_v62  ;;  %v418_v31 = vpack.c.bf16 %v234_v59, %v233_v37  ;;  %v7106_v62 = vor.u32 %v7571_v48, %v7103_v55  ;;  %v7158_v48 = vld [vmem:[#allocation2 + $0x1c] sm:$0xf]  ;;  %v5461_v55 = vld [vmem:[#allocation2 + $0x20] sm:$0xf] }
 0x24b   :  { %v3389_v17 = vadd.f32 %v3388_v43, %v7971_v58  ;;  %v3517_v47 = vpop.f32.mrf.mxu3  ;;  %v7580_v58 = vld [vmem:[#allocation2 + $0xd44] sm:$0xf0]  ;;  %v7098_v43 = vor.u32 %v7570_v53, %v7095_v0  ;;  %v7167_v0 = vld [vmem:[#allocation2 + $0x5c] sm:$0xf0] }
 0x24c   :  { %v3648_v4 = vpop.f32.mrf.mxu0  ;;  %4599 = vmatpush.bf16.msrb.mxu0 %v418_v31  ;;  %v7102_v34 = vor.u32 %v7580_v58, %v7101_v22  ;;  %v5453_v31 = vld [vmem:[#allocation2 + $0x18] sm:$0xf] }
 0x24d   :  { %v3518_v42 = vadd.f32 %v3517_v47, %v3389_v17 }
 0x24e   :  { %v3777_v5 = vpop.f32.mrf.mxu1 }
 0x24f   :  { %v3647_v39 = vadd.f32 %v3646_v52, %v3518_v42 }
 0x251   :  { %v8332_v36 = vadd.f32 %v3775_v44, %v3647_v39  ;;  %v249_v44 = vld [vmem:[%s9286_s1 + $0x6f0] sm:$0xff]  ;;  %v250_v39 = vld [vmem:[%s9286_s1 + $0x6f8] sm:$0xff] }
 0x252   :  { %v3390_v3 = vpop.f32.mrf.mxu2 }
 0x253   :  { %v3391_v52 = vadd.f32 %v3390_v3, %v7981_v14  ;;  %v3519_v41 = vpop.f32.mrf.mxu3  ;;  %v426_v14 = vpack.c.bf16 %v250_v39, %v249_v44  ;;  %v7168_v3 = vld [vmem:[#allocation2 + $0x64] sm:$0xf0] }
 0x254   :  { %v3651_v11 = vpop.f32.mrf.mxu0 }
 0x255   :  { %v3520_v17 = vadd.f32 %v3519_v41, %v3391_v52  ;;  %4728 = vmatpush.bf16.msrb.mxu1 %v426_v14  ;;  %v5455_v52 = vld [vmem:[#allocation2 + $0x60] sm:$0xf0] }
 0x256   :  { %v3780_v47 = vpop.f32.mrf.mxu1  ;;  %v7159_v41 = vld [vmem:[#allocation2 + $0x24] sm:$0xf]  ;;  %v5458_v44 = vor.u32 %v7158_v48, %v5455_v52  ;;  %v7185_v48 = vld [vmem:[#allocation2 + $0xec] sm:$0xf0] }
 0x257   :  { %v3649_v42 = vadd.f32 %v3648_v4, %v3520_v17  ;;  %3432 = vmatmul.bf16.gmra.mxu2 %v7094_v35  ;;  %3690 = vmatmul.bf16.gmra.mxu0 %v7102_v34  ;;  %v5463_v35 = vld [vmem:[#allocation2 + $0x68] sm:$0xf0]  ;;  %v5462_v17 = vor.u32 %v7168_v3, %v5461_v55  ;;  %v5525_v55 = vld [vmem:[#allocation2 + $0xa8] sm:$0xf]  ;;  %v5533_v52 = vld [vmem:[#allocation2 + $0xb0] sm:$0xf] }
 0x258   :  { %3561 = vmatmul.bf16.gmra.mxu3 %v7098_v43  ;;  %v5466_v39 = vor.u32 %v7159_v41, %v5463_v35  ;;  %v7176_v3 = vld [vmem:[#allocation2 + $0xac] sm:$0xf]  ;;  %v7186_v41 = vld [vmem:[#allocation2 + $0xf4] sm:$0xf0]  ;;  %v7177_v35 = vld [vmem:[#allocation2 + $0xb4] sm:$0xf] }
 0x259   :  { %3819 = vmatmul.bf16.gmra.mxu1 %v7106_v62  ;;  %v8341_v2 = vadd.f32 %v3777_v5, %v3649_v42 }
 0x25a   :  { %v3393_v26 = vpop.f32.mrf.mxu2 }
 0x25b   :  { %v3394_v37 = vadd.f32 %v3393_v26, %v7991_v27  ;;  %v3522_v4 = vpop.f32.mrf.mxu3  ;;  %v5454_v27 = vor.u32 %v7167_v0, %v5453_v31 }
 0x25c   :  { %v3653_v59 = vpop.f32.mrf.mxu0 }
 0x25d   :  { %v3523_v53 = vadd.f32 %v3522_v4, %v3394_v37 }
 0x25e   :  { %v3782_v22 = vpop.f32.mrf.mxu1 }
 0x25f   :  { %v3652_v58 = vadd.f32 %v3651_v11, %v3523_v53 }
 0x261   :  { %v8344_v34 = vadd.f32 %v3780_v47, %v3652_v58 }
 0x262   :  { %v3395_v5 = vpop.f32.mrf.mxu2 }
 0x263   :  { %v3396_v43 = vadd.f32 %v3395_v5, %v7995_v45  ;;  %v3524_v62 = vpop.f32.mrf.mxu3  ;;  %v5535_v5 = vld [vmem:[#allocation2 + $0xf8] sm:$0xf0] }
 0x264   :  { %v3656_v42 = vpop.f32.mrf.mxu0 }
 0x265   :  { %v3525_v11 = vadd.f32 %v3524_v62, %v3396_v43 }
 0x266   :  { %v3785_v14 = vpop.f32.mrf.mxu1 }
 0x267   :  { %v3654_v26 = vadd.f32 %v3653_v59, %v3525_v11  ;;  %3833 = vmatmul.bf16.vlgmr.msra.gmra.mxu2 %v5454_v27  ;;  %4091 = vmatmul.bf16.vlgmr.msra.gmra.mxu0 %v5462_v17  ;;  %v5527_v59 = vld [vmem:[#allocation2 + $0xf0] sm:$0xf0]  ;;  %v5534_v17 = vor.u32 %v7186_v41, %v5533_v52  ;;  %v5538_v11 = vor.u32 %v7177_v35, %v5535_v5  ;;  %v5597_v35 = vld [vmem:[#allocation2 + $0x138] sm:$0xf] }
 0x268   :  { %3962 = vmatmul.bf16.vlgmr.msra.gmra.mxu3 %v5458_v44 }
 0x269   :  { %4220 = vmatmul.bf16.vlgmr.msra.gmra.mxu1 %v5466_v39  ;;  %v8347_v37 = vadd.f32 %v3782_v22, %v3654_v26  ;;  %v5530_v39 = vor.u32 %v7176_v3, %v5527_v59 }
 0x26a   :  { %v3398_v47 = vpop.f32.mrf.mxu2 }
 0x26b   :  { %v3399_v4 = vadd.f32 %v3398_v47, %v7999_v57  ;;  %v3527_v53 = vpop.f32.mrf.mxu3  ;;  %v5526_v57 = vor.u32 %v7185_v48, %v5525_v55 }
 0x26c   :  { %v3658_v45 = vpop.f32.mrf.mxu0 }
 0x26d   :  { %v3528_v58 = vadd.f32 %v3527_v53, %v3399_v4  ;;  %v215_v4 = vld [vmem:[%s9286_s1 + $0x5e0] sm:$0xff] }
 0x26e   :  { %v3787_v31 = vpop.f32.mrf.mxu1 }
 0x26f   :  { %v3657_v0 = vadd.f32 %v3656_v42, %v3528_v58 }
 0x271   :  { %v8350_v43 = vadd.f32 %v3785_v14, %v3657_v0  ;;  %v199_v14 = vld [vmem:[%s9286_s1 + $0x560] sm:$0xff] }
 0x272   :  { %v3400_v22 = vpop.f32.mrf.mxu2 }
 0x273   :  { %v3401_v62 = vadd.f32 %v3400_v22, %v8003_v12  ;;  %v3529_v27 = vpop.f32.mrf.mxu3  ;;  %v200_v12 = vld [vmem:[%s9286_s1 + $0x568] sm:$0xff]  ;;  %v7203_v22 = vld [vmem:[#allocation2 + $0x17c] sm:$0xf0] }
 0x274   :  { %v3661_v44 = vpop.f32.mrf.mxu0  ;;  %v401_v53 = vpack.c.bf16 %v200_v12, %v199_v14 }
 0x275   :  { %v3530_v42 = vadd.f32 %v3529_v27, %v3401_v62  ;;  %v231_v62 = vld [vmem:[%s9286_s1 + $0x660] sm:$0xff]  ;;  %v7194_v27 = vld [vmem:[#allocation2 + $0x13c] sm:$0xf] }
 0x276   :  { %v3790_v26 = vpop.f32.mrf.mxu1  ;;  %4342 = vmatpush.bf16.msrb.mxu2 %v401_v53 }
 0x277   :  { %v3659_v47 = vadd.f32 %v3658_v45, %v3530_v42  ;;  %3838 = vmatmul.bf16.gmra.mxu2 %v5526_v57  ;;  %4096 = vmatmul.bf16.gmra.mxu0 %v5534_v17  ;;  %v216_v45 = vld [vmem:[%s9286_s1 + $0x5e8] sm:$0xff]  ;;  %v5605_v57 = vld [vmem:[#allocation2 + $0x140] sm:$0xf] }
 0x278   :  { %3967 = vmatmul.bf16.gmra.mxu3 %v5530_v39  ;;  %v409_v55 = vpack.c.bf16 %v216_v45, %v215_v4  ;;  %v5599_v39 = vld [vmem:[#allocation2 + $0x180] sm:$0xf0]  ;;  %v5607_v42 = vld [vmem:[#allocation2 + $0x188] sm:$0xf0]  ;;  %v5598_v4 = vor.u32 %v7203_v22, %v5597_v35 }
 0x279   :  { %4225 = vmatmul.bf16.gmra.mxu1 %v5538_v11  ;;  %v8365_v58 = vadd.f32 %v3787_v31, %v3659_v47  ;;  %v232_v31 = vld [vmem:[%s9286_s1 + $0x668] sm:$0xff]  ;;  %v7195_v11 = vld [vmem:[#allocation2 + $0x144] sm:$0xf] }
 0x27a   :  { %v3403_v0 = vpop.f32.mrf.mxu2  ;;  %4471 = vmatpush.bf16.msrb.mxu3 %v409_v55  ;;  %v417_v17 = vpack.c.bf16 %v232_v31, %v231_v62  ;;  %v5610_v55 = vor.u32 %v7195_v11, %v5607_v42  ;;  %v7212_v11 = vld [vmem:[#allocation2 + $0x1cc] sm:$0xf]  ;;  %v5677_v42 = vld [vmem:[#allocation2 + $0x1d0] sm:$0xf] }
 0x27b   :  { %v3404_v48 = vadd.f32 %v3403_v0, %v8019_v33  ;;  %v3532_v3 = vpop.f32.mrf.mxu3  ;;  %v7204_v33 = vld [vmem:[#allocation2 + $0x184] sm:$0xf0]  ;;  %v5602_v0 = vor.u32 %v7194_v27, %v5599_v39  ;;  %v7221_v39 = vld [vmem:[#allocation2 + $0x20c] sm:$0xf0] }
 0x27c   :  { %v3663_v52 = vpop.f32.mrf.mxu0  ;;  %4600 = vmatpush.bf16.msrb.mxu0 %v417_v17  ;;  %v5606_v53 = vor.u32 %v7204_v33, %v5605_v57  ;;  %v5669_v17 = vld [vmem:[#allocation2 + $0x1c8] sm:$0xf] }
 0x27d   :  { %v3533_v41 = vadd.f32 %v3532_v3, %v3404_v48 }
 0x27e   :  { %v3792_v59 = vpop.f32.mrf.mxu1 }
 0x27f   :  { %v3662_v5 = vadd.f32 %v3661_v44, %v3533_v41 }
 0x281   :  { %v8374_v47 = vadd.f32 %v3790_v26, %v3662_v5  ;;  %v247_v26 = vld [vmem:[%s9286_s1 + $0x6e0] sm:$0xff]  ;;  %v248_v5 = vld [vmem:[%s9286_s1 + $0x6e8] sm:$0xff] }
 0x282   :  { %v3405_v14 = vpop.f32.mrf.mxu2 }
 0x283   :  { %v3406_v44 = vadd.f32 %v3405_v14, %v8029_v63  ;;  %v3534_v12 = vpop.f32.mrf.mxu3  ;;  %v425_v63 = vpack.c.bf16 %v248_v5, %v247_v26  ;;  %v7222_v14 = vld [vmem:[#allocation2 + $0x214] sm:$0xf0] }
 0x284   :  { %v3666_v45 = vpop.f32.mrf.mxu0 }
 0x285   :  { %v3535_v48 = vadd.f32 %v3534_v12, %v3406_v44  ;;  %4729 = vmatpush.bf16.msrb.mxu1 %v425_v63  ;;  %v5671_v44 = vld [vmem:[#allocation2 + $0x210] sm:$0xf0] }
 0x286   :  { %v3795_v3 = vpop.f32.mrf.mxu1  ;;  %v7213_v12 = vld [vmem:[#allocation2 + $0x1d4] sm:$0xf]  ;;  %v5674_v26 = vor.u32 %v7212_v11, %v5671_v44  ;;  %v7239_v11 = vld [vmem:[#allocation2 + $0x29c] sm:$0xf0] }
 0x287   :  { %v3664_v41 = vadd.f32 %v3663_v52, %v3535_v48  ;;  %3843 = vmatmul.bf16.gmra.mxu2 %v5598_v4  ;;  %4101 = vmatmul.bf16.gmra.mxu0 %v5606_v53  ;;  %v5679_v4 = vld [vmem:[#allocation2 + $0x218] sm:$0xf0]  ;;  %v5678_v48 = vor.u32 %v7222_v14, %v5677_v42  ;;  %v5741_v42 = vld [vmem:[#allocation2 + $0x258] sm:$0xf]  ;;  %v5749_v44 = vld [vmem:[#allocation2 + $0x260] sm:$0xf] }
 0x288   :  { %3972 = vmatmul.bf16.gmra.mxu3 %v5602_v0  ;;  %v5682_v5 = vor.u32 %v7213_v12, %v5679_v4  ;;  %v7230_v14 = vld [vmem:[#allocation2 + $0x25c] sm:$0xf]  ;;  %v7240_v12 = vld [vmem:[#allocation2 + $0x2a4] sm:$0xf0]  ;;  %v7231_v4 = vld [vmem:[#allocation2 + $0x264] sm:$0xf] }
 0x289   :  { %4230 = vmatmul.bf16.gmra.mxu1 %v5610_v55  ;;  %v8383_v35 = vadd.f32 %v3792_v59, %v3664_v41 }
 0x28a   :  { %v3408_v22 = vpop.f32.mrf.mxu2 }
 0x28b   :  { %v3409_v62 = vadd.f32 %v3408_v22, %v8039_v10  ;;  %v3537_v52 = vpop.f32.mrf.mxu3  ;;  %v5670_v10 = vor.u32 %v7221_v39, %v5669_v17 }
 0x28c   :  { %v3668_v31 = vpop.f32.mrf.mxu0 }
 0x28d   :  { %v3538_v27 = vadd.f32 %v3537_v52, %v3409_v62 }
 0x28e   :  { %v3797_v57 = vpop.f32.mrf.mxu1 }
 0x28f   :  { %v3667_v33 = vadd.f32 %v3666_v45, %v3538_v27 }
 0x291   :  { %v8386_v53 = vadd.f32 %v3795_v3, %v3667_v33 }
 0x292   :  { %v3410_v59 = vpop.f32.mrf.mxu2 }
 0x293   :  { %v3411_v0 = vadd.f32 %v3410_v59, %v8043_v38  ;;  %v3539_v55 = vpop.f32.mrf.mxu3  ;;  %v5751_v59 = vld [vmem:[#allocation2 + $0x2a8] sm:$0xf0] }
 0x294   :  { %v3671_v41 = vpop.f32.mrf.mxu0 }
 0x295   :  { %v3540_v45 = vadd.f32 %v3539_v55, %v3411_v0 }
 0x296   :  { %v3800_v63 = vpop.f32.mrf.mxu1 }
 0x297   :  { %v3669_v22 = vadd.f32 %v3668_v31, %v3540_v45  ;;  %3848 = vmatmul.bf16.gmra.mxu2 %v5670_v10  ;;  %4106 = vmatmul.bf16.gmra.mxu0 %v5678_v48  ;;  %v5743_v31 = vld [vmem:[#allocation2 + $0x2a0] sm:$0xf0]  ;;  %v5750_v48 = vor.u32 %v7240_v12, %v5749_v44  ;;  %v5754_v45 = vor.u32 %v7231_v4, %v5751_v59  ;;  %v5813_v59 = vld [vmem:[#allocation2 + $0x2e8] sm:$0xf] }
 0x298   :  { %3977 = vmatmul.bf16.gmra.mxu3 %v5674_v26 }
 0x299   :  { %4235 = vmatmul.bf16.gmra.mxu1 %v5682_v5  ;;  %v8389_v62 = vadd.f32 %v3797_v57, %v3669_v22  ;;  %v5746_v5 = vor.u32 %v7230_v14, %v5743_v31 }
 0x29a   :  { %v3413_v3 = vpop.f32.mrf.mxu2 }
 0x29b   :  { %v3414_v52 = vadd.f32 %v3413_v3, %v8047_v49  ;;  %v3542_v27 = vpop.f32.mrf.mxu3  ;;  %v5742_v49 = vor.u32 %v7239_v11, %v5741_v42  ;;  %v9300_v11 = vld [vmem:[#allocation5_spill] sm:$0xff] }
 0x29c   :  { %v3673_v38 = vpop.f32.mrf.mxu0 }
 0x29d   :  { %v3543_v33 = vadd.f32 %v3542_v27, %v3414_v52  ;;  %v213_v52 = vld [vmem:[%s9286_s1 + $0x5d0] sm:$0xff] }
 0x29e   :  { %v3802_v17 = vpop.f32.mrf.mxu1 }
 0x29f   :  { %v3672_v39 = vadd.f32 %v3671_v41, %v3543_v33 }
 0x2a1   :  { %v8392_v0 = vadd.f32 %v3800_v63, %v3672_v39  ;;  %v197_v63 = vld [vmem:[%s9286_s1 + $0x550] sm:$0xff] }
 0x2a2   :  { %v3415_v57 = vpop.f32.mrf.mxu2 }
 0x2a3   :  { %9298 = vst [vmem:[#allocation15_spill] sm:$0xff] %v8392_v0  ;;  %v3416_v55 = vadd.f32 %v3415_v57, %v8051_v15  ;;  %v3544_v10 = vpop.f32.mrf.mxu3  ;;  %v198_v15 = vld [vmem:[%s9286_s1 + $0x558] sm:$0xff] }
 0x2a4   :  { %v3676_v26 = vpop.f32.mrf.mxu0  ;;  %v400_v27 = vpack.c.bf16 %v198_v15, %v197_v63  ;;  %v5823_v63 = vld [vmem:[#allocation2 + $0x338] sm:$0xf0] }
 0x2a5   :  { %v3545_v41 = vadd.f32 %v3544_v10, %v3416_v55  ;;  %v7257_v55 = vld [vmem:[#allocation2 + $0x32c] sm:$0xf0] }
 0x2a6   :  { %v3805_v22 = vpop.f32.mrf.mxu1  ;;  %4343 = vmatpush.bf16.msrb.mxu2 %v400_v27  ;;  %v229_v10 = vld [vmem:[%s9286_s1 + $0x650] sm:$0xff] }
 0x2a7   :  { %v3674_v3 = vadd.f32 %v3673_v38, %v3545_v41  ;;  %3853 = vmatmul.bf16.gmra.mxu2 %v5742_v49  ;;  %4111 = vmatmul.bf16.gmra.mxu0 %v5750_v48  ;;  %v214_v38 = vld [vmem:[%s9286_s1 + $0x5d8] sm:$0xff]  ;;  %v7248_v49 = vld [vmem:[#allocation2 + $0x2ec] sm:$0xf]  ;;  %v5821_v48 = vld [vmem:[#allocation2 + $0x2f0] sm:$0xf] }
 0x2a8   :  { %3982 = vmatmul.bf16.gmra.mxu3 %v5746_v5  ;;  %v408_v42 = vpack.c.bf16 %v214_v38, %v213_v52  ;;  %v7258_v5 = vld [vmem:[#allocation2 + $0x334] sm:$0xf0]  ;;  %v5815_v41 = vld [vmem:[#allocation2 + $0x330] sm:$0xf0] }
 0x2a9   :  { %4240 = vmatmul.bf16.gmra.mxu1 %v5754_v45  ;;  %v8407_v33 = vadd.f32 %v3802_v17, %v3674_v3  ;;  %v230_v17 = vld [vmem:[%s9286_s1 + $0x658] sm:$0xff]  ;;  %v7249_v3 = vld [vmem:[#allocation2 + $0x2f4] sm:$0xf] }
 0x2aa   :  { %v3418_v39 = vpop.f32.mrf.mxu2  ;;  %4472 = vmatpush.bf16.msrb.mxu3 %v408_v42  ;;  %v416_v45 = vpack.c.bf16 %v230_v17, %v229_v10  ;;  %v5822_v42 = vor.u32 %v7258_v5, %v5821_v48  ;;  %v9304_v17 = vld [vmem:[#allocation7_spill] sm:$0xff] }
 0x2ab   :  { %9299 = vst [vmem:[#allocation16_spill] sm:$0xff] %v8407_v33  ;;  %v3419_v14 = vadd.f32 %v3418_v39, %v9300_v11  ;;  %v3547_v44 = vpop.f32.mrf.mxu3  ;;  %v5814_v39 = vor.u32 %v7257_v55, %v5813_v59 }
 0x2ac   :  { %v3678_v12 = vpop.f32.mrf.mxu0  ;;  %4601 = vmatpush.bf16.msrb.mxu0 %v416_v45 }
 0x2ad   :  { %v3548_v31 = vadd.f32 %v3547_v44, %v3419_v14  ;;  %v5818_v14 = vor.u32 %v7248_v49, %v5815_v41  ;;  %v5826_v44 = vor.u32 %v7249_v3, %v5823_v63  ;;  %v5885_v3 = vld [vmem:[#allocation2 + $0x378] sm:$0xf]  ;;  %v7275_v63 = vld [vmem:[#allocation2 + $0x3bc] sm:$0xf0] }
 0x2ae   :  { %v3807_v4 = vpop.f32.mrf.mxu1 }
 0x2af   :  { %v3677_v57 = vadd.f32 %v3676_v26, %v3548_v31  ;;  %v9302_v26 = vld [vmem:[#allocation6_spill] sm:$0xff] }
 0x2b1   :  { %v8416_v15 = vadd.f32 %v3805_v22, %v3677_v57  ;;  %v245_v22 = vld [vmem:[%s9286_s1 + $0x6d0] sm:$0xff]  ;;  %v246_v57 = vld [vmem:[%s9286_s1 + $0x6d8] sm:$0xff] }
 0x2b2   :  { %v3420_v52 = vpop.f32.mrf.mxu2  ;;  %v424_v59 = vpack.c.bf16 %v246_v57, %v245_v22  ;;  %v5886_v22 = vor.u32 %v7275_v63, %v5885_v3 }
 0x2b3   :  { %9301 = vst [vmem:[#allocation5_spill] sm:$0xff] %v8416_v15  ;;  %v3421_v27 = vadd.f32 %v3420_v52, %v9302_v26  ;;  %v3549_v38 = vpop.f32.mrf.mxu3  ;;  %v7266_v52 = vld [vmem:[#allocation2 + $0x37c] sm:$0xf]  ;;  %v5893_v26 = vld [vmem:[#allocation2 + $0x380] sm:$0xf] }
 0x2b4   :  { %v3681_v11 = vpop.f32.mrf.mxu0  ;;  %4730 = vmatpush.bf16.msrb.mxu1 %v424_v59 }
 0x2b5   :  { %v3550_v31 = vadd.f32 %v3549_v38, %v3421_v27  ;;  %v7276_v27 = vld [vmem:[#allocation2 + $0x3c4] sm:$0xf0]  ;;  %v5887_v38 = vld [vmem:[#allocation2 + $0x3c0] sm:$0xf0] }
 0x2b6   :  { %v3810_v33 = vpop.f32.mrf.mxu1  ;;  %v5894_v57 = vor.u32 %v7276_v27, %v5893_v26  ;;  %v5957_v26 = vld [vmem:[#allocation2 + $0x408] sm:$0xf]  ;;  %v7284_v27 = vld [vmem:[#allocation2 + $0x40c] sm:$0xf] }
 0x2b7   :  { %v3679_v0 = vadd.f32 %v3678_v12, %v3550_v31  ;;  %3858 = vmatmul.bf16.gmra.mxu2 %v5814_v39  ;;  %4116 = vmatmul.bf16.gmra.mxu0 %v5822_v42  ;;  %v7267_v39 = vld [vmem:[#allocation2 + $0x384] sm:$0xf]  ;;  %v5895_v42 = vld [vmem:[#allocation2 + $0x3c8] sm:$0xf0] }
 0x2b8   :  { %3987 = vmatmul.bf16.gmra.mxu3 %v5818_v14 }
 0x2b9   :  { %4245 = vmatmul.bf16.gmra.mxu1 %v5826_v44  ;;  %v8425_v55 = vadd.f32 %v3807_v4, %v3679_v0  ;;  %v9306_v4 = vld [vmem:[#allocation8_spill] sm:$0xff] }
 0x2ba   :  { %v3423_v10 = vpop.f32.mrf.mxu2 }
 0x2bb   :  { %9303 = vst [vmem:[#allocation6_spill] sm:$0xff] %v8425_v55  ;;  %v3424_v49 = vadd.f32 %v3423_v10, %v9304_v17  ;;  %v3552_v12 = vpop.f32.mrf.mxu3  ;;  %v5890_v10 = vor.u32 %v7266_v52, %v5887_v38  ;;  %v5898_v17 = vor.u32 %v7267_v39, %v5895_v42  ;;  %v7293_v52 = vld [vmem:[#allocation2 + $0x44c] sm:$0xf0]  ;;  %v7294_v39 = vld [vmem:[#allocation2 + $0x454] sm:$0xf0] }
 0x2bc   :  { %v3683_v48 = vpop.f32.mrf.mxu0  ;;  %v5965_v38 = vld [vmem:[#allocation2 + $0x410] sm:$0xf]  ;;  %v7285_v42 = vld [vmem:[#allocation2 + $0x414] sm:$0xf] }
 0x2bd   :  { %v3553_v5 = vadd.f32 %v3552_v12, %v3424_v49 }
 0x2be   :  { %v3812_v45 = vpop.f32.mrf.mxu1 }
 0x2bf   :  { %v3682_v41 = vadd.f32 %v3681_v11, %v3553_v5 }
 0x2c1   :  { %v8428_v14 = vadd.f32 %v3810_v33, %v3682_v41  ;;  %v9308_v41 = vld [vmem:[#allocation9_spill] sm:$0xff] }
 0x2c2   :  { %v3425_v0 = vpop.f32.mrf.mxu2 }
 0x2c3   :  { %9305 = vst [vmem:[#allocation7_spill] sm:$0xff] %v8428_v14  ;;  %v3426_v44 = vadd.f32 %v3425_v0, %v9306_v4  ;;  %v3554_v31 = vpop.f32.mrf.mxu3 }
 0x2c4   :  { %v3686_v59 = vpop.f32.mrf.mxu0 }
 0x2c5   :  { %v3555_v11 = vadd.f32 %v3554_v31, %v3426_v44  ;;  %v5967_v44 = vld [vmem:[#allocation2 + $0x458] sm:$0xf0] }
 0x2c6   :  { %v3815_v49 = vpop.f32.mrf.mxu1 }
 0x2c7   :  { %v3684_v12 = vadd.f32 %v3683_v48, %v3555_v11  ;;  %3863 = vmatmul.bf16.gmra.mxu2 %v5886_v22  ;;  %4121 = vmatmul.bf16.gmra.mxu0 %v5894_v57  ;;  %v5959_v48 = vld [vmem:[#allocation2 + $0x450] sm:$0xf0]  ;;  %v9310_v22 = vld [vmem:[#allocation10_spill] sm:$0xff]  ;;  %v5966_v11 = vor.u32 %v7294_v39, %v5965_v38 }
 0x2c8   :  { %3992 = vmatmul.bf16.gmra.mxu3 %v5890_v10  ;;  %v9312_v39 = vld [vmem:[#allocation11_spill] sm:$0xff] }
 0x2c9   :  { %4250 = vmatmul.bf16.gmra.mxu1 %v5898_v17  ;;  %v8431_v5 = vadd.f32 %v3812_v45, %v3684_v12  ;;  %v5958_v17 = vor.u32 %v7293_v52, %v5957_v26 }
 0x2ca   :  { %v3428_v33 = vpop.f32.mrf.mxu2 }
 0x2cb   :  { %9307 = vst [vmem:[#allocation8_spill] sm:$0xff] %v8431_v5  ;;  %v3429_v14 = vadd.f32 %v3428_v33, %v9308_v41  ;;  %v3557_v55 = vpop.f32.mrf.mxu3 }
 0x2cc   :  { %v3688_v0 = vpop.f32.mrf.mxu0 }
 0x2cd   :  { %v3558_v4 = vadd.f32 %v3557_v55, %v3429_v14  ;;  %v5962_v55 = vor.u32 %v7284_v27, %v5959_v48  ;;  %v5970_v14 = vor.u32 %v7285_v42, %v5967_v44 }
 0x2ce   :  { %v3817_v3 = vpop.f32.mrf.mxu1 }
 0x2cf   :  { %v3687_v63 = vadd.f32 %v3686_v59, %v3558_v4  ;;  %v196_v4 = vld [vmem:[%s9286_s1 + $0x548] sm:$0xff] }
 0x2d1   :  { %v8434_v31 = vadd.f32 %v3815_v49, %v3687_v63  ;;  %v195_v49 = vld [vmem:[%s9286_s1 + $0x540] sm:$0xff] }
 0x2d2   :  { %v3430_v45 = vpop.f32.mrf.mxu2  ;;  %v211_v63 = vld [vmem:[%s9286_s1 + $0x5c0] sm:$0xff]  ;;  %v399_v26 = vpack.c.bf16 %v196_v4, %v195_v49 }
 0x2d3   :  { %9309 = vst [vmem:[#allocation9_spill] sm:$0xff] %v8434_v31  ;;  %v3431_v57 = vadd.f32 %v3430_v45, %v9310_v22  ;;  %v3559_v10 = vpop.f32.mrf.mxu3  ;;  %v6031_v49 = vld [vmem:[#allocation2 + $0x4e0] sm:$0xf0] }
 0x2d4   :  { %v3691_v12 = vpop.f32.mrf.mxu0  ;;  %4344 = vmatpush.bf16.msrb.mxu2 %v399_v26  ;;  %v7303_v4 = vld [vmem:[#allocation2 + $0x4a4] sm:$0xf] }
 0x2d5   :  { %v3560_v59 = vadd.f32 %v3559_v10, %v3431_v57  ;;  %v6029_v57 = vld [vmem:[#allocation2 + $0x498] sm:$0xf] }
 0x2d6   :  { %v3820_v33 = vpop.f32.mrf.mxu1 }
 0x2d7   :  { %v3689_v41 = vadd.f32 %v3688_v0, %v3560_v59  ;;  %3868 = vmatmul.bf16.gmra.mxu2 %v5958_v17  ;;  %4126 = vmatmul.bf16.gmra.mxu0 %v5966_v11  ;;  %v212_v0 = vld [vmem:[%s9286_s1 + $0x5c8] sm:$0xff]  ;;  %v7311_v17 = vld [vmem:[#allocation2 + $0x4dc] sm:$0xf0] }
 0x2d8   :  { %3997 = vmatmul.bf16.gmra.mxu3 %v5962_v55  ;;  %v407_v38 = vpack.c.bf16 %v212_v0, %v211_v63  ;;  %v227_v11 = vld [vmem:[%s9286_s1 + $0x640] sm:$0xff]  ;;  %v7302_v55 = vld [vmem:[#allocation2 + $0x49c] sm:$0xf]  ;;  %v7312_v59 = vld [vmem:[#allocation2 + $0x4e4] sm:$0xf0] }
 0x2d9   :  { %4255 = vmatmul.bf16.gmra.mxu1 %v5970_v14  ;;  %v8449_v52 = vadd.f32 %v3817_v3, %v3689_v41  ;;  %v228_v3 = vld [vmem:[%s9286_s1 + $0x648] sm:$0xff]  ;;  %v6037_v14 = vld [vmem:[#allocation2 + $0x4a0] sm:$0xf] }
 0x2da   :  { %v3433_v27 = vpop.f32.mrf.mxu2  ;;  %4473 = vmatpush.bf16.msrb.mxu3 %v407_v38  ;;  %v415_v41 = vpack.c.bf16 %v228_v3, %v227_v11  ;;  %v6039_v63 = vld [vmem:[#allocation2 + $0x4e8] sm:$0xf0]  ;;  %v9314_v3 = vld [vmem:[#allocation13_spill] sm:$0xff] }
 0x2db   :  { %9311 = vst [vmem:[#allocation10_spill] sm:$0xff] %v8449_v52  ;;  %v3434_v48 = vadd.f32 %v3433_v27, %v9312_v39  ;;  %v3562_v42 = vpop.f32.mrf.mxu3  ;;  %v6030_v39 = vor.u32 %v7311_v17, %v6029_v57  ;;  %v6042_v52 = vor.u32 %v7303_v4, %v6039_v63  ;;  %v7329_v4 = vld [vmem:[#allocation2 + $0x56c] sm:$0xf0]  ;;  %v7320_v63 = vld [vmem:[#allocation2 + $0x52c] sm:$0xf] }
 0x2dc   :  { %v3693_v44 = vpop.f32.mrf.mxu0  ;;  %4602 = vmatpush.bf16.msrb.mxu0 %v415_v41 }
 0x2dd   :  { %v3563_v45 = vadd.f32 %v3562_v42, %v3434_v48  ;;  %v6038_v48 = vor.u32 %v7312_v59, %v6037_v14 }
 0x2de   :  { %v3822_v22 = vpop.f32.mrf.mxu1 }
 0x2df   :  { %v3692_v10 = vadd.f32 %v3691_v12, %v3563_v45  ;;  %v9313_v12 = vld [vmem:[#allocation12_spill] sm:$0xff]  ;;  %v6034_v45 = vor.u32 %v7302_v55, %v6031_v49  ;;  %v6101_v49 = vld [vmem:[#allocation2 + $0x528] sm:$0xf] }
 0x2e1   :  { %v8458_v26 = vadd.f32 %v3820_v33, %v3692_v10  ;;  %v243_v33 = vld [vmem:[%s9286_s1 + $0x6c0] sm:$0xff]  ;;  %v244_v10 = vld [vmem:[%s9286_s1 + $0x6c8] sm:$0xff] }
 0x2e2   :  { %v3435_v0 = vpop.f32.mrf.mxu2  ;;  %v423_v57 = vpack.c.bf16 %v244_v10, %v243_v33 }
 0x2e3   :  { %v3436_v27 = vadd.f32 %v3435_v0, %v9313_v12  ;;  %v3564_v38 = vpop.f32.mrf.mxu3  ;;  %v6109_v0 = vld [vmem:[#allocation2 + $0x530] sm:$0xf]  ;;  %v7330_v12 = vld [vmem:[#allocation2 + $0x574] sm:$0xf0] }
 0x2e4   :  { %v4092_v42 = vpop.f32.mrf.mxu0  ;;  %4731 = vmatpush.bf16.msrb.mxu1 %v423_v57  ;;  %v6110_v33 = vor.u32 %v7330_v12, %v6109_v0  ;;  %v6173_v0 = vld [vmem:[#allocation2 + $0x5b8] sm:$0xf]  ;;  %v7338_v12 = vld [vmem:[#allocation2 + $0x5bc] sm:$0xf] }
 0x2e5   :  { %v3565_v31 = vadd.f32 %v3564_v38, %v3436_v27  ;;  %v6103_v27 = vld [vmem:[#allocation2 + $0x570] sm:$0xf0] }
 0x2e6   :  { %v4221_v5 = vpop.f32.mrf.mxu1  ;;  %v7321_v38 = vld [vmem:[#allocation2 + $0x534] sm:$0xf]  ;;  %v6106_v57 = vor.u32 %v7320_v63, %v6103_v27  ;;  %v7347_v63 = vld [vmem:[#allocation2 + $0x5fc] sm:$0xf0] }
 0x2e7   :  { %v3694_v15 = vadd.f32 %v3693_v44, %v3565_v31  ;;  %3873 = vmatmul.bf16.gmra.mxu2 %v6030_v39  ;;  %4131 = vmatmul.bf16.gmra.mxu0 %v6038_v48  ;;  %v6181_v27 = vld [vmem:[#allocation2 + $0x5c0] sm:$0xf] }
 0x2e8   :  { %4002 = vmatmul.bf16.gmra.mxu3 %v6034_v45  ;;  %v6102_v45 = vor.u32 %v7329_v4, %v6101_v49 }
 0x2e9   :  { %4260 = vmatmul.bf16.gmra.mxu1 %v6042_v52  ;;  %v8467_v17 = vadd.f32 %v3822_v22, %v3694_v15  ;;  %v6111_v52 = vld [vmem:[#allocation2 + $0x578] sm:$0xf0] }
 0x2ea   :  { %v3834_v11 = vpop.f32.mrf.mxu2 }
 0x2eb   :  { %v3835_v55 = vadd.f32 %v3834_v11, %v9314_v3  ;;  %v3963_v31 = vpop.f32.mrf.mxu3  ;;  %v6114_v11 = vor.u32 %v7321_v38, %v6111_v52  ;;  %v7348_v38 = vld [vmem:[#allocation2 + $0x604] sm:$0xf0]  ;;  %v7339_v52 = vld [vmem:[#allocation2 + $0x5c4] sm:$0xf] }
 0x2ec   :  { %v4094_v44 = vpop.f32.mrf.mxu0 }
 0x2ed   :  { %v3964_v14 = vadd.f32 %v3963_v31, %v3835_v55 }
 0x2ee   :  { %v4223_v59 = vpop.f32.mrf.mxu1 }
 0x2ef   :  { %v4093_v41 = vadd.f32 %v4092_v42, %v3964_v14 }
 0x2f1   :  { %v8470_v39 = vadd.f32 %v4221_v5, %v4093_v41 }
 0x2f2   :  { %v3836_v15 = vpop.f32.mrf.mxu2 }
 0x2f3   :  { %v3837_v22 = vadd.f32 %v3836_v15, %v8137_v40  ;;  %v3965_v48 = vpop.f32.mrf.mxu3 }
 0x2f4   :  { %v4097_v10 = vpop.f32.mrf.mxu0 }
 0x2f5   :  { %v3966_v42 = vadd.f32 %v3965_v48, %v3837_v22  ;;  %v6183_v22 = vld [vmem:[#allocation2 + $0x608] sm:$0xf0] }
 0x2f6   :  { %v4226_v3 = vpop.f32.mrf.mxu1 }
 0x2f7   :  { %v4095_v55 = vadd.f32 %v4094_v44, %v3966_v42  ;;  %3878 = vmatmul.bf16.gmra.mxu2 %v6102_v45  ;;  %4136 = vmatmul.bf16.gmra.mxu0 %v6110_v33  ;;  %v6175_v44 = vld [vmem:[#allocation2 + $0x600] sm:$0xf0]  ;;  %v9316_v45 = vld [vmem:[#allocation14_spill] sm:$0xff] }
 0x2f8   :  { %4007 = vmatmul.bf16.gmra.mxu3 %v6106_v57 }
 0x2f9   :  { %4265 = vmatmul.bf16.gmra.mxu1 %v6114_v11  ;;  %v8473_v31 = vadd.f32 %v4223_v59, %v4095_v55  ;;  %v6182_v11 = vor.u32 %v7348_v38, %v6181_v27  ;;  %v6178_v55 = vor.u32 %v7338_v12, %v6175_v44 }
 0x2fa   :  { %v3839_v5 = vpop.f32.mrf.mxu2 }
 0x2fb   :  { %v3840_v14 = vadd.f32 %v3839_v5, %v8140_v13  ;;  %v3968_v41 = vpop.f32.mrf.mxu3  ;;  %v6174_v13 = vor.u32 %v7347_v63, %v6173_v0  ;;  %v6186_v5 = vor.u32 %v7339_v52, %v6183_v22 }
 0x2fc   :  { %v4099_v40 = vpop.f32.mrf.mxu0 }
 0x2fd   :  { %v3969_v15 = vadd.f32 %v3968_v41, %v3840_v14 }
 0x2fe   :  { %v4228_v49 = vpop.f32.mrf.mxu1 }
 0x2ff   :  { %v4098_v4 = vadd.f32 %v4097_v10, %v3969_v15  ;;  %v194_v15 = vld [vmem:[%s9286_s1 + $0x538] sm:$0xff] }
 0x301   :  { %v8476_v48 = vadd.f32 %v4226_v3, %v4098_v4  ;;  %v193_v3 = vld [vmem:[%s9286_s1 + $0x530] sm:$0xff] }
 0x302   :  { %v3841_v59 = vpop.f32.mrf.mxu2  ;;  %v209_v4 = vld [vmem:[%s9286_s1 + $0x5b0] sm:$0xff]  ;;  %v398_v0 = vpack.c.bf16 %v194_v15, %v193_v3  ;;  %v6255_v3 = vld [vmem:[#allocation2 + $0x698] sm:$0xf0] }
 0x303   :  { %9315 = vst [vmem:[#allocation11_spill] sm:$0xff] %v8476_v48  ;;  %v3842_v33 = vadd.f32 %v3841_v59, %v9316_v45  ;;  %v3970_v57 = vpop.f32.mrf.mxu3  ;;  %v6245_v45 = vld [vmem:[#allocation2 + $0x648] sm:$0xf] }
 0x304   :  { %v4102_v42 = vpop.f32.mrf.mxu0  ;;  %4345 = vmatpush.bf16.msrb.mxu2 %v398_v0 }
 0x305   :  { %v3971_v10 = vadd.f32 %v3970_v57, %v3842_v33  ;;  %v7365_v57 = vld [vmem:[#allocation2 + $0x68c] sm:$0xf0] }
 0x306   :  { %v4231_v14 = vpop.f32.mrf.mxu1 }
 0x307   :  { %v4100_v41 = vadd.f32 %v4099_v40, %v3971_v10  ;;  %3883 = vmatmul.bf16.gmra.mxu2 %v6174_v13  ;;  %4141 = vmatmul.bf16.gmra.mxu0 %v6182_v11  ;;  %v210_v40 = vld [vmem:[%s9286_s1 + $0x5b8] sm:$0xff]  ;;  %v225_v13 = vld [vmem:[%s9286_s1 + $0x630] sm:$0xff]  ;;  %v7356_v11 = vld [vmem:[#allocation2 + $0x64c] sm:$0xf] }
 0x308   :  { %4012 = vmatmul.bf16.gmra.mxu3 %v6178_v55  ;;  %v406_v27 = vpack.c.bf16 %v210_v40, %v209_v4  ;;  %v6253_v55 = vld [vmem:[#allocation2 + $0x650] sm:$0xf]  ;;  %v6247_v10 = vld [vmem:[#allocation2 + $0x690] sm:$0xf0]  ;;  %v6246_v40 = vor.u32 %v7365_v57, %v6245_v45 }
 0x309   :  { %4270 = vmatmul.bf16.gmra.mxu1 %v6186_v5  ;;  %v8491_v63 = vadd.f32 %v4228_v49, %v4100_v41  ;;  %v226_v49 = vld [vmem:[%s9286_s1 + $0x638] sm:$0xff]  ;;  %v7357_v41 = vld [vmem:[#allocation2 + $0x654] sm:$0xf] }
 0x30a   :  { %v3844_v12 = vpop.f32.mrf.mxu2  ;;  %4474 = vmatpush.bf16.msrb.mxu3 %v406_v27  ;;  %v414_v5 = vpack.c.bf16 %v226_v49, %v225_v13 }
 0x30b   :  { %9317 = vst [vmem:[#allocation12_spill] sm:$0xff] %v8491_v63  ;;  %v3845_v38 = vadd.f32 %v3844_v12, %v8164_v30  ;;  %v3973_v44 = vpop.f32.mrf.mxu3  ;;  %v7366_v30 = vld [vmem:[#allocation2 + $0x694] sm:$0xf0] }
 0x30c   :  { %v4104_v52 = vpop.f32.mrf.mxu0  ;;  %4603 = vmatpush.bf16.msrb.mxu0 %v414_v5  ;;  %v6254_v12 = vor.u32 %v7366_v30, %v6253_v55  ;;  %v6317_v5 = vld [vmem:[#allocation2 + $0x6d8] sm:$0xf] }
 0x30d   :  { %v3974_v22 = vadd.f32 %v3973_v44, %v3845_v38  ;;  %v6250_v38 = vor.u32 %v7356_v11, %v6247_v10  ;;  %v6258_v44 = vor.u32 %v7357_v41, %v6255_v3  ;;  %v7383_v10 = vld [vmem:[#allocation2 + $0x71c] sm:$0xf0]  ;;  %v7374_v41 = vld [vmem:[#allocation2 + $0x6dc] sm:$0xf] }
 0x30e   :  { %v4233_v59 = vpop.f32.mrf.mxu1  ;;  %v6325_v3 = vld [vmem:[#allocation2 + $0x6e0] sm:$0xf] }
 0x30f   :  { %v4103_v33 = vadd.f32 %v4102_v42, %v3974_v22 }
 0x311   :  { %v8500_v15 = vadd.f32 %v4231_v14, %v4103_v33  ;;  %v241_v14 = vld [vmem:[%s9286_s1 + $0x6b0] sm:$0xff]  ;;  %v242_v33 = vld [vmem:[%s9286_s1 + $0x6b8] sm:$0xff] }
 0x312   :  { %v3846_v4 = vpop.f32.mrf.mxu2 }
 0x313   :  { %v3847_v42 = vadd.f32 %v3846_v4, %v8173_v6  ;;  %v3975_v0 = vpop.f32.mrf.mxu3  ;;  %v422_v6 = vpack.c.bf16 %v242_v33, %v241_v14  ;;  %v7384_v4 = vld [vmem:[#allocation2 + $0x724] sm:$0xf0] }
 0x314   :  { %v4107_v27 = vpop.f32.mrf.mxu0 }
 0x315   :  { %v3976_v22 = vadd.f32 %v3975_v0, %v3847_v42  ;;  %4732 = vmatpush.bf16.msrb.mxu1 %v422_v6  ;;  %v6319_v42 = vld [vmem:[#allocation2 + $0x720] sm:$0xf0] }
 0x316   :  { %v4236_v63 = vpop.f32.mrf.mxu1  ;;  %v7375_v0 = vld [vmem:[#allocation2 + $0x6e4] sm:$0xf]  ;;  %v6322_v14 = vor.u32 %v7374_v41, %v6319_v42  ;;  %v7401_v41 = vld [vmem:[#allocation2 + $0x7ac] sm:$0xf0] }
 0x317   :  { %v4105_v48 = vadd.f32 %v4104_v52, %v3976_v22  ;;  %3888 = vmatmul.bf16.gmra.mxu2 %v6246_v40  ;;  %4146 = vmatmul.bf16.gmra.mxu0 %v6254_v12  ;;  %v6327_v40 = vld [vmem:[#allocation2 + $0x728] sm:$0xf0]  ;;  %v6397_v42 = vld [vmem:[#allocation2 + $0x770] sm:$0xf] }
 0x318   :  { %4017 = vmatmul.bf16.gmra.mxu3 %v6250_v38  ;;  %v6330_v33 = vor.u32 %v7375_v0, %v6327_v40  ;;  %v7402_v0 = vld [vmem:[#allocation2 + $0x7b4] sm:$0xf0]  ;;  %v7393_v40 = vld [vmem:[#allocation2 + $0x774] sm:$0xf] }
 0x319   :  { %4275 = vmatmul.bf16.gmra.mxu1 %v6258_v44  ;;  %v8509_v45 = vadd.f32 %v4233_v59, %v4105_v48  ;;  %v6326_v44 = vor.u32 %v7384_v4, %v6325_v3  ;;  %v6389_v3 = vld [vmem:[#allocation2 + $0x768] sm:$0xf]  ;;  %v7392_v4 = vld [vmem:[#allocation2 + $0x76c] sm:$0xf] }
 0x31a   :  { %v3849_v57 = vpop.f32.mrf.mxu2 }
 0x31b   :  { %v3850_v13 = vadd.f32 %v3849_v57, %v8176_v56  ;;  %v3978_v52 = vpop.f32.mrf.mxu3  ;;  %v6318_v56 = vor.u32 %v7383_v10, %v6317_v5 }
 0x31c   :  { %v4109_v49 = vpop.f32.mrf.mxu0 }
 0x31d   :  { %v3979_v11 = vadd.f32 %v3978_v52, %v3850_v13 }
 0x31e   :  { %v4238_v55 = vpop.f32.mrf.mxu1 }
 0x31f   :  { %v4108_v30 = vadd.f32 %v4107_v27, %v3979_v11 }
 0x321   :  { %v8512_v12 = vadd.f32 %v4236_v63, %v4108_v30 }
 0x322   :  { %v3851_v48 = vpop.f32.mrf.mxu2 }
 0x323   :  { %v3852_v59 = vadd.f32 %v3851_v48, %v8179_v50  ;;  %v3980_v38 = vpop.f32.mrf.mxu3  ;;  %v6399_v48 = vld [vmem:[#allocation2 + $0x7b8] sm:$0xf0] }
 0x324   :  { %v4112_v22 = vpop.f32.mrf.mxu0 }
 0x325   :  { %v3981_v27 = vadd.f32 %v3980_v38, %v3852_v59 }
 0x326   :  { %v4241_v6 = vpop.f32.mrf.mxu1 }
 0x327   :  { %v4110_v57 = vadd.f32 %v4109_v49, %v3981_v27  ;;  %3893 = vmatmul.bf16.gmra.mxu2 %v6318_v56  ;;  %4151 = vmatmul.bf16.gmra.mxu0 %v6326_v44  ;;  %v6391_v49 = vld [vmem:[#allocation2 + $0x7b0] sm:$0xf0]  ;;  %v6398_v44 = vor.u32 %v7402_v0, %v6397_v42  ;;  %v6402_v27 = vor.u32 %v7393_v40, %v6399_v48  ;;  %v6461_v40 = vld [vmem:[#allocation2 + $0x7f8] sm:$0xf] }
 0x328   :  { %4022 = vmatmul.bf16.gmra.mxu3 %v6322_v14 }
 0x329   :  { %4280 = vmatmul.bf16.gmra.mxu1 %v6330_v33  ;;  %v8515_v13 = vadd.f32 %v4238_v55, %v4110_v57  ;;  %v6394_v33 = vor.u32 %v7392_v4, %v6391_v49 }
 0x32a   :  { %v3854_v63 = vpop.f32.mrf.mxu2 }
 0x32b   :  { %v3855_v52 = vadd.f32 %v3854_v63, %v8182_v60  ;;  %v3983_v11 = vpop.f32.mrf.mxu3  ;;  %v6390_v60 = vor.u32 %v7401_v41, %v6389_v3 }
 0x32c   :  { %v4114_v50 = vpop.f32.mrf.mxu0 }
 0x32d   :  { %v3984_v30 = vadd.f32 %v3983_v11, %v3855_v52  ;;  %v207_v52 = vld [vmem:[%s9286_s1 + $0x5a0] sm:$0xff] }
 0x32e   :  { %v4243_v5 = vpop.f32.mrf.mxu1 }
 0x32f   :  { %v4113_v10 = vadd.f32 %v4112_v22, %v3984_v30 }
 0x331   :  { %v8518_v59 = vadd.f32 %v4241_v6, %v4113_v10  ;;  %v191_v6 = vld [vmem:[%s9286_s1 + $0x520] sm:$0xff] }
 0x332   :  { %v3856_v55 = vpop.f32.mrf.mxu2 }
 0x333   :  { %v3857_v38 = vadd.f32 %v3856_v55, %v8197_v46  ;;  %v3985_v56 = vpop.f32.mrf.mxu3  ;;  %v192_v46 = vld [vmem:[%s9286_s1 + $0x528] sm:$0xff]  ;;  %v7419_v55 = vld [vmem:[#allocation2 + $0x83c] sm:$0xf0] }
 0x334   :  { %v4117_v14 = vpop.f32.mrf.mxu0  ;;  %v397_v11 = vpack.c.bf16 %v192_v46, %v191_v6 }
 0x335   :  { %v3986_v22 = vadd.f32 %v3985_v56, %v3857_v38  ;;  %v223_v38 = vld [vmem:[%s9286_s1 + $0x620] sm:$0xff]  ;;  %v7410_v56 = vld [vmem:[#allocation2 + $0x7fc] sm:$0xf] }
 0x336   :  { %v4246_v57 = vpop.f32.mrf.mxu1  ;;  %4346 = vmatpush.bf16.msrb.mxu2 %v397_v11 }
 0x337   :  { %v4115_v63 = vadd.f32 %v4114_v50, %v3986_v22  ;;  %3898 = vmatmul.bf16.gmra.mxu2 %v6390_v60  ;;  %4156 = vmatmul.bf16.gmra.mxu0 %v6398_v44  ;;  %v208_v50 = vld [vmem:[%s9286_s1 + $0x5a8] sm:$0xff]  ;;  %v6469_v60 = vld [vmem:[#allocation2 + $0x800] sm:$0xf] }
 0x338   :  { %4027 = vmatmul.bf16.gmra.mxu3 %v6394_v33  ;;  %v405_v3 = vpack.c.bf16 %v208_v50, %v207_v52  ;;  %v6463_v33 = vld [vmem:[#allocation2 + $0x840] sm:$0xf0]  ;;  %v6471_v22 = vld [vmem:[#allocation2 + $0x848] sm:$0xf0]  ;;  %v6462_v52 = vor.u32 %v7419_v55, %v6461_v40 }
 0x339   :  { %4285 = vmatmul.bf16.gmra.mxu1 %v6402_v27  ;;  %v8533_v30 = vadd.f32 %v4243_v5, %v4115_v63  ;;  %v224_v5 = vld [vmem:[%s9286_s1 + $0x628] sm:$0xff]  ;;  %v7411_v27 = vld [vmem:[#allocation2 + $0x804] sm:$0xf] }
 0x33a   :  { %v3859_v10 = vpop.f32.mrf.mxu2  ;;  %4475 = vmatpush.bf16.msrb.mxu3 %v405_v3  ;;  %v413_v44 = vpack.c.bf16 %v224_v5, %v223_v38  ;;  %v6474_v3 = vor.u32 %v7411_v27, %v6471_v22  ;;  %v7428_v27 = vld [vmem:[#allocation2 + $0x88c] sm:$0xf]  ;;  %v6541_v22 = vld [vmem:[#allocation2 + $0x890] sm:$0xf] }
 0x33b   :  { %v3860_v41 = vadd.f32 %v3859_v10, %v8206_v23  ;;  %v3988_v4 = vpop.f32.mrf.mxu3  ;;  %v7420_v23 = vld [vmem:[#allocation2 + $0x844] sm:$0xf0]  ;;  %v6466_v10 = vor.u32 %v7410_v56, %v6463_v33  ;;  %v7437_v33 = vld [vmem:[#allocation2 + $0x8cc] sm:$0xf0] }
 0x33c   :  { %v4119_v42 = vpop.f32.mrf.mxu0  ;;  %4604 = vmatpush.bf16.msrb.mxu0 %v413_v44  ;;  %v6470_v11 = vor.u32 %v7420_v23, %v6469_v60  ;;  %v6533_v44 = vld [vmem:[#allocation2 + $0x888] sm:$0xf] }
 0x33d   :  { %v3989_v0 = vadd.f32 %v3988_v4, %v3860_v41 }
 0x33e   :  { %v4248_v49 = vpop.f32.mrf.mxu1 }
 0x33f   :  { %v4118_v48 = vadd.f32 %v4117_v14, %v3989_v0 }
 0x341   :  { %v8542_v63 = vadd.f32 %v4246_v57, %v4118_v48  ;;  %v239_v57 = vld [vmem:[%s9286_s1 + $0x6a0] sm:$0xff]  ;;  %v240_v48 = vld [vmem:[%s9286_s1 + $0x6a8] sm:$0xff] }
 0x342   :  { %v3861_v6 = vpop.f32.mrf.mxu2 }
 0x343   :  { %v3862_v14 = vadd.f32 %v3861_v6, %v8215_v8  ;;  %v3990_v46 = vpop.f32.mrf.mxu3  ;;  %v421_v8 = vpack.c.bf16 %v240_v48, %v239_v57  ;;  %v7438_v6 = vld [vmem:[#allocation2 + $0x8d4] sm:$0xf0] }
 0x344   :  { %v4122_v50 = vpop.f32.mrf.mxu0 }
 0x345   :  { %v3991_v41 = vadd.f32 %v3990_v46, %v3862_v14  ;;  %4733 = vmatpush.bf16.msrb.mxu1 %v421_v8  ;;  %v6535_v14 = vld [vmem:[#allocation2 + $0x8d0] sm:$0xf0] }
 0x346   :  { %v4251_v4 = vpop.f32.mrf.mxu1  ;;  %v7429_v46 = vld [vmem:[#allocation2 + $0x894] sm:$0xf]  ;;  %v6538_v57 = vor.u32 %v7428_v27, %v6535_v14  ;;  %v7455_v27 = vld [vmem:[#allocation2 + $0x95c] sm:$0xf0] }
 0x347   :  { %v4120_v0 = vadd.f32 %v4119_v42, %v3991_v41  ;;  %3903 = vmatmul.bf16.gmra.mxu2 %v6462_v52  ;;  %4161 = vmatmul.bf16.gmra.mxu0 %v6470_v11  ;;  %v6543_v52 = vld [vmem:[#allocation2 + $0x8d8] sm:$0xf0]  ;;  %v6542_v41 = vor.u32 %v7438_v6, %v6541_v22  ;;  %v6605_v22 = vld [vmem:[#allocation2 + $0x918] sm:$0xf]  ;;  %v6613_v14 = vld [vmem:[#allocation2 + $0x920] sm:$0xf] }
 0x348   :  { %4032 = vmatmul.bf16.gmra.mxu3 %v6466_v10  ;;  %v6546_v48 = vor.u32 %v7429_v46, %v6543_v52  ;;  %v7446_v6 = vld [vmem:[#allocation2 + $0x91c] sm:$0xf]  ;;  %v7456_v46 = vld [vmem:[#allocation2 + $0x964] sm:$0xf0]  ;;  %v7447_v52 = vld [vmem:[#allocation2 + $0x924] sm:$0xf] }
 0x349   :  { %4290 = vmatmul.bf16.gmra.mxu1 %v6474_v3  ;;  %v8551_v40 = vadd.f32 %v4248_v49, %v4120_v0 }
 0x34a   :  { %v3864_v55 = vpop.f32.mrf.mxu2 }
 0x34b   :  { %v3865_v38 = vadd.f32 %v3864_v55, %v8218_v16  ;;  %v3993_v42 = vpop.f32.mrf.mxu3  ;;  %v6534_v16 = vor.u32 %v7437_v33, %v6533_v44 }
 0x34c   :  { %v4124_v5 = vpop.f32.mrf.mxu0 }
 0x34d   :  { %v3994_v56 = vadd.f32 %v3993_v42, %v3865_v38 }
 0x34e   :  { %v4253_v60 = vpop.f32.mrf.mxu1 }
 0x34f   :  { %v4123_v23 = vadd.f32 %v4122_v50, %v3994_v56 }
 0x351   :  { %v8554_v11 = vadd.f32 %v4251_v4, %v4123_v23 }
 0x352   :  { %v3866_v49 = vpop.f32.mrf.mxu2 }
 0x353   :  { %v3867_v10 = vadd.f32 %v3866_v49, %v8221_v1  ;;  %v3995_v3 = vpop.f32.mrf.mxu3  ;;  %v6615_v49 = vld [vmem:[#allocation2 + $0x968] sm:$0xf0] }
 0x354   :  { %v4127_v0 = vpop.f32.mrf.mxu0 }
 0x355   :  { %v3996_v50 = vadd.f32 %v3995_v3, %v3867_v10 }
 0x356   :  { %v4256_v8 = vpop.f32.mrf.mxu1 }
 0x357   :  { %v4125_v55 = vadd.f32 %v4124_v5, %v3996_v50  ;;  %3908 = vmatmul.bf16.gmra.mxu2 %v6534_v16  ;;  %4166 = vmatmul.bf16.gmra.mxu0 %v6542_v41  ;;  %v6607_v5 = vld [vmem:[#allocation2 + $0x960] sm:$0xf0]  ;;  %v6614_v41 = vor.u32 %v7456_v46, %v6613_v14  ;;  %v6618_v50 = vor.u32 %v7447_v52, %v6615_v49  ;;  %v6677_v52 = vld [vmem:[#allocation2 + $0x9a8] sm:$0xf] }
 0x358   :  { %4037 = vmatmul.bf16.gmra.mxu3 %v6538_v57 }
 0x359   :  { %4295 = vmatmul.bf16.gmra.mxu1 %v6546_v48  ;;  %v8557_v38 = vadd.f32 %v4253_v60, %v4125_v55  ;;  %v6610_v48 = vor.u32 %v7446_v6, %v6607_v5 }
 0x35a   :  { %v3869_v4 = vpop.f32.mrf.mxu2 }
 0x35b   :  { %v3870_v42 = vadd.f32 %v3869_v4, %v8224_v20  ;;  %v3998_v56 = vpop.f32.mrf.mxu3  ;;  %v6606_v20 = vor.u32 %v7455_v27, %v6605_v22 }
 0x35c   :  { %v4129_v1 = vpop.f32.mrf.mxu0 }
 0x35d   :  { %v3999_v23 = vadd.f32 %v3998_v56, %v3870_v42  ;;  %v205_v42 = vld [vmem:[%s9286_s1 + $0x590] sm:$0xff] }
 0x35e   :  { %v4258_v44 = vpop.f32.mrf.mxu1 }
 0x35f   :  { %v4128_v33 = vadd.f32 %v4127_v0, %v3999_v23 }
 0x361   :  { %v8560_v10 = vadd.f32 %v4256_v8, %v4128_v33  ;;  %v189_v8 = vld [vmem:[%s9286_s1 + $0x510] sm:$0xff] }
 0x362   :  { %v3871_v60 = vpop.f32.mrf.mxu2 }
 0x363   :  { %v3872_v3 = vadd.f32 %v3871_v60, %v8239_v19  ;;  %v4000_v16 = vpop.f32.mrf.mxu3  ;;  %v190_v19 = vld [vmem:[%s9286_s1 + $0x518] sm:$0xff]  ;;  %v7473_v60 = vld [vmem:[#allocation2 + $0x9ec] sm:$0xf0] }
 0x364   :  { %v4132_v57 = vpop.f32.mrf.mxu0  ;;  %v396_v56 = vpack.c.bf16 %v190_v19, %v189_v8 }
 0x365   :  { %v4001_v0 = vadd.f32 %v4000_v16, %v3872_v3  ;;  %v221_v3 = vld [vmem:[%s9286_s1 + $0x610] sm:$0xff]  ;;  %v7464_v16 = vld [vmem:[#allocation2 + $0x9ac] sm:$0xf] }
 0x366   :  { %v4261_v55 = vpop.f32.mrf.mxu1  ;;  %4347 = vmatpush.bf16.msrb.mxu2 %v396_v56 }
 0x367   :  { %v4130_v4 = vadd.f32 %v4129_v1, %v4001_v0  ;;  %3913 = vmatmul.bf16.gmra.mxu2 %v6606_v20  ;;  %4171 = vmatmul.bf16.gmra.mxu0 %v6614_v41  ;;  %v206_v1 = vld [vmem:[%s9286_s1 + $0x598] sm:$0xff]  ;;  %v6685_v20 = vld [vmem:[#allocation2 + $0x9b0] sm:$0xf] }
 0x368   :  { %4042 = vmatmul.bf16.gmra.mxu3 %v6610_v48  ;;  %v404_v22 = vpack.c.bf16 %v206_v1, %v205_v42  ;;  %v6679_v48 = vld [vmem:[#allocation2 + $0x9f0] sm:$0xf0]  ;;  %v6687_v0 = vld [vmem:[#allocation2 + $0x9f8] sm:$0xf0]  ;;  %v6678_v42 = vor.u32 %v7473_v60, %v6677_v52 }
 0x369   :  { %4300 = vmatmul.bf16.gmra.mxu1 %v6618_v50  ;;  %v8575_v23 = vadd.f32 %v4258_v44, %v4130_v4  ;;  %v222_v44 = vld [vmem:[%s9286_s1 + $0x618] sm:$0xff]  ;;  %v7465_v50 = vld [vmem:[#allocation2 + $0x9b4] sm:$0xf] }
 0x36a   :  { %v3874_v33 = vpop.f32.mrf.mxu2  ;;  %4476 = vmatpush.bf16.msrb.mxu3 %v404_v22  ;;  %v412_v41 = vpack.c.bf16 %v222_v44, %v221_v3  ;;  %v6690_v22 = vor.u32 %v7465_v50, %v6687_v0  ;;  %v7482_v50 = vld [vmem:[#allocation2 + $0xa3c] sm:$0xf]  ;;  %v6757_v0 = vld [vmem:[#allocation2 + $0xa40] sm:$0xf] }
 0x36b   :  { %v3875_v27 = vadd.f32 %v3874_v33, %v8248_v28  ;;  %v4003_v6 = vpop.f32.mrf.mxu3  ;;  %v7474_v28 = vld [vmem:[#allocation2 + $0x9f4] sm:$0xf0]  ;;  %v6682_v33 = vor.u32 %v7464_v16, %v6679_v48  ;;  %v7491_v48 = vld [vmem:[#allocation2 + $0xa7c] sm:$0xf0] }
 0x36c   :  { %v4134_v14 = vpop.f32.mrf.mxu0  ;;  %4605 = vmatpush.bf16.msrb.mxu0 %v412_v41  ;;  %v6686_v56 = vor.u32 %v7474_v28, %v6685_v20  ;;  %v6749_v41 = vld [vmem:[#allocation2 + $0xa38] sm:$0xf] }
 0x36d   :  { %v4004_v46 = vadd.f32 %v4003_v6, %v3875_v27 }
 0x36e   :  { %v4263_v5 = vpop.f32.mrf.mxu1 }
 0x36f   :  { %v4133_v49 = vadd.f32 %v4132_v57, %v4004_v46 }
 0x371   :  { %v8584_v4 = vadd.f32 %v4261_v55, %v4133_v49  ;;  %v237_v55 = vld [vmem:[%s9286_s1 + $0x690] sm:$0xff]  ;;  %v238_v49 = vld [vmem:[%s9286_s1 + $0x698] sm:$0xff] }
 0x372   :  { %v3876_v8 = vpop.f32.mrf.mxu2 }
 0x373   :  { %v3877_v57 = vadd.f32 %v3876_v8, %v8257_v54  ;;  %v4005_v19 = vpop.f32.mrf.mxu3  ;;  %v420_v54 = vpack.c.bf16 %v238_v49, %v237_v55  ;;  %v7492_v8 = vld [vmem:[#allocation2 + $0xa84] sm:$0xf0] }
 0x374   :  { %v4137_v1 = vpop.f32.mrf.mxu0 }
 0x375   :  { %v4006_v27 = vadd.f32 %v4005_v19, %v3877_v57  ;;  %4734 = vmatpush.bf16.msrb.mxu1 %v420_v54  ;;  %v6751_v57 = vld [vmem:[#allocation2 + $0xa80] sm:$0xf0] }
 0x376   :  { %v4266_v6 = vpop.f32.mrf.mxu1  ;;  %v7483_v19 = vld [vmem:[#allocation2 + $0xa44] sm:$0xf]  ;;  %v6754_v55 = vor.u32 %v7482_v50, %v6751_v57  ;;  %v7509_v50 = vld [vmem:[#allocation2 + $0xb0c] sm:$0xf0] }
 0x377   :  { %v4135_v46 = vadd.f32 %v4134_v14, %v4006_v27  ;;  %3918 = vmatmul.bf16.gmra.mxu2 %v6678_v42  ;;  %4176 = vmatmul.bf16.gmra.mxu0 %v6686_v56  ;;  %v6759_v42 = vld [vmem:[#allocation2 + $0xa88] sm:$0xf0]  ;;  %v6758_v27 = vor.u32 %v7492_v8, %v6757_v0  ;;  %v6821_v0 = vld [vmem:[#allocation2 + $0xac8] sm:$0xf]  ;;  %v6829_v57 = vld [vmem:[#allocation2 + $0xad0] sm:$0xf] }
 0x378   :  { %4047 = vmatmul.bf16.gmra.mxu3 %v6682_v33  ;;  %v6762_v49 = vor.u32 %v7483_v19, %v6759_v42  ;;  %v7500_v8 = vld [vmem:[#allocation2 + $0xacc] sm:$0xf]  ;;  %v7510_v19 = vld [vmem:[#allocation2 + $0xb14] sm:$0xf0]  ;;  %v7501_v42 = vld [vmem:[#allocation2 + $0xad4] sm:$0xf] }
 0x379   :  { %4305 = vmatmul.bf16.gmra.mxu1 %v6690_v22  ;;  %v8593_v52 = vadd.f32 %v4263_v5, %v4135_v46 }
 0x37a   :  { %v3879_v60 = vpop.f32.mrf.mxu2 }
 0x37b   :  { %v3880_v3 = vadd.f32 %v3879_v60, %v8260_v24  ;;  %v4008_v14 = vpop.f32.mrf.mxu3  ;;  %v6750_v24 = vor.u32 %v7491_v48, %v6749_v41 }
 0x37c   :  { %v4139_v44 = vpop.f32.mrf.mxu0 }
 0x37d   :  { %v4009_v16 = vadd.f32 %v4008_v14, %v3880_v3 }
 0x37e   :  { %v4268_v20 = vpop.f32.mrf.mxu1 }
 0x37f   :  { %v4138_v28 = vadd.f32 %v4137_v1, %v4009_v16 }
 0x381   :  { %v8596_v56 = vadd.f32 %v4266_v6, %v4138_v28 }
 0x382   :  { %v3881_v5 = vpop.f32.mrf.mxu2 }
 0x383   :  { %v3882_v33 = vadd.f32 %v3881_v5, %v8263_v32  ;;  %v4010_v22 = vpop.f32.mrf.mxu3  ;;  %v6831_v5 = vld [vmem:[#allocation2 + $0xb18] sm:$0xf0] }
 0x384   :  { %v4142_v46 = vpop.f32.mrf.mxu0 }
 0x385   :  { %v4011_v1 = vadd.f32 %v4010_v22, %v3882_v33 }
 0x386   :  { %v4271_v54 = vpop.f32.mrf.mxu1 }
 0x387   :  { %v4140_v60 = vadd.f32 %v4139_v44, %v4011_v1  ;;  %3923 = vmatmul.bf16.gmra.mxu2 %v6750_v24  ;;  %4181 = vmatmul.bf16.gmra.mxu0 %v6758_v27  ;;  %v6823_v44 = vld [vmem:[#allocation2 + $0xb10] sm:$0xf0]  ;;  %v6830_v27 = vor.u32 %v7510_v19, %v6829_v57  ;;  %v6834_v1 = vor.u32 %v7501_v42, %v6831_v5  ;;  %v6893_v42 = vld [vmem:[#allocation2 + $0xb58] sm:$0xf] }
 0x388   :  { %4052 = vmatmul.bf16.gmra.mxu3 %v6754_v55 }
 0x389   :  { %4310 = vmatmul.bf16.gmra.mxu1 %v6762_v49  ;;  %v8599_v3 = vadd.f32 %v4268_v20, %v4140_v60  ;;  %v6826_v49 = vor.u32 %v7500_v8, %v6823_v44 }
 0x38a   :  { %v3884_v6 = vpop.f32.mrf.mxu2 }
 0x38b   :  { %v3885_v14 = vadd.f32 %v3884_v6, %v8266_v18  ;;  %v4013_v16 = vpop.f32.mrf.mxu3  ;;  %v6822_v18 = vor.u32 %v7509_v50, %v6821_v0 }
 0x38c   :  { %v4144_v32 = vpop.f32.mrf.mxu0 }
 0x38d   :  { %v4014_v28 = vadd.f32 %v4013_v16, %v3885_v14  ;;  %v203_v14 = vld [vmem:[%s9286_s1 + $0x580] sm:$0xff] }
 0x38e   :  { %v4273_v41 = vpop.f32.mrf.mxu1 }
 0x38f   :  { %v4143_v48 = vadd.f32 %v4142_v46, %v4014_v28 }
 0x391   :  { %v8602_v33 = vadd.f32 %v4271_v54, %v4143_v48  ;;  %v187_v54 = vld [vmem:[%s9286_s1 + $0x500] sm:$0xff] }
 0x392   :  { %v3886_v20 = vpop.f32.mrf.mxu2 }
 0x393   :  { %v3887_v22 = vadd.f32 %v3886_v20, %v8281_v25  ;;  %v4015_v24 = vpop.f32.mrf.mxu3  ;;  %v188_v25 = vld [vmem:[%s9286_s1 + $0x508] sm:$0xff]  ;;  %v7527_v20 = vld [vmem:[#allocation2 + $0xb9c] sm:$0xf0] }
 0x394   :  { %v4147_v55 = vpop.f32.mrf.mxu0  ;;  %v395_v16 = vpack.c.bf16 %v188_v25, %v187_v54 }
 0x395   :  { %v4016_v46 = vadd.f32 %v4015_v24, %v3887_v22  ;;  %v219_v22 = vld [vmem:[%s9286_s1 + $0x600] sm:$0xff]  ;;  %v7518_v24 = vld [vmem:[#allocation2 + $0xb5c] sm:$0xf] }
 0x396   :  { %v4276_v60 = vpop.f32.mrf.mxu1  ;;  %4348 = vmatpush.bf16.msrb.mxu2 %v395_v16 }
 0x397   :  { %v4145_v6 = vadd.f32 %v4144_v32, %v4016_v46  ;;  %3928 = vmatmul.bf16.gmra.mxu2 %v6822_v18  ;;  %4186 = vmatmul.bf16.gmra.mxu0 %v6830_v27  ;;  %v204_v32 = vld [vmem:[%s9286_s1 + $0x588] sm:$0xff]  ;;  %v6901_v18 = vld [vmem:[#allocation2 + $0xb60] sm:$0xf] }
 0x398   :  { %4057 = vmatmul.bf16.gmra.mxu3 %v6826_v49  ;;  %v403_v0 = vpack.c.bf16 %v204_v32, %v203_v14  ;;  %v6895_v49 = vld [vmem:[#allocation2 + $0xba0] sm:$0xf0]  ;;  %v6903_v46 = vld [vmem:[#allocation2 + $0xba8] sm:$0xf0]  ;;  %v6894_v14 = vor.u32 %v7527_v20, %v6893_v42 }
 0x399   :  { %4315 = vmatmul.bf16.gmra.mxu1 %v6834_v1  ;;  %v8617_v28 = vadd.f32 %v4273_v41, %v4145_v6  ;;  %v220_v41 = vld [vmem:[%s9286_s1 + $0x608] sm:$0xff]  ;;  %v7519_v1 = vld [vmem:[#allocation2 + $0xb64] sm:$0xf] }
 0x39a   :  { %v3889_v48 = vpop.f32.mrf.mxu2  ;;  %4477 = vmatpush.bf16.msrb.mxu3 %v403_v0  ;;  %v411_v27 = vpack.c.bf16 %v220_v41, %v219_v22  ;;  %v6906_v0 = vor.u32 %v7519_v1, %v6903_v46  ;;  %v7536_v1 = vld [vmem:[#allocation2 + $0xbec] sm:$0xf]  ;;  %v6973_v46 = vld [vmem:[#allocation2 + $0xbf0] sm:$0xf] }
 0x39b   :  { %v3890_v50 = vadd.f32 %v3889_v48, %v8290_v61  ;;  %v4018_v8 = vpop.f32.mrf.mxu3  ;;  %v7528_v61 = vld [vmem:[#allocation2 + $0xba4] sm:$0xf0]  ;;  %v6898_v48 = vor.u32 %v7518_v24, %v6895_v49  ;;  %v7545_v49 = vld [vmem:[#allocation2 + $0xc2c] sm:$0xf0] }
 0x39c   :  { %v4149_v57 = vpop.f32.mrf.mxu0  ;;  %4606 = vmatpush.bf16.msrb.mxu0 %v411_v27  ;;  %v6902_v16 = vor.u32 %v7528_v61, %v6901_v18  ;;  %v6965_v27 = vld [vmem:[#allocation2 + $0xbe8] sm:$0xf] }
 0x39d   :  { %v4019_v19 = vadd.f32 %v4018_v8, %v3890_v50 }
 0x39e   :  { %v4278_v44 = vpop.f32.mrf.mxu1 }
 0x39f   :  { %v4148_v5 = vadd.f32 %v4147_v55, %v4019_v19 }
 0x3a1   :  { %v8626_v6 = vadd.f32 %v4276_v60, %v4148_v5  ;;  %v235_v60 = vld [vmem:[%s9286_s1 + $0x680] sm:$0xff]  ;;  %v236_v5 = vld [vmem:[%s9286_s1 + $0x688] sm:$0xff] }
 0x3a2   :  { %v3891_v54 = vpop.f32.mrf.mxu2 }
 0x3a3   :  { %v3892_v55 = vadd.f32 %v3891_v54, %v8299_v21  ;;  %v4020_v25 = vpop.f32.mrf.mxu3  ;;  %v419_v21 = vpack.c.bf16 %v236_v5, %v235_v60  ;;  %v7546_v54 = vld [vmem:[#allocation2 + $0xc34] sm:$0xf0] }
 0x3a4   :  { %v4152_v32 = vpop.f32.mrf.mxu0 }
 0x3a5   :  { %v4021_v50 = vadd.f32 %v4020_v25, %v3892_v55  ;;  %4735 = vmatpush.bf16.msrb.mxu1 %v419_v21  ;;  %v6967_v55 = vld [vmem:[#allocation2 + $0xc30] sm:$0xf0] }
 0x3a6   :  { %v4281_v8 = vpop.f32.mrf.mxu1  ;;  %v7537_v25 = vld [vmem:[#allocation2 + $0xbf4] sm:$0xf]  ;;  %v6970_v60 = vor.u32 %v7536_v1, %v6967_v55  ;;  %v7563_v1 = vld [vmem:[#allocation2 + $0xcbc] sm:$0xf0] }
 0x3a7   :  { %v4150_v19 = vadd.f32 %v4149_v57, %v4021_v50  ;;  %3933 = vmatmul.bf16.gmra.mxu2 %v6894_v14  ;;  %4191 = vmatmul.bf16.gmra.mxu0 %v6902_v16  ;;  %v6975_v14 = vld [vmem:[#allocation2 + $0xc38] sm:$0xf0]  ;;  %v6974_v50 = vor.u32 %v7546_v54, %v6973_v46  ;;  %v7037_v46 = vld [vmem:[#allocation2 + $0xc78] sm:$0xf]  ;;  %v7045_v55 = vld [vmem:[#allocation2 + $0xc80] sm:$0xf] }
 0x3a8   :  { %4062 = vmatmul.bf16.gmra.mxu3 %v6898_v48  ;;  %v6978_v5 = vor.u32 %v7537_v25, %v6975_v14  ;;  %v7554_v54 = vld [vmem:[#allocation2 + $0xc7c] sm:$0xf]  ;;  %v7564_v25 = vld [vmem:[#allocation2 + $0xcc4] sm:$0xf0]  ;;  %v7555_v14 = vld [vmem:[#allocation2 + $0xc84] sm:$0xf] }
 0x3a9   :  { %4320 = vmatmul.bf16.gmra.mxu1 %v6906_v0  ;;  %v8635_v42 = vadd.f32 %v4278_v44, %v4150_v19 }
 0x3aa   :  { %v3894_v20 = vpop.f32.mrf.mxu2 }
 0x3ab   :  { %v3895_v22 = vadd.f32 %v3894_v20, %v8302_v7  ;;  %v4023_v57 = vpop.f32.mrf.mxu3  ;;  %v6966_v7 = vor.u32 %v7545_v49, %v6965_v27 }
 0x3ac   :  { %v4154_v41 = vpop.f32.mrf.mxu0 }
 0x3ad   :  { %v4024_v24 = vadd.f32 %v4023_v57, %v3895_v22 }
 0x3ae   :  { %v4283_v18 = vpop.f32.mrf.mxu1 }
 0x3af   :  { %v4153_v61 = vadd.f32 %v4152_v32, %v4024_v24 }
 0x3b1   :  { %v8638_v16 = vadd.f32 %v4281_v8, %v4153_v61 }
 0x3b2   :  { %v3896_v44 = vpop.f32.mrf.mxu2 }
 0x3b3   :  { %v3897_v48 = vadd.f32 %v3896_v44, %v8305_v9  ;;  %v4025_v0 = vpop.f32.mrf.mxu3  ;;  %v7047_v44 = vld [vmem:[#allocation2 + $0xcc8] sm:$0xf0] }
 0x3b4   :  { %v4157_v19 = vpop.f32.mrf.mxu0 }
 0x3b5   :  { %v4026_v32 = vadd.f32 %v4025_v0, %v3897_v48 }
 0x3b6   :  { %v4286_v21 = vpop.f32.mrf.mxu1 }
 0x3b7   :  { %v4155_v20 = vadd.f32 %v4154_v41, %v4026_v32  ;;  %3938 = vmatmul.bf16.gmra.mxu2 %v6966_v7  ;;  %4196 = vmatmul.bf16.gmra.mxu0 %v6974_v50  ;;  %v7039_v41 = vld [vmem:[#allocation2 + $0xcc0] sm:$0xf0]  ;;  %v7046_v50 = vor.u32 %v7564_v25, %v7045_v55  ;;  %v7050_v32 = vor.u32 %v7555_v14, %v7047_v44  ;;  %v7109_v14 = vld [vmem:[#allocation2 + $0xd08] sm:$0xf] }
 0x3b8   :  { %4067 = vmatmul.bf16.gmra.mxu3 %v6970_v60 }
 0x3b9   :  { %4325 = vmatmul.bf16.gmra.mxu1 %v6978_v5  ;;  %v8641_v22 = vadd.f32 %v4283_v18, %v4155_v20  ;;  %v7042_v5 = vor.u32 %v7554_v54, %v7039_v41 }
 0x3ba   :  { %v3899_v8 = vpop.f32.mrf.mxu2 }
 0x3bb   :  { %v3900_v57 = vadd.f32 %v3899_v8, %v8308_v51  ;;  %v4028_v24 = vpop.f32.mrf.mxu3  ;;  %v7038_v51 = vor.u32 %v7563_v1, %v7037_v46 }
 0x3bc   :  { %v4159_v9 = vpop.f32.mrf.mxu0 }
 0x3bd   :  { %v4029_v61 = vadd.f32 %v4028_v24, %v3900_v57  ;;  %v281_v57 = vld [vmem:[%s9286_s1 + $0x7f0] sm:$0xff] }
 0x3be   :  { %v4288_v27 = vpop.f32.mrf.mxu1 }
 0x3bf   :  { %v4158_v49 = vadd.f32 %v4157_v19, %v4029_v61 }
 0x3c1   :  { %v8644_v48 = vadd.f32 %v4286_v21, %v4158_v49  ;;  %v265_v21 = vld [vmem:[%s9286_s1 + $0x770] sm:$0xff] }
 0x3c2   :  { %v3901_v18 = vpop.f32.mrf.mxu2 }
 0x3c3   :  { %v3902_v0 = vadd.f32 %v3901_v18, %v8323_v29  ;;  %v4030_v7 = vpop.f32.mrf.mxu3  ;;  %v266_v29 = vld [vmem:[%s9286_s1 + $0x778] sm:$0xff]  ;;  %v7581_v18 = vld [vmem:[#allocation2 + $0xd4c] sm:$0xf0] }
 0x3c4   :  { %v4162_v60 = vpop.f32.mrf.mxu0  ;;  %v434_v24 = vpack.c.bf16 %v266_v29, %v265_v21 }
 0x3c5   :  { %v4031_v19 = vadd.f32 %v4030_v7, %v3902_v0  ;;  %v297_v0 = vld [vmem:[%s9286_s1 + $0x870] sm:$0xff]  ;;  %v7572_v7 = vld [vmem:[#allocation2 + $0xd0c] sm:$0xf] }
 0x3c6   :  { %v4291_v20 = vpop.f32.mrf.mxu1  ;;  %4857 = vmatpush.bf16.msra.mxu2 %v434_v24 }
 0x3c7   :  { %v4160_v8 = vadd.f32 %v4159_v9, %v4031_v19  ;;  %3943 = vmatmul.bf16.gmra.mxu2 %v7038_v51  ;;  %4201 = vmatmul.bf16.gmra.mxu0 %v7046_v50  ;;  %v282_v9 = vld [vmem:[%s9286_s1 + $0x7f8] sm:$0xff]  ;;  %v7117_v51 = vld [vmem:[#allocation2 + $0xd10] sm:$0xf] }
 0x3c8   :  { %4072 = vmatmul.bf16.gmra.mxu3 %v7042_v5  ;;  %v442_v46 = vpack.c.bf16 %v282_v9, %v281_v57  ;;  %v7111_v5 = vld [vmem:[#allocation2 + $0xd50] sm:$0xf0]  ;;  %v7119_v19 = vld [vmem:[#allocation2 + $0xd58] sm:$0xf0]  ;;  %v7110_v57 = vor.u32 %v7581_v18, %v7109_v14 }
 0x3c9   :  { %4330 = vmatmul.bf16.gmra.mxu1 %v7050_v32  ;;  %v8659_v61 = vadd.f32 %v4288_v27, %v4160_v8  ;;  %v298_v27 = vld [vmem:[%s9286_s1 + $0x878] sm:$0xff]  ;;  %v7573_v32 = vld [vmem:[#allocation2 + $0xd14] sm:$0xf] }
 0x3ca   :  { %v3904_v49 = vpop.f32.mrf.mxu2  ;;  %4986 = vmatpush.bf16.msra.mxu3 %v442_v46  ;;  %v450_v50 = vpack.c.bf16 %v298_v27, %v297_v0  ;;  %v7122_v46 = vor.u32 %v7573_v32, %v7119_v19  ;;  %v7160_v32 = vld [vmem:[#allocation2 + $0x2c] sm:$0xf]  ;;  %v5477_v19 = vld [vmem:[#allocation2 + $0x30] sm:$0xf] }
 0x3cb   :  { %v3905_v1 = vadd.f32 %v3904_v49, %v8332_v36  ;;  %v4033_v54 = vpop.f32.mrf.mxu3  ;;  %v7582_v36 = vld [vmem:[#allocation2 + $0xd54] sm:$0xf0]  ;;  %v7114_v49 = vor.u32 %v7572_v7, %v7111_v5  ;;  %v7169_v5 = vld [vmem:[#allocation2 + $0x6c] sm:$0xf0] }
 0x3cc   :  { %v4164_v55 = vpop.f32.mrf.mxu0  ;;  %5115 = vmatpush.bf16.msra.mxu0 %v450_v50  ;;  %v7118_v24 = vor.u32 %v7582_v36, %v7117_v51  ;;  %v5469_v50 = vld [vmem:[#allocation2 + $0x28] sm:$0xf] }
 0x3cd   :  { %v4034_v25 = vadd.f32 %v4033_v54, %v3905_v1 }
 0x3ce   :  { %v4293_v41 = vpop.f32.mrf.mxu1 }
 0x3cf   :  { %v4163_v44 = vadd.f32 %v4162_v60, %v4034_v25 }
 0x3d1   :  { %v8668_v8 = vadd.f32 %v4291_v20, %v4163_v44  ;;  %v313_v20 = vld [vmem:[%s9286_s1 + $0x8f0] sm:$0xff]  ;;  %v314_v44 = vld [vmem:[%s9286_s1 + $0x8f8] sm:$0xff] }
 0x3d2   :  { %v3906_v21 = vpop.f32.mrf.mxu2 }
 0x3d3   :  { %v3907_v60 = vadd.f32 %v3906_v21, %v8341_v2  ;;  %v4035_v29 = vpop.f32.mrf.mxu3  ;;  %v458_v2 = vpack.c.bf16 %v314_v44, %v313_v20  ;;  %v7170_v21 = vld [vmem:[#allocation2 + $0x74] sm:$0xf0] }
 0x3d4   :  { %v4167_v9 = vpop.f32.mrf.mxu0 }
 0x3d5   :  { %v4036_v1 = vadd.f32 %v4035_v29, %v3907_v60  ;;  %5244 = vmatpush.bf16.msra.mxu1 %v458_v2  ;;  %v5471_v60 = vld [vmem:[#allocation2 + $0x70] sm:$0xf0] }
 0x3d6   :  { %v4296_v54 = vpop.f32.mrf.mxu1  ;;  %v7161_v29 = vld [vmem:[#allocation2 + $0x34] sm:$0xf]  ;;  %v5474_v20 = vor.u32 %v7160_v32, %v5471_v60  ;;  %v7187_v32 = vld [vmem:[#allocation2 + $0xfc] sm:$0xf0] }
 0x3d7   :  { %v4165_v25 = vadd.f32 %v4164_v55, %v4036_v1  ;;  %3948 = vmatmul.bf16.gmra.mxu2 %v7110_v57  ;;  %4206 = vmatmul.bf16.gmra.mxu0 %v7118_v24  ;;  %v5479_v57 = vld [vmem:[#allocation2 + $0x78] sm:$0xf0]  ;;  %v5478_v1 = vor.u32 %v7170_v21, %v5477_v19  ;;  %v5541_v19 = vld [vmem:[#allocation2 + $0xb8] sm:$0xf]  ;;  %v5549_v60 = vld [vmem:[#allocation2 + $0xc0] sm:$0xf] }
 0x3d8   :  { %4077 = vmatmul.bf16.gmra.mxu3 %v7114_v49  ;;  %v5482_v44 = vor.u32 %v7161_v29, %v5479_v57  ;;  %v7178_v21 = vld [vmem:[#allocation2 + $0xbc] sm:$0xf]  ;;  %v7188_v29 = vld [vmem:[#allocation2 + $0x104] sm:$0xf0]  ;;  %v7179_v57 = vld [vmem:[#allocation2 + $0xc4] sm:$0xf] }
 0x3d9   :  { %4335 = vmatmul.bf16.gmra.mxu1 %v7122_v46  ;;  %v8677_v14 = vadd.f32 %v4293_v41, %v4165_v25 }
 0x3da   :  { %v3909_v18 = vpop.f32.mrf.mxu2 }
 0x3db   :  { %v3910_v0 = vadd.f32 %v3909_v18, %v8344_v34  ;;  %v4038_v55 = vpop.f32.mrf.mxu3  ;;  %v5470_v34 = vor.u32 %v7169_v5, %v5469_v50 }
 0x3dc   :  { %v4169_v27 = vpop.f32.mrf.mxu0 }
 0x3dd   :  { %v4039_v7 = vadd.f32 %v4038_v55, %v3910_v0 }
 0x3de   :  { %v4298_v51 = vpop.f32.mrf.mxu1 }
 0x3df   :  { %v4168_v36 = vadd.f32 %v4167_v9, %v4039_v7 }
 0x3e1   :  { %v8680_v24 = vadd.f32 %v4296_v54, %v4168_v36 }
 0x3e2   :  { %v3911_v41 = vpop.f32.mrf.mxu2 }
 0x3e3   :  { %v3912_v49 = vadd.f32 %v3911_v41, %v8347_v37  ;;  %v4040_v46 = vpop.f32.mrf.mxu3  ;;  %v5551_v41 = vld [vmem:[#allocation2 + $0x108] sm:$0xf0] }
 0x3e4   :  { %v4172_v25 = vpop.f32.mrf.mxu0 }
 0x3e5   :  { %v4041_v9 = vadd.f32 %v4040_v46, %v3912_v49 }
 0x3e6   :  { %v4301_v2 = vpop.f32.mrf.mxu1 }
 0x3e7   :  { %v4170_v18 = vadd.f32 %v4169_v27, %v4041_v9  ;;  %4349 = vmatmul.bf16.vlgmr.msrb.gmra.mxu2 %v5470_v34  ;;  %4607 = vmatmul.bf16.vlgmr.msrb.gmra.mxu0 %v5478_v1  ;;  %v5543_v27 = vld [vmem:[#allocation2 + $0x100] sm:$0xf0]  ;;  %v5550_v1 = vor.u32 %v7188_v29, %v5549_v60  ;;  %v5554_v9 = vor.u32 %v7179_v57, %v5551_v41  ;;  %v5613_v57 = vld [vmem:[#allocation2 + $0x148] sm:$0xf] }
 0x3e8   :  { %4478 = vmatmul.bf16.vlgmr.msrb.gmra.mxu3 %v5474_v20 }
 0x3e9   :  { %4736 = vmatmul.bf16.vlgmr.msrb.gmra.mxu1 %v5482_v44  ;;  %v8683_v0 = vadd.f32 %v4298_v51, %v4170_v18  ;;  %v5546_v44 = vor.u32 %v7178_v21, %v5543_v27 }
 0x3ea   :  { %v3914_v54 = vpop.f32.mrf.mxu2 }
 0x3eb   :  { %v3915_v55 = vadd.f32 %v3914_v54, %v8350_v43  ;;  %v4043_v7 = vpop.f32.mrf.mxu3  ;;  %v5542_v43 = vor.u32 %v7187_v32, %v5541_v19 }
 0x3ec   :  { %v4174_v37 = vpop.f32.mrf.mxu0 }
 0x3ed   :  { %v4044_v36 = vadd.f32 %v4043_v7, %v3915_v55  ;;  %v279_v55 = vld [vmem:[%s9286_s1 + $0x7e0] sm:$0xff] }
 0x3ee   :  { %v4303_v50 = vpop.f32.mrf.mxu1 }
 0x3ef   :  { %v4173_v5 = vadd.f32 %v4172_v25, %v4044_v36 }
 0x3f1   :  { %v8686_v49 = vadd.f32 %v4301_v2, %v4173_v5  ;;  %v263_v2 = vld [vmem:[%s9286_s1 + $0x760] sm:$0xff] }
 0x3f2   :  { %v3916_v51 = vpop.f32.mrf.mxu2 }
 0x3f3   :  { %v3917_v46 = vadd.f32 %v3916_v51, %v8365_v58  ;;  %v4045_v34 = vpop.f32.mrf.mxu3  ;;  %v264_v58 = vld [vmem:[%s9286_s1 + $0x768] sm:$0xff]  ;;  %v7205_v51 = vld [vmem:[#allocation2 + $0x18c] sm:$0xf0] }
 0x3f4   :  { %v4177_v20 = vpop.f32.mrf.mxu0  ;;  %v433_v7 = vpack.c.bf16 %v264_v58, %v263_v2 }
 0x3f5   :  { %v4046_v25 = vadd.f32 %v4045_v34, %v3917_v46  ;;  %v295_v46 = vld [vmem:[%s9286_s1 + $0x860] sm:$0xff]  ;;  %v7196_v34 = vld [vmem:[#allocation2 + $0x14c] sm:$0xf] }
 0x3f6   :  { %v4306_v18 = vpop.f32.mrf.mxu1  ;;  %4858 = vmatpush.bf16.msra.mxu2 %v433_v7 }
 0x3f7   :  { %v4175_v54 = vadd.f32 %v4174_v37, %v4046_v25  ;;  %4354 = vmatmul.bf16.gmra.mxu2 %v5542_v43  ;;  %4612 = vmatmul.bf16.gmra.mxu0 %v5550_v1  ;;  %v280_v37 = vld [vmem:[%s9286_s1 + $0x7e8] sm:$0xff]  ;;  %v5621_v43 = vld [vmem:[#allocation2 + $0x150] sm:$0xf]  ;;  %v5623_v25 = vld [vmem:[#allocation2 + $0x198] sm:$0xf0] }
 0x3f8   :  { %4483 = vmatmul.bf16.gmra.mxu3 %v5546_v44  ;;  %v441_v19 = vpack.c.bf16 %v280_v37, %v279_v55  ;;  %v5615_v44 = vld [vmem:[#allocation2 + $0x190] sm:$0xf0]  ;;  %v5614_v55 = vor.u32 %v7205_v51, %v5613_v57 }
 0x3f9   :  { %4741 = vmatmul.bf16.gmra.mxu1 %v5554_v9  ;;  %v8701_v36 = vadd.f32 %v4303_v50, %v4175_v54  ;;  %v296_v50 = vld [vmem:[%s9286_s1 + $0x868] sm:$0xff]  ;;  %v7197_v9 = vld [vmem:[#allocation2 + $0x154] sm:$0xf] }
 0x3fa   :  { %v3919_v5 = vpop.f32.mrf.mxu2  ;;  %4987 = vmatpush.bf16.msra.mxu3 %v441_v19  ;;  %v449_v1 = vpack.c.bf16 %v296_v50, %v295_v46  ;;  %v5626_v19 = vor.u32 %v7197_v9, %v5623_v25  ;;  %v7214_v9 = vld [vmem:[#allocation2 + $0x1dc] sm:$0xf]  ;;  %v5693_v25 = vld [vmem:[#allocation2 + $0x1e0] sm:$0xf] }
 0x3fb   :  { %v3920_v32 = vadd.f32 %v3919_v5, %v8374_v47  ;;  %v4048_v21 = vpop.f32.mrf.mxu3  ;;  %v7206_v47 = vld [vmem:[#allocation2 + $0x194] sm:$0xf0]  ;;  %v5618_v5 = vor.u32 %v7196_v34, %v5615_v44  ;;  %v7223_v44 = vld [vmem:[#allocation2 + $0x21c] sm:$0xf0] }
 0x3fc   :  { %v4179_v60 = vpop.f32.mrf.mxu0  ;;  %5116 = vmatpush.bf16.msra.mxu0 %v449_v1  ;;  %v5622_v7 = vor.u32 %v7206_v47, %v5621_v43  ;;  %v5685_v1 = vld [vmem:[#allocation2 + $0x1d8] sm:$0xf] }
 0x3fd   :  { %v4049_v29 = vadd.f32 %v4048_v21, %v3920_v32 }
 0x3fe   :  { %v4308_v27 = vpop.f32.mrf.mxu1 }
 0x3ff   :  { %v4178_v41 = vadd.f32 %v4177_v20, %v4049_v29 }
 0x401   :  { %v8710_v54 = vadd.f32 %v4306_v18, %v4178_v41  ;;  %v311_v18 = vld [vmem:[%s9286_s1 + $0x8e0] sm:$0xff]  ;;  %v312_v41 = vld [vmem:[%s9286_s1 + $0x8e8] sm:$0xff] }
 0x402   :  { %v3921_v2 = vpop.f32.mrf.mxu2 }
 0x403   :  { %v3922_v20 = vadd.f32 %v3921_v2, %v8383_v35  ;;  %v4050_v58 = vpop.f32.mrf.mxu3  ;;  %v457_v35 = vpack.c.bf16 %v312_v41, %v311_v18  ;;  %v7224_v2 = vld [vmem:[#allocation2 + $0x224] sm:$0xf0] }
 0x404   :  { %v4182_v37 = vpop.f32.mrf.mxu0 }
 0x405   :  { %v4051_v32 = vadd.f32 %v4050_v58, %v3922_v20  ;;  %5245 = vmatpush.bf16.msra.mxu1 %v457_v35  ;;  %v5687_v20 = vld [vmem:[#allocation2 + $0x220] sm:$0xf0] }
 0x406   :  { %v4311_v21 = vpop.f32.mrf.mxu1  ;;  %v7215_v58 = vld [vmem:[#allocation2 + $0x1e4] sm:$0xf]  ;;  %v5690_v18 = vor.u32 %v7214_v9, %v5687_v20  ;;  %v7241_v9 = vld [vmem:[#allocation2 + $0x2ac] sm:$0xf0] }
 0x407   :  { %v4180_v29 = vadd.f32 %v4179_v60, %v4051_v32  ;;  %4359 = vmatmul.bf16.gmra.mxu2 %v5614_v55  ;;  %4617 = vmatmul.bf16.gmra.mxu0 %v5622_v7  ;;  %v5695_v55 = vld [vmem:[#allocation2 + $0x228] sm:$0xf0]  ;;  %v5694_v32 = vor.u32 %v7224_v2, %v5693_v25  ;;  %v5757_v25 = vld [vmem:[#allocation2 + $0x268] sm:$0xf]  ;;  %v5765_v20 = vld [vmem:[#allocation2 + $0x270] sm:$0xf] }
 0x408   :  { %4488 = vmatmul.bf16.gmra.mxu3 %v5618_v5  ;;  %v5698_v41 = vor.u32 %v7215_v58, %v5695_v55  ;;  %v7232_v2 = vld [vmem:[#allocation2 + $0x26c] sm:$0xf]  ;;  %v7242_v58 = vld [vmem:[#allocation2 + $0x2b4] sm:$0xf0]  ;;  %v7233_v55 = vld [vmem:[#allocation2 + $0x274] sm:$0xf] }
 0x409   :  { %4746 = vmatmul.bf16.gmra.mxu1 %v5626_v19  ;;  %v8719_v57 = vadd.f32 %v4308_v27, %v4180_v29 }
 0x40a   :  { %v3924_v51 = vpop.f32.mrf.mxu2 }
 0x40b   :  { %v3925_v46 = vadd.f32 %v3924_v51, %v8386_v53  ;;  %v4053_v60 = vpop.f32.mrf.mxu3  ;;  %v5686_v53 = vor.u32 %v7223_v44, %v5685_v1 }
 0x40c   :  { %v4184_v50 = vpop.f32.mrf.mxu0 }
 0x40d   :  { %v4054_v34 = vadd.f32 %v4053_v60, %v3925_v46  ;;  %v9320_v60 = vld [vmem:[#allocation15_spill] sm:$0xff] }
 0x40e   :  { %v4313_v43 = vpop.f32.mrf.mxu1 }
 0x40f   :  { %v4183_v47 = vadd.f32 %v4182_v37, %v4054_v34 }
 0x411   :  { %v8722_v7 = vadd.f32 %v4311_v21, %v4183_v47 }
 0x412   :  { %v3926_v27 = vpop.f32.mrf.mxu2 }
 0x413   :  { %9318 = vst [vmem:[#allocation13_spill] sm:$0xff] %v8722_v7  ;;  %v3927_v5 = vadd.f32 %v3926_v27, %v8389_v62  ;;  %v4055_v19 = vpop.f32.mrf.mxu3 }
 0x414   :  { %v4187_v29 = vpop.f32.mrf.mxu0 }
 0x415   :  { %v4056_v37 = vadd.f32 %v4055_v19, %v3927_v5  ;;  %v5767_v5 = vld [vmem:[#allocation2 + $0x2b8] sm:$0xf0] }
 0x416   :  { %v4316_v35 = vpop.f32.mrf.mxu1 }
 0x417   :  { %v4185_v51 = vadd.f32 %v4184_v50, %v4056_v37  ;;  %4364 = vmatmul.bf16.gmra.mxu2 %v5686_v53  ;;  %4622 = vmatmul.bf16.gmra.mxu0 %v5694_v32  ;;  %v5759_v50 = vld [vmem:[#allocation2 + $0x2b0] sm:$0xf0]  ;;  %v9322_v53 = vld [vmem:[#allocation16_spill] sm:$0xff]  ;;  %v5766_v37 = vor.u32 %v7242_v58, %v5765_v20  ;;  %v9324_v58 = vld [vmem:[#allocation5_spill] sm:$0xff] }
 0x418   :  { %4493 = vmatmul.bf16.gmra.mxu3 %v5690_v18 }
 0x419   :  { %4751 = vmatmul.bf16.gmra.mxu1 %v5698_v41  ;;  %v8725_v46 = vadd.f32 %v4313_v43, %v4185_v51  ;;  %v5758_v41 = vor.u32 %v7241_v9, %v5757_v25 }
 0x41a   :  { %v3929_v21 = vpop.f32.mrf.mxu2 }
 0x41b   :  { %9319 = vst [vmem:[#allocation14_spill] sm:$0xff] %v8725_v46  ;;  %v3930_v34 = vadd.f32 %v3929_v21, %v9320_v60  ;;  %v4058_v47 = vpop.f32.mrf.mxu3  ;;  %v5762_v21 = vor.u32 %v7232_v2, %v5759_v50  ;;  %v5770_v60 = vor.u32 %v7233_v55, %v5767_v5 }
 0x41c   :  { %v4189_v62 = vpop.f32.mrf.mxu0 }
 0x41d   :  { %v4059_v27 = vadd.f32 %v4058_v47, %v3930_v34 }
 0x41e   :  { %v4318_v1 = vpop.f32.mrf.mxu1 }
 0x41f   :  { %v4188_v44 = vadd.f32 %v4187_v29, %v4059_v27  ;;  %v262_v27 = vld [vmem:[%s9286_s1 + $0x758] sm:$0xff] }
 0x421   :  { %v8728_v19 = vadd.f32 %v4316_v35, %v4188_v44  ;;  %v261_v35 = vld [vmem:[%s9286_s1 + $0x750] sm:$0xff] }
 0x422   :  { %v3931_v43 = vpop.f32.mrf.mxu2  ;;  %v277_v44 = vld [vmem:[%s9286_s1 + $0x7d0] sm:$0xff]  ;;  %v432_v25 = vpack.c.bf16 %v262_v27, %v261_v35  ;;  %v5831_v35 = vld [vmem:[#allocation2 + $0x340] sm:$0xf0] }
 0x423   :  { %9321 = vst [vmem:[#allocation15_spill] sm:$0xff] %v8728_v19  ;;  %v3932_v32 = vadd.f32 %v3931_v43, %v9322_v53  ;;  %v4060_v18 = vpop.f32.mrf.mxu3  ;;  %v7251_v27 = vld [vmem:[#allocation2 + $0x304] sm:$0xf] }
 0x424   :  { %v4192_v51 = vpop.f32.mrf.mxu0  ;;  %4859 = vmatpush.bf16.msra.mxu2 %v432_v25 }
 0x425   :  { %v4061_v29 = vadd.f32 %v4060_v18, %v3932_v32  ;;  %v5829_v32 = vld [vmem:[#allocation2 + $0x2f8] sm:$0xf] }
 0x426   :  { %v4321_v34 = vpop.f32.mrf.mxu1 }
 0x427   :  { %v4190_v47 = vadd.f32 %v4189_v62, %v4061_v29  ;;  %4369 = vmatmul.bf16.gmra.mxu2 %v5758_v41  ;;  %4627 = vmatmul.bf16.gmra.mxu0 %v5766_v37  ;;  %v278_v62 = vld [vmem:[%s9286_s1 + $0x7d8] sm:$0xff]  ;;  %v7259_v41 = vld [vmem:[#allocation2 + $0x33c] sm:$0xf0]  ;;  %v293_v37 = vld [vmem:[%s9286_s1 + $0x850] sm:$0xff] }
 0x428   :  { %4498 = vmatmul.bf16.gmra.mxu3 %v5762_v21  ;;  %v440_v20 = vpack.c.bf16 %v278_v62, %v277_v44  ;;  %v7250_v21 = vld [vmem:[#allocation2 + $0x2fc] sm:$0xf]  ;;  %v7260_v29 = vld [vmem:[#allocation2 + $0x344] sm:$0xf0]  ;;  %v5839_v44 = vld [vmem:[#allocation2 + $0x348] sm:$0xf0] }
 0x429   :  { %4756 = vmatmul.bf16.gmra.mxu1 %v5770_v60  ;;  %v8743_v9 = vadd.f32 %v4318_v1, %v4190_v47  ;;  %v294_v1 = vld [vmem:[%s9286_s1 + $0x858] sm:$0xff]  ;;  %v5837_v60 = vld [vmem:[#allocation2 + $0x300] sm:$0xf] }
 0x42a   :  { %v3934_v2 = vpop.f32.mrf.mxu2  ;;  %4988 = vmatpush.bf16.msra.mxu3 %v440_v20  ;;  %v448_v47 = vpack.c.bf16 %v294_v1, %v293_v37  ;;  %v9327_v1 = vld [vmem:[#allocation7_spill] sm:$0xff] }
 0x42b   :  { %9323 = vst [vmem:[#allocation16_spill] sm:$0xff] %v8743_v9  ;;  %v3935_v50 = vadd.f32 %v3934_v2, %v9324_v58  ;;  %v4063_v55 = vpop.f32.mrf.mxu3  ;;  %v5830_v58 = vor.u32 %v7259_v41, %v5829_v32  ;;  %v5842_v9 = vor.u32 %v7251_v27, %v5839_v44  ;;  %v7277_v27 = vld [vmem:[#allocation2 + $0x3cc] sm:$0xf0]  ;;  %v7268_v44 = vld [vmem:[#allocation2 + $0x38c] sm:$0xf] }
 0x42c   :  { %v4194_v5 = vpop.f32.mrf.mxu0  ;;  %5117 = vmatpush.bf16.msra.mxu0 %v448_v47 }
 0x42d   :  { %v4064_v43 = vadd.f32 %v4063_v55, %v3935_v50  ;;  %v5838_v50 = vor.u32 %v7260_v29, %v5837_v60 }
 0x42e   :  { %v4323_v53 = vpop.f32.mrf.mxu1 }
 0x42f   :  { %v4193_v18 = vadd.f32 %v4192_v51, %v4064_v43  ;;  %v9325_v51 = vld [vmem:[#allocation6_spill] sm:$0xff]  ;;  %v5834_v43 = vor.u32 %v7250_v21, %v5831_v35 }
 0x430   :  { %v5901_v35 = vld [vmem:[#allocation2 + $0x388] sm:$0xf] }
 0x431   :  { %v8752_v25 = vadd.f32 %v4321_v34, %v4193_v18  ;;  %v309_v34 = vld [vmem:[%s9286_s1 + $0x8d0] sm:$0xff]  ;;  %v310_v18 = vld [vmem:[%s9286_s1 + $0x8d8] sm:$0xff] }
 0x432   :  { %v3936_v62 = vpop.f32.mrf.mxu2  ;;  %v456_v32 = vpack.c.bf16 %v310_v18, %v309_v34  ;;  %v5902_v34 = vor.u32 %v7277_v27, %v5901_v35 }
 0x433   :  { %v3937_v2 = vadd.f32 %v3936_v62, %v9325_v51  ;;  %v4065_v20 = vpop.f32.mrf.mxu3  ;;  %v5909_v62 = vld [vmem:[#allocation2 + $0x390] sm:$0xf]  ;;  %v7278_v51 = vld [vmem:[#allocation2 + $0x3d4] sm:$0xf0] }
 0x434   :  { %v4197_v55 = vpop.f32.mrf.mxu0  ;;  %5246 = vmatpush.bf16.msra.mxu1 %v456_v32  ;;  %v5910_v18 = vor.u32 %v7278_v51, %v5909_v62  ;;  %v5973_v62 = vld [vmem:[#allocation2 + $0x418] sm:$0xf]  ;;  %v7286_v51 = vld [vmem:[#allocation2 + $0x41c] sm:$0xf] }
 0x435   :  { %v4066_v19 = vadd.f32 %v4065_v20, %v3937_v2  ;;  %v5903_v2 = vld [vmem:[#allocation2 + $0x3d0] sm:$0xf0] }
 0x436   :  { %v4326_v46 = vpop.f32.mrf.mxu1  ;;  %v7269_v20 = vld [vmem:[#allocation2 + $0x394] sm:$0xf] }
 0x437   :  { %v4195_v7 = vadd.f32 %v4194_v5, %v4066_v19  ;;  %4374 = vmatmul.bf16.gmra.mxu2 %v5830_v58  ;;  %4632 = vmatmul.bf16.gmra.mxu0 %v5838_v50 }
 0x438   :  { %4503 = vmatmul.bf16.gmra.mxu3 %v5834_v43 }
 0x439   :  { %4761 = vmatmul.bf16.gmra.mxu1 %v5842_v9  ;;  %v8761_v41 = vadd.f32 %v4323_v53, %v4195_v7  ;;  %v5911_v9 = vld [vmem:[#allocation2 + $0x3d8] sm:$0xf0] }
 0x43a   :  { %v3939_v37 = vpop.f32.mrf.mxu2  ;;  %v9329_v53 = vld [vmem:[#allocation8_spill] sm:$0xff] }
 0x43b   :  { %9326 = vst [vmem:[#allocation5_spill] sm:$0xff] %v8761_v41  ;;  %v3940_v21 = vadd.f32 %v3939_v37, %v9327_v1  ;;  %v4068_v19 = vpop.f32.mrf.mxu3  ;;  %v5906_v37 = vor.u32 %v7268_v44, %v5903_v2  ;;  %v5914_v1 = vor.u32 %v7269_v20, %v5911_v9  ;;  %v7295_v44 = vld [vmem:[#allocation2 + $0x45c] sm:$0xf0]  ;;  %v7296_v20 = vld [vmem:[#allocation2 + $0x464] sm:$0xf0] }
 0x43c   :  { %v4199_v5 = vpop.f32.mrf.mxu0  ;;  %v5981_v2 = vld [vmem:[#allocation2 + $0x420] sm:$0xf]  ;;  %v7287_v9 = vld [vmem:[#allocation2 + $0x424] sm:$0xf] }
 0x43d   :  { %v4069_v60 = vadd.f32 %v4068_v19, %v3940_v21 }
 0x43e   :  { %v4328_v29 = vpop.f32.mrf.mxu1 }
 0x43f   :  { %v4198_v47 = vadd.f32 %v4197_v55, %v4069_v60 }
 0x441   :  { %v8764_v58 = vadd.f32 %v4326_v46, %v4198_v47  ;;  %v9330_v47 = vld [vmem:[#allocation9_spill] sm:$0xff] }
 0x442   :  { %v3941_v7 = vpop.f32.mrf.mxu2 }
 0x443   :  { %9328 = vst [vmem:[#allocation6_spill] sm:$0xff] %v8764_v58  ;;  %v3942_v50 = vadd.f32 %v3941_v7, %v9329_v53  ;;  %v4070_v43 = vpop.f32.mrf.mxu3 }
 0x444   :  { %v4202_v32 = vpop.f32.mrf.mxu0 }
 0x445   :  { %v4071_v55 = vadd.f32 %v4070_v43, %v3942_v50  ;;  %v5983_v50 = vld [vmem:[#allocation2 + $0x468] sm:$0xf0] }
 0x446   :  { %v4331_v21 = vpop.f32.mrf.mxu1 }
 0x447   :  { %v4200_v19 = vadd.f32 %v4199_v5, %v4071_v55  ;;  %4379 = vmatmul.bf16.gmra.mxu2 %v5902_v34  ;;  %4637 = vmatmul.bf16.gmra.mxu0 %v5910_v18  ;;  %v5975_v5 = vld [vmem:[#allocation2 + $0x460] sm:$0xf0]  ;;  %v9332_v34 = vld [vmem:[#allocation10_spill] sm:$0xff]  ;;  %v5982_v55 = vor.u32 %v7296_v20, %v5981_v2 }
 0x448   :  { %4508 = vmatmul.bf16.gmra.mxu3 %v5906_v37 }
 0x449   :  { %4766 = vmatmul.bf16.gmra.mxu1 %v5914_v1  ;;  %v8767_v60 = vadd.f32 %v4328_v29, %v4200_v19  ;;  %v5974_v1 = vor.u32 %v7295_v44, %v5973_v62 }
 0x44a   :  { %v3944_v46 = vpop.f32.mrf.mxu2 }
 0x44b   :  { %v3945_v58 = vadd.f32 %v3944_v46, %v9330_v47  ;;  %v4073_v41 = vpop.f32.mrf.mxu3 }
 0x44c   :  { %v4204_v7 = vpop.f32.mrf.mxu0 }
 0x44d   :  { %v4074_v53 = vadd.f32 %v4073_v41, %v3945_v58  ;;  %v5978_v41 = vor.u32 %v7286_v51, %v5975_v5  ;;  %v5986_v58 = vor.u32 %v7287_v9, %v5983_v50 }
 0x44e   :  { %v4333_v35 = vpop.f32.mrf.mxu1 }
 0x44f   :  { %v4203_v27 = vadd.f32 %v4202_v32, %v4074_v53  ;;  %v260_v53 = vld [vmem:[%s9286_s1 + $0x748] sm:$0xff] }
 0x451   :  { %v8770_v43 = vadd.f32 %v4331_v21, %v4203_v27  ;;  %v259_v21 = vld [vmem:[%s9286_s1 + $0x740] sm:$0xff] }
 0x452   :  { %v3946_v29 = vpop.f32.mrf.mxu2  ;;  %v275_v27 = vld [vmem:[%s9286_s1 + $0x7c0] sm:$0xff]  ;;  %v431_v62 = vpack.c.bf16 %v260_v53, %v259_v21  ;;  %v6055_v21 = vld [vmem:[#allocation2 + $0x4f8] sm:$0xf0] }
 0x453   :  { %9331 = vst [vmem:[#allocation7_spill] sm:$0xff] %v8770_v43  ;;  %v3947_v18 = vadd.f32 %v3946_v29, %v9332_v34  ;;  %v4075_v37 = vpop.f32.mrf.mxu3  ;;  %v6045_v34 = vld [vmem:[#allocation2 + $0x4a8] sm:$0xf] }
 0x454   :  { %v4207_v19 = vpop.f32.mrf.mxu0  ;;  %4860 = vmatpush.bf16.msra.mxu2 %v431_v62 }
 0x455   :  { %v4076_v32 = vadd.f32 %v4075_v37, %v3947_v18  ;;  %v7313_v37 = vld [vmem:[#allocation2 + $0x4ec] sm:$0xf0] }
 0x456   :  { %v4336_v46 = vpop.f32.mrf.mxu1 }
 0x457   :  { %v4205_v47 = vadd.f32 %v4204_v7, %v4076_v32  ;;  %4384 = vmatmul.bf16.gmra.mxu2 %v5974_v1  ;;  %4642 = vmatmul.bf16.gmra.mxu0 %v5982_v55  ;;  %v276_v7 = vld [vmem:[%s9286_s1 + $0x7c8] sm:$0xff]  ;;  %v291_v1 = vld [vmem:[%s9286_s1 + $0x840] sm:$0xff]  ;;  %v6047_v32 = vld [vmem:[#allocation2 + $0x4f0] sm:$0xf0] }
 0x458   :  { %4513 = vmatmul.bf16.gmra.mxu3 %v5978_v41  ;;  %v439_v2 = vpack.c.bf16 %v276_v7, %v275_v27  ;;  %v7304_v55 = vld [vmem:[#allocation2 + $0x4ac] sm:$0xf]  ;;  %v6053_v41 = vld [vmem:[#allocation2 + $0x4b0] sm:$0xf]  ;;  %v6046_v7 = vor.u32 %v7313_v37, %v6045_v34 }
 0x459   :  { %4771 = vmatmul.bf16.gmra.mxu1 %v5986_v58  ;;  %v8785_v44 = vadd.f32 %v4333_v35, %v4205_v47  ;;  %v292_v35 = vld [vmem:[%s9286_s1 + $0x848] sm:$0xff]  ;;  %v7305_v47 = vld [vmem:[#allocation2 + $0x4b4] sm:$0xf] }
 0x45a   :  { %v3949_v51 = vpop.f32.mrf.mxu2  ;;  %4989 = vmatpush.bf16.msra.mxu3 %v439_v2  ;;  %v447_v58 = vpack.c.bf16 %v292_v35, %v291_v1 }
 0x45b   :  { %9333 = vst [vmem:[#allocation8_spill] sm:$0xff] %v8785_v44  ;;  %v3950_v20 = vadd.f32 %v3949_v51, %v8458_v26  ;;  %v4078_v5 = vpop.f32.mrf.mxu3  ;;  %v7314_v26 = vld [vmem:[#allocation2 + $0x4f4] sm:$0xf0] }
 0x45c   :  { %v4209_v9 = vpop.f32.mrf.mxu0  ;;  %5118 = vmatpush.bf16.msra.mxu0 %v447_v58  ;;  %v6054_v51 = vor.u32 %v7314_v26, %v6053_v41  ;;  %v6117_v58 = vld [vmem:[#allocation2 + $0x538] sm:$0xf] }
 0x45d   :  { %v4079_v50 = vadd.f32 %v4078_v5, %v3950_v20  ;;  %v6050_v20 = vor.u32 %v7304_v55, %v6047_v32  ;;  %v6058_v5 = vor.u32 %v7305_v47, %v6055_v21  ;;  %v7331_v32 = vld [vmem:[#allocation2 + $0x57c] sm:$0xf0]  ;;  %v7322_v47 = vld [vmem:[#allocation2 + $0x53c] sm:$0xf] }
 0x45e   :  { %v4338_v29 = vpop.f32.mrf.mxu1  ;;  %v6125_v21 = vld [vmem:[#allocation2 + $0x540] sm:$0xf] }
 0x45f   :  { %v4208_v18 = vadd.f32 %v4207_v19, %v4079_v50 }
 0x461   :  { %v8794_v53 = vadd.f32 %v4336_v46, %v4208_v18  ;;  %v307_v46 = vld [vmem:[%s9286_s1 + $0x8c0] sm:$0xff]  ;;  %v308_v18 = vld [vmem:[%s9286_s1 + $0x8c8] sm:$0xff] }
 0x462   :  { %v3951_v27 = vpop.f32.mrf.mxu2 }
 0x463   :  { %v3952_v19 = vadd.f32 %v3951_v27, %v8467_v17  ;;  %v4080_v62 = vpop.f32.mrf.mxu3  ;;  %v455_v17 = vpack.c.bf16 %v308_v18, %v307_v46  ;;  %v7332_v27 = vld [vmem:[#allocation2 + $0x584] sm:$0xf0] }
 0x464   :  { %v4608_v2 = vpop.f32.mrf.mxu0 }
 0x465   :  { %v4081_v50 = vadd.f32 %v4080_v62, %v3952_v19  ;;  %5247 = vmatpush.bf16.msra.mxu1 %v455_v17  ;;  %v6119_v19 = vld [vmem:[#allocation2 + $0x580] sm:$0xf0] }
 0x466   :  { %v4737_v44 = vpop.f32.mrf.mxu1  ;;  %v7323_v62 = vld [vmem:[#allocation2 + $0x544] sm:$0xf]  ;;  %v6122_v46 = vor.u32 %v7322_v47, %v6119_v19  ;;  %v7349_v47 = vld [vmem:[#allocation2 + $0x60c] sm:$0xf0] }
 0x467   :  { %v4210_v43 = vadd.f32 %v4209_v9, %v4081_v50  ;;  %4389 = vmatmul.bf16.gmra.mxu2 %v6046_v7  ;;  %4647 = vmatmul.bf16.gmra.mxu0 %v6054_v51  ;;  %v6127_v7 = vld [vmem:[#allocation2 + $0x588] sm:$0xf0]  ;;  %v6197_v19 = vld [vmem:[#allocation2 + $0x5d0] sm:$0xf] }
 0x468   :  { %4518 = vmatmul.bf16.gmra.mxu3 %v6050_v20  ;;  %v6130_v18 = vor.u32 %v7323_v62, %v6127_v7  ;;  %v7350_v62 = vld [vmem:[#allocation2 + $0x614] sm:$0xf0]  ;;  %v7341_v7 = vld [vmem:[#allocation2 + $0x5d4] sm:$0xf] }
 0x469   :  { %4776 = vmatmul.bf16.gmra.mxu1 %v6058_v5  ;;  %v8803_v34 = vadd.f32 %v4338_v29, %v4210_v43  ;;  %v6126_v5 = vor.u32 %v7332_v27, %v6125_v21  ;;  %v6189_v21 = vld [vmem:[#allocation2 + $0x5c8] sm:$0xf]  ;;  %v7340_v27 = vld [vmem:[#allocation2 + $0x5cc] sm:$0xf] }
 0x46a   :  { %v4350_v37 = vpop.f32.mrf.mxu2 }
 0x46b   :  { %v4351_v1 = vadd.f32 %v4350_v37, %v8470_v39  ;;  %v4479_v9 = vpop.f32.mrf.mxu3  ;;  %v6118_v39 = vor.u32 %v7331_v32, %v6117_v58 }
 0x46c   :  { %v4610_v35 = vpop.f32.mrf.mxu0 }
 0x46d   :  { %v4480_v55 = vadd.f32 %v4479_v9, %v4351_v1  ;;  %v9334_v9 = vld [vmem:[#allocation11_spill] sm:$0xff] }
 0x46e   :  { %v4739_v41 = vpop.f32.mrf.mxu1 }
 0x46f   :  { %v4609_v26 = vadd.f32 %v4608_v2, %v4480_v55 }
 0x471   :  { %v8806_v51 = vadd.f32 %v4737_v44, %v4609_v26 }
 0x472   :  { %v4352_v43 = vpop.f32.mrf.mxu2 }
 0x473   :  { %v4353_v29 = vadd.f32 %v4352_v43, %v8473_v31  ;;  %v4481_v20 = vpop.f32.mrf.mxu3 }
 0x474   :  { %v4613_v50 = vpop.f32.mrf.mxu0 }
 0x475   :  { %v4482_v2 = vadd.f32 %v4481_v20, %v4353_v29  ;;  %v6199_v29 = vld [vmem:[#allocation2 + $0x618] sm:$0xf0] }
 0x476   :  { %v4742_v17 = vpop.f32.mrf.mxu1 }
 0x477   :  { %v4611_v37 = vadd.f32 %v4610_v35, %v4482_v2  ;;  %4394 = vmatmul.bf16.gmra.mxu2 %v6118_v39  ;;  %4652 = vmatmul.bf16.gmra.mxu0 %v6126_v5  ;;  %v6191_v35 = vld [vmem:[#allocation2 + $0x610] sm:$0xf0]  ;;  %v9336_v39 = vld [vmem:[#allocation12_spill] sm:$0xff]  ;;  %v6198_v2 = vor.u32 %v7350_v62, %v6197_v19 }
 0x478   :  { %4523 = vmatmul.bf16.gmra.mxu3 %v6122_v46 }
 0x479   :  { %4781 = vmatmul.bf16.gmra.mxu1 %v6130_v18  ;;  %v8809_v1 = vadd.f32 %v4739_v41, %v4611_v37  ;;  %v6190_v18 = vor.u32 %v7349_v47, %v6189_v21 }
 0x47a   :  { %v4355_v44 = vpop.f32.mrf.mxu2 }
 0x47b   :  { %v4356_v55 = vadd.f32 %v4355_v44, %v9334_v9  ;;  %v4484_v26 = vpop.f32.mrf.mxu3  ;;  %v6194_v44 = vor.u32 %v7340_v27, %v6191_v35  ;;  %v6202_v9 = vor.u32 %v7341_v7, %v6199_v29 }
 0x47c   :  { %v4615_v31 = vpop.f32.mrf.mxu0 }
 0x47d   :  { %v4485_v43 = vadd.f32 %v4484_v26, %v4356_v55 }
 0x47e   :  { %v4744_v58 = vpop.f32.mrf.mxu1 }
 0x47f   :  { %v4614_v32 = vadd.f32 %v4613_v50, %v4485_v43  ;;  %v258_v43 = vld [vmem:[%s9286_s1 + $0x738] sm:$0xff] }
 0x481   :  { %v8812_v20 = vadd.f32 %v4742_v17, %v4614_v32  ;;  %v257_v17 = vld [vmem:[%s9286_s1 + $0x730] sm:$0xff] }
 0x482   :  { %v4357_v41 = vpop.f32.mrf.mxu2  ;;  %v273_v32 = vld [vmem:[%s9286_s1 + $0x7b0] sm:$0xff]  ;;  %v430_v21 = vpack.c.bf16 %v258_v43, %v257_v17  ;;  %v6271_v17 = vld [vmem:[#allocation2 + $0x6a8] sm:$0xf0] }
 0x483   :  { %9335 = vst [vmem:[#allocation9_spill] sm:$0xff] %v8812_v20  ;;  %v4358_v5 = vadd.f32 %v4357_v41, %v9336_v39  ;;  %v4486_v46 = vpop.f32.mrf.mxu3  ;;  %v6261_v39 = vld [vmem:[#allocation2 + $0x658] sm:$0xf] }
 0x484   :  { %v4618_v37 = vpop.f32.mrf.mxu0  ;;  %4861 = vmatpush.bf16.msra.mxu2 %v430_v21 }
 0x485   :  { %v4487_v50 = vadd.f32 %v4486_v46, %v4358_v5  ;;  %v7367_v46 = vld [vmem:[#allocation2 + $0x69c] sm:$0xf0] }
 0x486   :  { %v4747_v55 = vpop.f32.mrf.mxu1 }
 0x487   :  { %v4616_v26 = vadd.f32 %v4615_v31, %v4487_v50  ;;  %4399 = vmatmul.bf16.gmra.mxu2 %v6190_v18  ;;  %4657 = vmatmul.bf16.gmra.mxu0 %v6198_v2  ;;  %v274_v31 = vld [vmem:[%s9286_s1 + $0x7b8] sm:$0xff]  ;;  %v289_v18 = vld [vmem:[%s9286_s1 + $0x830] sm:$0xff]  ;;  %v6263_v50 = vld [vmem:[#allocation2 + $0x6a0] sm:$0xf0] }
 0x488   :  { %4528 = vmatmul.bf16.gmra.mxu3 %v6194_v44  ;;  %v438_v19 = vpack.c.bf16 %v274_v31, %v273_v32  ;;  %v7358_v2 = vld [vmem:[#allocation2 + $0x65c] sm:$0xf]  ;;  %v6269_v44 = vld [vmem:[#allocation2 + $0x660] sm:$0xf]  ;;  %v6262_v31 = vor.u32 %v7367_v46, %v6261_v39 }
 0x489   :  { %4786 = vmatmul.bf16.gmra.mxu1 %v6202_v9  ;;  %v8827_v47 = vadd.f32 %v4744_v58, %v4616_v26  ;;  %v290_v58 = vld [vmem:[%s9286_s1 + $0x838] sm:$0xff]  ;;  %v7359_v26 = vld [vmem:[#allocation2 + $0x664] sm:$0xf] }
 0x48a   :  { %v4360_v27 = vpop.f32.mrf.mxu2  ;;  %4990 = vmatpush.bf16.msra.mxu3 %v438_v19  ;;  %v446_v9 = vpack.c.bf16 %v290_v58, %v289_v18 }
 0x48b   :  { %9337 = vst [vmem:[#allocation10_spill] sm:$0xff] %v8827_v47  ;;  %v4361_v62 = vadd.f32 %v4360_v27, %v8500_v15  ;;  %v4489_v35 = vpop.f32.mrf.mxu3  ;;  %v7368_v15 = vld [vmem:[#allocation2 + $0x6a4] sm:$0xf0] }
 0x48c   :  { %v4620_v7 = vpop.f32.mrf.mxu0  ;;  %5119 = vmatpush.bf16.msra.mxu0 %v446_v9  ;;  %v6270_v27 = vor.u32 %v7368_v15, %v6269_v44  ;;  %v6333_v9 = vld [vmem:[#allocation2 + $0x6e8] sm:$0xf] }
 0x48d   :  { %v4490_v29 = vadd.f32 %v4489_v35, %v4361_v62  ;;  %v6266_v62 = vor.u32 %v7358_v2, %v6263_v50  ;;  %v6274_v35 = vor.u32 %v7359_v26, %v6271_v17  ;;  %v7385_v50 = vld [vmem:[#allocation2 + $0x72c] sm:$0xf0]  ;;  %v7376_v26 = vld [vmem:[#allocation2 + $0x6ec] sm:$0xf] }
 0x48e   :  { %v4749_v41 = vpop.f32.mrf.mxu1  ;;  %v6341_v17 = vld [vmem:[#allocation2 + $0x6f0] sm:$0xf] }
 0x48f   :  { %v4619_v5 = vadd.f32 %v4618_v37, %v4490_v29 }
 0x491   :  { %v8836_v43 = vadd.f32 %v4747_v55, %v4619_v5  ;;  %v305_v55 = vld [vmem:[%s9286_s1 + $0x8b0] sm:$0xff]  ;;  %v306_v5 = vld [vmem:[%s9286_s1 + $0x8b8] sm:$0xff] }
 0x492   :  { %v4362_v32 = vpop.f32.mrf.mxu2 }
 0x493   :  { %v4363_v37 = vadd.f32 %v4362_v32, %v8509_v45  ;;  %v4491_v21 = vpop.f32.mrf.mxu3  ;;  %v454_v45 = vpack.c.bf16 %v306_v5, %v305_v55  ;;  %v7386_v32 = vld [vmem:[#allocation2 + $0x734] sm:$0xf0] }
 0x494   :  { %v4623_v19 = vpop.f32.mrf.mxu0 }
 0x495   :  { %v4492_v29 = vadd.f32 %v4491_v21, %v4363_v37  ;;  %5248 = vmatpush.bf16.msra.mxu1 %v454_v45  ;;  %v6335_v37 = vld [vmem:[#allocation2 + $0x730] sm:$0xf0] }
 0x496   :  { %v4752_v47 = vpop.f32.mrf.mxu1  ;;  %v7377_v21 = vld [vmem:[#allocation2 + $0x6f4] sm:$0xf]  ;;  %v6338_v55 = vor.u32 %v7376_v26, %v6335_v37  ;;  %v7403_v26 = vld [vmem:[#allocation2 + $0x7bc] sm:$0xf0] }
 0x497   :  { %v4621_v20 = vadd.f32 %v4620_v7, %v4492_v29  ;;  %4404 = vmatmul.bf16.gmra.mxu2 %v6262_v31  ;;  %4662 = vmatmul.bf16.gmra.mxu0 %v6270_v27  ;;  %v6343_v31 = vld [vmem:[#allocation2 + $0x738] sm:$0xf0]  ;;  %v6413_v37 = vld [vmem:[#allocation2 + $0x780] sm:$0xf] }
 0x498   :  { %4533 = vmatmul.bf16.gmra.mxu3 %v6266_v62  ;;  %v6346_v5 = vor.u32 %v7377_v21, %v6343_v31  ;;  %v7404_v21 = vld [vmem:[#allocation2 + $0x7c4] sm:$0xf0]  ;;  %v7395_v31 = vld [vmem:[#allocation2 + $0x784] sm:$0xf] }
 0x499   :  { %4791 = vmatmul.bf16.gmra.mxu1 %v6274_v35  ;;  %v8845_v39 = vadd.f32 %v4749_v41, %v4621_v20  ;;  %v6342_v35 = vor.u32 %v7386_v32, %v6341_v17  ;;  %v6405_v17 = vld [vmem:[#allocation2 + $0x778] sm:$0xf]  ;;  %v7394_v32 = vld [vmem:[#allocation2 + $0x77c] sm:$0xf] }
 0x49a   :  { %v4365_v46 = vpop.f32.mrf.mxu2 }
 0x49b   :  { %v4366_v18 = vadd.f32 %v4365_v46, %v8512_v12  ;;  %v4494_v7 = vpop.f32.mrf.mxu3  ;;  %v6334_v12 = vor.u32 %v7385_v50, %v6333_v9 }
 0x49c   :  { %v4625_v58 = vpop.f32.mrf.mxu0 }
 0x49d   :  { %v4495_v2 = vadd.f32 %v4494_v7, %v4366_v18 }
 0x49e   :  { %v4754_v44 = vpop.f32.mrf.mxu1 }
 0x49f   :  { %v4624_v15 = vadd.f32 %v4623_v19, %v4495_v2 }
 0x4a1   :  { %v8848_v27 = vadd.f32 %v4752_v47, %v4624_v15 }
 0x4a2   :  { %v4367_v20 = vpop.f32.mrf.mxu2 }
 0x4a3   :  { %v4368_v41 = vadd.f32 %v4367_v20, %v8515_v13  ;;  %v4496_v62 = vpop.f32.mrf.mxu3  ;;  %v6415_v20 = vld [vmem:[#allocation2 + $0x7c8] sm:$0xf0] }
 0x4a4   :  { %v4628_v29 = vpop.f32.mrf.mxu0 }
 0x4a5   :  { %v4497_v19 = vadd.f32 %v4496_v62, %v4368_v41 }
 0x4a6   :  { %v4757_v45 = vpop.f32.mrf.mxu1 }
 0x4a7   :  { %v4626_v46 = vadd.f32 %v4625_v58, %v4497_v19  ;;  %4409 = vmatmul.bf16.gmra.mxu2 %v6334_v12  ;;  %4667 = vmatmul.bf16.gmra.mxu0 %v6342_v35  ;;  %v6407_v58 = vld [vmem:[#allocation2 + $0x7c0] sm:$0xf0]  ;;  %v6414_v35 = vor.u32 %v7404_v21, %v6413_v37  ;;  %v6418_v19 = vor.u32 %v7395_v31, %v6415_v20  ;;  %v6477_v31 = vld [vmem:[#allocation2 + $0x808] sm:$0xf] }
 0x4a8   :  { %4538 = vmatmul.bf16.gmra.mxu3 %v6338_v55 }
 0x4a9   :  { %4796 = vmatmul.bf16.gmra.mxu1 %v6346_v5  ;;  %v8851_v18 = vadd.f32 %v4754_v44, %v4626_v46  ;;  %v6410_v5 = vor.u32 %v7394_v32, %v6407_v58 }
 0x4aa   :  { %v4370_v47 = vpop.f32.mrf.mxu2 }
 0x4ab   :  { %v4371_v7 = vadd.f32 %v4370_v47, %v8518_v59  ;;  %v4499_v2 = vpop.f32.mrf.mxu3  ;;  %v6406_v59 = vor.u32 %v7403_v26, %v6405_v17 }
 0x4ac   :  { %v4630_v13 = vpop.f32.mrf.mxu0 }
 0x4ad   :  { %v4500_v15 = vadd.f32 %v4499_v2, %v4371_v7  ;;  %v271_v7 = vld [vmem:[%s9286_s1 + $0x7a0] sm:$0xff] }
 0x4ae   :  { %v4759_v9 = vpop.f32.mrf.mxu1 }
 0x4af   :  { %v4629_v50 = vadd.f32 %v4628_v29, %v4500_v15 }
 0x4b1   :  { %v8854_v41 = vadd.f32 %v4757_v45, %v4629_v50  ;;  %v255_v45 = vld [vmem:[%s9286_s1 + $0x720] sm:$0xff] }
 0x4b2   :  { %v4372_v44 = vpop.f32.mrf.mxu2 }
 0x4b3   :  { %v4373_v62 = vadd.f32 %v4372_v44, %v8533_v30  ;;  %v4501_v12 = vpop.f32.mrf.mxu3  ;;  %v256_v30 = vld [vmem:[%s9286_s1 + $0x728] sm:$0xff]  ;;  %v7421_v44 = vld [vmem:[#allocation2 + $0x84c] sm:$0xf0] }
 0x4b4   :  { %v4633_v55 = vpop.f32.mrf.mxu0  ;;  %v429_v2 = vpack.c.bf16 %v256_v30, %v255_v45 }
 0x4b5   :  { %v4502_v29 = vadd.f32 %v4501_v12, %v4373_v62  ;;  %v287_v62 = vld [vmem:[%s9286_s1 + $0x820] sm:$0xff]  ;;  %v7412_v12 = vld [vmem:[#allocation2 + $0x80c] sm:$0xf] }
 0x4b6   :  { %v4762_v46 = vpop.f32.mrf.mxu1  ;;  %4862 = vmatpush.bf16.msra.mxu2 %v429_v2 }
 0x4b7   :  { %v4631_v47 = vadd.f32 %v4630_v13, %v4502_v29  ;;  %4414 = vmatmul.bf16.gmra.mxu2 %v6406_v59  ;;  %4672 = vmatmul.bf16.gmra.mxu0 %v6414_v35  ;;  %v272_v13 = vld [vmem:[%s9286_s1 + $0x7a8] sm:$0xff]  ;;  %v6485_v59 = vld [vmem:[#allocation2 + $0x810] sm:$0xf]  ;;  %v6487_v29 = vld [vmem:[#allocation2 + $0x858] sm:$0xf0] }
 0x4b8   :  { %4543 = vmatmul.bf16.gmra.mxu3 %v6410_v5  ;;  %v437_v17 = vpack.c.bf16 %v272_v13, %v271_v7  ;;  %v6479_v5 = vld [vmem:[#allocation2 + $0x850] sm:$0xf0]  ;;  %v6478_v7 = vor.u32 %v7421_v44, %v6477_v31 }
 0x4b9   :  { %4801 = vmatmul.bf16.gmra.mxu1 %v6418_v19  ;;  %v8869_v15 = vadd.f32 %v4759_v9, %v4631_v47  ;;  %v288_v9 = vld [vmem:[%s9286_s1 + $0x828] sm:$0xff]  ;;  %v7413_v19 = vld [vmem:[#allocation2 + $0x814] sm:$0xf] }
 0x4ba   :  { %v4375_v50 = vpop.f32.mrf.mxu2  ;;  %4991 = vmatpush.bf16.msra.mxu3 %v437_v17  ;;  %v445_v35 = vpack.c.bf16 %v288_v9, %v287_v62  ;;  %v6490_v17 = vor.u32 %v7413_v19, %v6487_v29  ;;  %v7430_v19 = vld [vmem:[#allocation2 + $0x89c] sm:$0xf]  ;;  %v6557_v29 = vld [vmem:[#allocation2 + $0x8a0] sm:$0xf] }
 0x4bb   :  { %v4376_v26 = vadd.f32 %v4375_v50, %v8542_v63  ;;  %v4504_v32 = vpop.f32.mrf.mxu3  ;;  %v7422_v63 = vld [vmem:[#allocation2 + $0x854] sm:$0xf0]  ;;  %v6482_v50 = vor.u32 %v7412_v12, %v6479_v5  ;;  %v7439_v5 = vld [vmem:[#allocation2 + $0x8dc] sm:$0xf0] }
 0x4bc   :  { %v4635_v37 = vpop.f32.mrf.mxu0  ;;  %5120 = vmatpush.bf16.msra.mxu0 %v445_v35  ;;  %v6486_v2 = vor.u32 %v7422_v63, %v6485_v59  ;;  %v6549_v35 = vld [vmem:[#allocation2 + $0x898] sm:$0xf] }
 0x4bd   :  { %v4505_v21 = vadd.f32 %v4504_v32, %v4376_v26 }
 0x4be   :  { %v4764_v58 = vpop.f32.mrf.mxu1 }
 0x4bf   :  { %v4634_v20 = vadd.f32 %v4633_v55, %v4505_v21 }
 0x4c1   :  { %v8878_v47 = vadd.f32 %v4762_v46, %v4634_v20  ;;  %v303_v46 = vld [vmem:[%s9286_s1 + $0x8a0] sm:$0xff]  ;;  %v304_v20 = vld [vmem:[%s9286_s1 + $0x8a8] sm:$0xff] }
 0x4c2   :  { %v4377_v45 = vpop.f32.mrf.mxu2 }
 0x4c3   :  { %v4378_v55 = vadd.f32 %v4377_v45, %v8551_v40  ;;  %v4506_v30 = vpop.f32.mrf.mxu3  ;;  %v453_v40 = vpack.c.bf16 %v304_v20, %v303_v46  ;;  %v7440_v45 = vld [vmem:[#allocation2 + $0x8e4] sm:$0xf0] }
 0x4c4   :  { %v4638_v13 = vpop.f32.mrf.mxu0 }
 0x4c5   :  { %v4507_v26 = vadd.f32 %v4506_v30, %v4378_v55  ;;  %5249 = vmatpush.bf16.msra.mxu1 %v453_v40  ;;  %v6551_v55 = vld [vmem:[#allocation2 + $0x8e0] sm:$0xf0] }
 0x4c6   :  { %v4767_v32 = vpop.f32.mrf.mxu1  ;;  %v7431_v30 = vld [vmem:[#allocation2 + $0x8a4] sm:$0xf]  ;;  %v6554_v46 = vor.u32 %v7430_v19, %v6551_v55  ;;  %v7457_v19 = vld [vmem:[#allocation2 + $0x96c] sm:$0xf0] }
 0x4c7   :  { %v4636_v21 = vadd.f32 %v4635_v37, %v4507_v26  ;;  %4419 = vmatmul.bf16.gmra.mxu2 %v6478_v7  ;;  %4677 = vmatmul.bf16.gmra.mxu0 %v6486_v2  ;;  %v6559_v7 = vld [vmem:[#allocation2 + $0x8e8] sm:$0xf0]  ;;  %v6558_v26 = vor.u32 %v7440_v45, %v6557_v29  ;;  %v6621_v29 = vld [vmem:[#allocation2 + $0x928] sm:$0xf]  ;;  %v6629_v55 = vld [vmem:[#allocation2 + $0x930] sm:$0xf] }
 0x4c8   :  { %4548 = vmatmul.bf16.gmra.mxu3 %v6482_v50  ;;  %v6562_v20 = vor.u32 %v7431_v30, %v6559_v7  ;;  %v7448_v45 = vld [vmem:[#allocation2 + $0x92c] sm:$0xf]  ;;  %v7458_v30 = vld [vmem:[#allocation2 + $0x974] sm:$0xf0]  ;;  %v7449_v7 = vld [vmem:[#allocation2 + $0x934] sm:$0xf] }
 0x4c9   :  { %4806 = vmatmul.bf16.gmra.mxu1 %v6490_v17  ;;  %v8887_v31 = vadd.f32 %v4764_v58, %v4636_v21 }
 0x4ca   :  { %v4380_v44 = vpop.f32.mrf.mxu2 }
 0x4cb   :  { %v4381_v62 = vadd.f32 %v4380_v44, %v8554_v11  ;;  %v4509_v37 = vpop.f32.mrf.mxu3  ;;  %v6550_v11 = vor.u32 %v7439_v5, %v6549_v35 }
 0x4cc   :  { %v4640_v9 = vpop.f32.mrf.mxu0 }
 0x4cd   :  { %v4510_v12 = vadd.f32 %v4509_v37, %v4381_v62 }
 0x4ce   :  { %v4769_v59 = vpop.f32.mrf.mxu1 }
 0x4cf   :  { %v4639_v63 = vadd.f32 %v4638_v13, %v4510_v12 }
 0x4d1   :  { %v8890_v2 = vadd.f32 %v4767_v32, %v4639_v63 }
 0x4d2   :  { %v4382_v58 = vpop.f32.mrf.mxu2 }
 0x4d3   :  { %v4383_v50 = vadd.f32 %v4382_v58, %v8557_v38  ;;  %v4511_v17 = vpop.f32.mrf.mxu3  ;;  %v6631_v58 = vld [vmem:[#allocation2 + $0x978] sm:$0xf0] }
 0x4d4   :  { %v4643_v21 = vpop.f32.mrf.mxu0 }
 0x4d5   :  { %v4512_v13 = vadd.f32 %v4511_v17, %v4383_v50 }
 0x4d6   :  { %v4772_v40 = vpop.f32.mrf.mxu1 }
 0x4d7   :  { %v4641_v44 = vadd.f32 %v4640_v9, %v4512_v13  ;;  %4424 = vmatmul.bf16.gmra.mxu2 %v6550_v11  ;;  %4682 = vmatmul.bf16.gmra.mxu0 %v6558_v26  ;;  %v6623_v9 = vld [vmem:[#allocation2 + $0x970] sm:$0xf0]  ;;  %v6630_v26 = vor.u32 %v7458_v30, %v6629_v55  ;;  %v6634_v13 = vor.u32 %v7449_v7, %v6631_v58  ;;  %v6693_v7 = vld [vmem:[#allocation2 + $0x9b8] sm:$0xf] }
 0x4d8   :  { %4553 = vmatmul.bf16.gmra.mxu3 %v6554_v46 }
 0x4d9   :  { %4811 = vmatmul.bf16.gmra.mxu1 %v6562_v20  ;;  %v8893_v62 = vadd.f32 %v4769_v59, %v4641_v44  ;;  %v6626_v20 = vor.u32 %v7448_v45, %v6623_v9 }
 0x4da   :  { %v4385_v32 = vpop.f32.mrf.mxu2 }
 0x4db   :  { %v4386_v37 = vadd.f32 %v4385_v32, %v8560_v10  ;;  %v4514_v12 = vpop.f32.mrf.mxu3  ;;  %v6622_v10 = vor.u32 %v7457_v19, %v6621_v29 }
 0x4dc   :  { %v4645_v38 = vpop.f32.mrf.mxu0 }
 0x4dd   :  { %v4515_v63 = vadd.f32 %v4514_v12, %v4386_v37  ;;  %v269_v37 = vld [vmem:[%s9286_s1 + $0x790] sm:$0xff] }
 0x4de   :  { %v4774_v35 = vpop.f32.mrf.mxu1 }
 0x4df   :  { %v4644_v5 = vadd.f32 %v4643_v21, %v4515_v63 }
 0x4e1   :  { %v8896_v50 = vadd.f32 %v4772_v40, %v4644_v5  ;;  %v253_v40 = vld [vmem:[%s9286_s1 + $0x710] sm:$0xff] }
 0x4e2   :  { %v4387_v59 = vpop.f32.mrf.mxu2 }
 0x4e3   :  { %v4388_v17 = vadd.f32 %v4387_v59, %v8575_v23  ;;  %v4516_v11 = vpop.f32.mrf.mxu3  ;;  %v254_v23 = vld [vmem:[%s9286_s1 + $0x718] sm:$0xff]  ;;  %v7475_v59 = vld [vmem:[#allocation2 + $0x9fc] sm:$0xf0] }
 0x4e4   :  { %v4648_v46 = vpop.f32.mrf.mxu0  ;;  %v428_v12 = vpack.c.bf16 %v254_v23, %v253_v40 }
 0x4e5   :  { %v4517_v21 = vadd.f32 %v4516_v11, %v4388_v17  ;;  %v285_v17 = vld [vmem:[%s9286_s1 + $0x810] sm:$0xff]  ;;  %v7466_v11 = vld [vmem:[#allocation2 + $0x9bc] sm:$0xf] }
 0x4e6   :  { %v4777_v44 = vpop.f32.mrf.mxu1  ;;  %4863 = vmatpush.bf16.msra.mxu2 %v428_v12 }
 0x4e7   :  { %v4646_v32 = vadd.f32 %v4645_v38, %v4517_v21  ;;  %4429 = vmatmul.bf16.gmra.mxu2 %v6622_v10  ;;  %4687 = vmatmul.bf16.gmra.mxu0 %v6630_v26  ;;  %v270_v38 = vld [vmem:[%s9286_s1 + $0x798] sm:$0xff]  ;;  %v6701_v10 = vld [vmem:[#allocation2 + $0x9c0] sm:$0xf]  ;;  %v6703_v21 = vld [vmem:[#allocation2 + $0xa08] sm:$0xf0] }
 0x4e8   :  { %4558 = vmatmul.bf16.gmra.mxu3 %v6626_v20  ;;  %v436_v29 = vpack.c.bf16 %v270_v38, %v269_v37  ;;  %v6695_v20 = vld [vmem:[#allocation2 + $0xa00] sm:$0xf0]  ;;  %v6694_v37 = vor.u32 %v7475_v59, %v6693_v7 }
 0x4e9   :  { %4816 = vmatmul.bf16.gmra.mxu1 %v6634_v13  ;;  %v8911_v63 = vadd.f32 %v4774_v35, %v4646_v32  ;;  %v286_v35 = vld [vmem:[%s9286_s1 + $0x818] sm:$0xff]  ;;  %v7467_v13 = vld [vmem:[#allocation2 + $0x9c4] sm:$0xf] }
 0x4ea   :  { %v4390_v5 = vpop.f32.mrf.mxu2  ;;  %4992 = vmatpush.bf16.msra.mxu3 %v436_v29  ;;  %v444_v26 = vpack.c.bf16 %v286_v35, %v285_v17  ;;  %v6706_v29 = vor.u32 %v7467_v13, %v6703_v21  ;;  %v7484_v13 = vld [vmem:[#allocation2 + $0xa4c] sm:$0xf]  ;;  %v6773_v21 = vld [vmem:[#allocation2 + $0xa50] sm:$0xf] }
 0x4eb   :  { %v4391_v19 = vadd.f32 %v4390_v5, %v8584_v4  ;;  %v4519_v45 = vpop.f32.mrf.mxu3  ;;  %v7476_v4 = vld [vmem:[#allocation2 + $0xa04] sm:$0xf0]  ;;  %v6698_v5 = vor.u32 %v7466_v11, %v6695_v20  ;;  %v7493_v20 = vld [vmem:[#allocation2 + $0xa8c] sm:$0xf0] }
 0x4ec   :  { %v4650_v55 = vpop.f32.mrf.mxu0  ;;  %5121 = vmatpush.bf16.msra.mxu0 %v444_v26  ;;  %v6702_v12 = vor.u32 %v7476_v4, %v6701_v10  ;;  %v6765_v26 = vld [vmem:[#allocation2 + $0xa48] sm:$0xf] }
 0x4ed   :  { %v4520_v30 = vadd.f32 %v4519_v45, %v4391_v19 }
 0x4ee   :  { %v4779_v9 = vpop.f32.mrf.mxu1 }
 0x4ef   :  { %v4649_v58 = vadd.f32 %v4648_v46, %v4520_v30 }
 0x4f1   :  { %v8920_v32 = vadd.f32 %v4777_v44, %v4649_v58  ;;  %v301_v44 = vld [vmem:[%s9286_s1 + $0x890] sm:$0xff]  ;;  %v302_v58 = vld [vmem:[%s9286_s1 + $0x898] sm:$0xff] }
 0x4f2   :  { %v4392_v40 = vpop.f32.mrf.mxu2 }
 0x4f3   :  { %v4393_v46 = vadd.f32 %v4392_v40, %v8593_v52  ;;  %v4521_v23 = vpop.f32.mrf.mxu3  ;;  %v452_v52 = vpack.c.bf16 %v302_v58, %v301_v44  ;;  %v7494_v40 = vld [vmem:[#allocation2 + $0xa94] sm:$0xf0] }
 0x4f4   :  { %v4653_v38 = vpop.f32.mrf.mxu0 }
 0x4f5   :  { %v4522_v19 = vadd.f32 %v4521_v23, %v4393_v46  ;;  %5250 = vmatpush.bf16.msra.mxu1 %v452_v52  ;;  %v6767_v46 = vld [vmem:[#allocation2 + $0xa90] sm:$0xf0] }
 0x4f6   :  { %v4782_v45 = vpop.f32.mrf.mxu1  ;;  %v7485_v23 = vld [vmem:[#allocation2 + $0xa54] sm:$0xf]  ;;  %v6770_v44 = vor.u32 %v7484_v13, %v6767_v46  ;;  %v7511_v13 = vld [vmem:[#allocation2 + $0xb1c] sm:$0xf0] }
 0x4f7   :  { %v4651_v30 = vadd.f32 %v4650_v55, %v4522_v19  ;;  %4434 = vmatmul.bf16.gmra.mxu2 %v6694_v37  ;;  %4692 = vmatmul.bf16.gmra.mxu0 %v6702_v12  ;;  %v6775_v37 = vld [vmem:[#allocation2 + $0xa98] sm:$0xf0]  ;;  %v6774_v19 = vor.u32 %v7494_v40, %v6773_v21  ;;  %v6837_v21 = vld [vmem:[#allocation2 + $0xad8] sm:$0xf]  ;;  %v6845_v46 = vld [vmem:[#allocation2 + $0xae0] sm:$0xf] }
 0x4f8   :  { %4563 = vmatmul.bf16.gmra.mxu3 %v6698_v5  ;;  %v6778_v58 = vor.u32 %v7485_v23, %v6775_v37  ;;  %v7502_v40 = vld [vmem:[#allocation2 + $0xadc] sm:$0xf]  ;;  %v7512_v23 = vld [vmem:[#allocation2 + $0xb24] sm:$0xf0]  ;;  %v7503_v37 = vld [vmem:[#allocation2 + $0xae4] sm:$0xf] }
 0x4f9   :  { %4821 = vmatmul.bf16.gmra.mxu1 %v6706_v29  ;;  %v8929_v7 = vadd.f32 %v4779_v9, %v4651_v30 }
 0x4fa   :  { %v4395_v59 = vpop.f32.mrf.mxu2 }
 0x4fb   :  { %v4396_v17 = vadd.f32 %v4395_v59, %v8596_v56  ;;  %v4524_v55 = vpop.f32.mrf.mxu3  ;;  %v6766_v56 = vor.u32 %v7493_v20, %v6765_v26 }
 0x4fc   :  { %v4655_v35 = vpop.f32.mrf.mxu0 }
 0x4fd   :  { %v4525_v11 = vadd.f32 %v4524_v55, %v4396_v17 }
 0x4fe   :  { %v4784_v10 = vpop.f32.mrf.mxu1 }
 0x4ff   :  { %v4654_v4 = vadd.f32 %v4653_v38, %v4525_v11 }
 0x501   :  { %v8932_v12 = vadd.f32 %v4782_v45, %v4654_v4 }
 0x502   :  { %v4397_v9 = vpop.f32.mrf.mxu2 }
 0x503   :  { %v4398_v5 = vadd.f32 %v4397_v9, %v8599_v3  ;;  %v4526_v29 = vpop.f32.mrf.mxu3  ;;  %v6847_v9 = vld [vmem:[#allocation2 + $0xb28] sm:$0xf0] }
 0x504   :  { %v4658_v30 = vpop.f32.mrf.mxu0 }
 0x505   :  { %v4527_v38 = vadd.f32 %v4526_v29, %v4398_v5 }
 0x506   :  { %v4787_v52 = vpop.f32.mrf.mxu1 }
 0x507   :  { %v4656_v59 = vadd.f32 %v4655_v35, %v4527_v38  ;;  %4439 = vmatmul.bf16.gmra.mxu2 %v6766_v56  ;;  %4697 = vmatmul.bf16.gmra.mxu0 %v6774_v19  ;;  %v6839_v35 = vld [vmem:[#allocation2 + $0xb20] sm:$0xf0]  ;;  %v6846_v19 = vor.u32 %v7512_v23, %v6845_v46  ;;  %v6850_v38 = vor.u32 %v7503_v37, %v6847_v9  ;;  %v6909_v37 = vld [vmem:[#allocation2 + $0xb68] sm:$0xf] }
 0x508   :  { %4568 = vmatmul.bf16.gmra.mxu3 %v6770_v44 }
 0x509   :  { %4826 = vmatmul.bf16.gmra.mxu1 %v6778_v58  ;;  %v8935_v17 = vadd.f32 %v4784_v10, %v4656_v59  ;;  %v6842_v58 = vor.u32 %v7502_v40, %v6839_v35 }
 0x50a   :  { %v4400_v45 = vpop.f32.mrf.mxu2 }
 0x50b   :  { %v4401_v55 = vadd.f32 %v4400_v45, %v8602_v33  ;;  %v4529_v11 = vpop.f32.mrf.mxu3  ;;  %v6838_v33 = vor.u32 %v7511_v13, %v6837_v21 }
 0x50c   :  { %v4660_v3 = vpop.f32.mrf.mxu0 }
 0x50d   :  { %v4530_v4 = vadd.f32 %v4529_v11, %v4401_v55  ;;  %v267_v55 = vld [vmem:[%s9286_s1 + $0x780] sm:$0xff] }
 0x50e   :  { %v4789_v26 = vpop.f32.mrf.mxu1 }
 0x50f   :  { %v4659_v20 = vadd.f32 %v4658_v30, %v4530_v4 }
 0x511   :  { %v8938_v5 = vadd.f32 %v4787_v52, %v4659_v20  ;;  %v251_v52 = vld [vmem:[%s9286_s1 + $0x700] sm:$0xff] }
 0x512   :  { %v4402_v10 = vpop.f32.mrf.mxu2 }
 0x513   :  { %v4403_v29 = vadd.f32 %v4402_v10, %v8617_v28  ;;  %v4531_v56 = vpop.f32.mrf.mxu3  ;;  %v252_v28 = vld [vmem:[%s9286_s1 + $0x708] sm:$0xff]  ;;  %v7529_v10 = vld [vmem:[#allocation2 + $0xbac] sm:$0xf0] }
 0x514   :  { %v4663_v44 = vpop.f32.mrf.mxu0  ;;  %v427_v11 = vpack.c.bf16 %v252_v28, %v251_v52 }
 0x515   :  { %v4532_v30 = vadd.f32 %v4531_v56, %v4403_v29  ;;  %v283_v29 = vld [vmem:[%s9286_s1 + $0x800] sm:$0xff]  ;;  %v7520_v56 = vld [vmem:[#allocation2 + $0xb6c] sm:$0xf] }
 0x516   :  { %v4792_v59 = vpop.f32.mrf.mxu1  ;;  %4864 = vmatpush.bf16.msra.mxu2 %v427_v11 }
 0x517   :  { %v4661_v45 = vadd.f32 %v4660_v3, %v4532_v30  ;;  %4444 = vmatmul.bf16.gmra.mxu2 %v6838_v33  ;;  %4702 = vmatmul.bf16.gmra.mxu0 %v6846_v19  ;;  %v268_v3 = vld [vmem:[%s9286_s1 + $0x788] sm:$0xff]  ;;  %v6917_v33 = vld [vmem:[#allocation2 + $0xb70] sm:$0xf]  ;;  %v6919_v30 = vld [vmem:[#allocation2 + $0xbb8] sm:$0xf0] }
 0x518   :  { %4573 = vmatmul.bf16.gmra.mxu3 %v6842_v58  ;;  %v435_v21 = vpack.c.bf16 %v268_v3, %v267_v55  ;;  %v6911_v58 = vld [vmem:[#allocation2 + $0xbb0] sm:$0xf0]  ;;  %v6910_v55 = vor.u32 %v7529_v10, %v6909_v37 }
 0x519   :  { %4831 = vmatmul.bf16.gmra.mxu1 %v6850_v38  ;;  %v8953_v4 = vadd.f32 %v4789_v26, %v4661_v45  ;;  %v284_v26 = vld [vmem:[%s9286_s1 + $0x808] sm:$0xff]  ;;  %v7521_v38 = vld [vmem:[#allocation2 + $0xb74] sm:$0xf] }
 0x51a   :  { %v4405_v20 = vpop.f32.mrf.mxu2  ;;  %4993 = vmatpush.bf16.msra.mxu3 %v435_v21  ;;  %v443_v19 = vpack.c.bf16 %v284_v26, %v283_v29  ;;  %v6922_v21 = vor.u32 %v7521_v38, %v6919_v30  ;;  %v7538_v38 = vld [vmem:[#allocation2 + $0xbfc] sm:$0xf]  ;;  %v6989_v30 = vld [vmem:[#allocation2 + $0xc00] sm:$0xf] }
 0x51b   :  { %v4406_v13 = vadd.f32 %v4405_v20, %v8626_v6  ;;  %v4534_v40 = vpop.f32.mrf.mxu3  ;;  %v7530_v6 = vld [vmem:[#allocation2 + $0xbb4] sm:$0xf0]  ;;  %v6914_v20 = vor.u32 %v7520_v56, %v6911_v58  ;;  %v7547_v58 = vld [vmem:[#allocation2 + $0xc3c] sm:$0xf0] }
 0x51c   :  { %v4665_v46 = vpop.f32.mrf.mxu0  ;;  %5122 = vmatpush.bf16.msra.mxu0 %v443_v19  ;;  %v6918_v11 = vor.u32 %v7530_v6, %v6917_v33  ;;  %v6981_v19 = vld [vmem:[#allocation2 + $0xbf8] sm:$0xf] }
 0x51d   :  { %v4535_v23 = vadd.f32 %v4534_v40, %v4406_v13 }
 0x51e   :  { %v4794_v35 = vpop.f32.mrf.mxu1 }
 0x51f   :  { %v4664_v9 = vadd.f32 %v4663_v44, %v4535_v23 }
 0x521   :  { %v8962_v45 = vadd.f32 %v4792_v59, %v4664_v9  ;;  %v299_v59 = vld [vmem:[%s9286_s1 + $0x880] sm:$0xff]  ;;  %v300_v9 = vld [vmem:[%s9286_s1 + $0x888] sm:$0xff] }
 0x522   :  { %v4407_v52 = vpop.f32.mrf.mxu2 }
 0x523   :  { %v4408_v44 = vadd.f32 %v4407_v52, %v8635_v42  ;;  %v4536_v28 = vpop.f32.mrf.mxu3  ;;  %v451_v42 = vpack.c.bf16 %v300_v9, %v299_v59  ;;  %v7548_v52 = vld [vmem:[#allocation2 + $0xc44] sm:$0xf0] }
 0x524   :  { %v4668_v3 = vpop.f32.mrf.mxu0 }
 0x525   :  { %v4537_v13 = vadd.f32 %v4536_v28, %v4408_v44  ;;  %5251 = vmatpush.bf16.msra.mxu1 %v451_v42  ;;  %v6983_v44 = vld [vmem:[#allocation2 + $0xc40] sm:$0xf0] }
 0x526   :  { %v4797_v40 = vpop.f32.mrf.mxu1  ;;  %v7539_v28 = vld [vmem:[#allocation2 + $0xc04] sm:$0xf]  ;;  %v6986_v59 = vor.u32 %v7538_v38, %v6983_v44  ;;  %v7565_v38 = vld [vmem:[#allocation2 + $0xccc] sm:$0xf0] }
 0x527   :  { %v4666_v23 = vadd.f32 %v4665_v46, %v4537_v13  ;;  %4449 = vmatmul.bf16.gmra.mxu2 %v6910_v55  ;;  %4707 = vmatmul.bf16.gmra.mxu0 %v6918_v11  ;;  %v6991_v55 = vld [vmem:[#allocation2 + $0xc48] sm:$0xf0]  ;;  %v6990_v13 = vor.u32 %v7548_v52, %v6989_v30  ;;  %v7053_v30 = vld [vmem:[#allocation2 + $0xc88] sm:$0xf]  ;;  %v7061_v44 = vld [vmem:[#allocation2 + $0xc90] sm:$0xf] }
 0x528   :  { %4578 = vmatmul.bf16.gmra.mxu3 %v6914_v20  ;;  %v6994_v9 = vor.u32 %v7539_v28, %v6991_v55  ;;  %v7556_v52 = vld [vmem:[#allocation2 + $0xc8c] sm:$0xf]  ;;  %v7566_v28 = vld [vmem:[#allocation2 + $0xcd4] sm:$0xf0]  ;;  %v7557_v55 = vld [vmem:[#allocation2 + $0xc94] sm:$0xf] }
 0x529   :  { %4836 = vmatmul.bf16.gmra.mxu1 %v6922_v21  ;;  %v8971_v37 = vadd.f32 %v4794_v35, %v4666_v23 }
 0x52a   :  { %v4410_v10 = vpop.f32.mrf.mxu2 }
 0x52b   :  { %v4411_v29 = vadd.f32 %v4410_v10, %v8638_v16  ;;  %v4539_v46 = vpop.f32.mrf.mxu3  ;;  %v6982_v16 = vor.u32 %v7547_v58, %v6981_v19 }
 0x52c   :  { %v4670_v26 = vpop.f32.mrf.mxu0 }
 0x52d   :  { %v4540_v56 = vadd.f32 %v4539_v46, %v4411_v29 }
 0x52e   :  { %v4799_v33 = vpop.f32.mrf.mxu1 }
 0x52f   :  { %v4669_v6 = vadd.f32 %v4668_v3, %v4540_v56 }
 0x531   :  { %v8974_v11 = vadd.f32 %v4797_v40, %v4669_v6 }
 0x532   :  { %v4412_v35 = vpop.f32.mrf.mxu2 }
 0x533   :  { %v4413_v20 = vadd.f32 %v4412_v35, %v8641_v22  ;;  %v4541_v21 = vpop.f32.mrf.mxu3  ;;  %v7063_v35 = vld [vmem:[#allocation2 + $0xcd8] sm:$0xf0] }
 0x534   :  { %v4673_v23 = vpop.f32.mrf.mxu0 }
 0x535   :  { %v4542_v3 = vadd.f32 %v4541_v21, %v4413_v20 }
 0x536   :  { %v4802_v42 = vpop.f32.mrf.mxu1 }
 0x537   :  { %v4671_v10 = vadd.f32 %v4670_v26, %v4542_v3  ;;  %4454 = vmatmul.bf16.gmra.mxu2 %v6982_v16  ;;  %4712 = vmatmul.bf16.gmra.mxu0 %v6990_v13  ;;  %v7055_v26 = vld [vmem:[#allocation2 + $0xcd0] sm:$0xf0]  ;;  %v7062_v13 = vor.u32 %v7566_v28, %v7061_v44  ;;  %v7066_v3 = vor.u32 %v7557_v55, %v7063_v35  ;;  %v7125_v44 = vld [vmem:[#allocation2 + $0xd18] sm:$0xf]  ;;  %v7574_v28 = vld [vmem:[#allocation2 + $0xd1c] sm:$0xf] }
 0x538   :  { %4583 = vmatmul.bf16.gmra.mxu3 %v6986_v59  ;;  %v7584_v55 = vld [vmem:[#allocation2 + $0xd64] sm:$0xf0]  ;;  %v7575_v35 = vld [vmem:[#allocation2 + $0xd24] sm:$0xf] }
 0x539   :  { %4841 = vmatmul.bf16.gmra.mxu1 %v6994_v9  ;;  %v8977_v29 = vadd.f32 %v4799_v33, %v4671_v10  ;;  %v7058_v9 = vor.u32 %v7556_v52, %v7055_v26  ;;  %v7583_v52 = vld [vmem:[#allocation2 + $0xd5c] sm:$0xf0] }
 0x53a   :  { %v4415_v40 = vpop.f32.mrf.mxu2  ;;  %v7133_v26 = vld [vmem:[#allocation2 + $0xd20] sm:$0xf] }
 0x53b   :  { %v4416_v46 = vadd.f32 %v4415_v40, %v8644_v48  ;;  %v4544_v56 = vpop.f32.mrf.mxu3  ;;  %v7054_v48 = vor.u32 %v7565_v38, %v7053_v30 }
 0x53c   :  { %v4675_v22 = vpop.f32.mrf.mxu0 }
 0x53d   :  { %v4545_v6 = vadd.f32 %v4544_v56, %v4416_v46 }
 0x53e   :  { %v4804_v19 = vpop.f32.mrf.mxu1 }
 0x53f   :  { %v4674_v58 = vadd.f32 %v4673_v23, %v4545_v6 }
 0x541   :  { %v8980_v20 = vadd.f32 %v4802_v42, %v4674_v58 }
 0x542   :  { %v4417_v33 = vpop.f32.mrf.mxu2 }
 0x543   :  { %v4418_v21 = vadd.f32 %v4417_v33, %v8659_v61  ;;  %v4546_v16 = vpop.f32.mrf.mxu3  ;;  %v7135_v33 = vld [vmem:[#allocation2 + $0xd68] sm:$0xf0] }
 0x544   :  { %v4678_v59 = vpop.f32.mrf.mxu0 }
 0x545   :  { %v4547_v23 = vadd.f32 %v4546_v16, %v4418_v21 }
 0x546   :  { %v4807_v10 = vpop.f32.mrf.mxu1 }
 0x547   :  { %v4676_v40 = vadd.f32 %v4675_v22, %v4547_v23  ;;  %4459 = vmatmul.bf16.gmra.mxu2 %v7054_v48  ;;  %4717 = vmatmul.bf16.gmra.mxu0 %v7062_v13  ;;  %v7127_v22 = vld [vmem:[#allocation2 + $0xd60] sm:$0xf0]  ;;  %v7134_v13 = vor.u32 %v7584_v55, %v7133_v26  ;;  %v7138_v23 = vor.u32 %v7575_v35, %v7135_v33  ;;  %v5485_v26 = vld [vmem:[#allocation2 + $0x38] sm:$0xf]  ;;  %v7162_v55 = vld [vmem:[#allocation2 + $0x3c] sm:$0xf] }
 0x548   :  { %4588 = vmatmul.bf16.gmra.mxu3 %v7058_v9  ;;  %v7172_v35 = vld [vmem:[#allocation2 + $0x84] sm:$0xf0]  ;;  %v7163_v33 = vld [vmem:[#allocation2 + $0x44] sm:$0xf] }
 0x549   :  { %4846 = vmatmul.bf16.gmra.mxu1 %v7066_v3  ;;  %v8983_v46 = vadd.f32 %v4804_v19, %v4676_v40  ;;  %v7130_v3 = vor.u32 %v7574_v28, %v7127_v22  ;;  %v7171_v28 = vld [vmem:[#allocation2 + $0x7c] sm:$0xf0] }
 0x54a   :  { %v4420_v42 = vpop.f32.mrf.mxu2  ;;  %v5493_v22 = vld [vmem:[#allocation2 + $0x40] sm:$0xf] }
 0x54b   :  { %v4421_v56 = vadd.f32 %v4420_v42, %v8668_v8  ;;  %v4549_v6 = vpop.f32.mrf.mxu3  ;;  %v7126_v8 = vor.u32 %v7583_v52, %v7125_v44 }
 0x54c   :  { %v4680_v61 = vpop.f32.mrf.mxu0 }
 0x54d   :  { %v4550_v58 = vadd.f32 %v4549_v6, %v4421_v56 }
 0x54e   :  { %v4809_v30 = vpop.f32.mrf.mxu1 }
 0x54f   :  { %v4679_v38 = vadd.f32 %v4678_v59, %v4550_v58 }
 0x551   :  { %v8986_v21 = vadd.f32 %v4807_v10, %v4679_v38 }
 0x552   :  { %v4422_v19 = vpop.f32.mrf.mxu2 }
 0x553   :  { %v4423_v16 = vadd.f32 %v4422_v19, %v8677_v14  ;;  %v4551_v48 = vpop.f32.mrf.mxu3  ;;  %v5495_v19 = vld [vmem:[#allocation2 + $0x88] sm:$0xf0] }
 0x554   :  { %v4683_v9 = vpop.f32.mrf.mxu0 }
 0x555   :  { %v4552_v59 = vadd.f32 %v4551_v48, %v4423_v16 }
 0x556   :  { %v4812_v40 = vpop.f32.mrf.mxu1 }
 0x557   :  { %v4681_v42 = vadd.f32 %v4680_v61, %v4552_v59  ;;  %4464 = vmatmul.bf16.gmra.mxu2 %v7126_v8  ;;  %4722 = vmatmul.bf16.gmra.mxu0 %v7134_v13  ;;  %v5487_v61 = vld [vmem:[#allocation2 + $0x80] sm:$0xf0]  ;;  %v5494_v13 = vor.u32 %v7172_v35, %v5493_v22  ;;  %v5498_v59 = vor.u32 %v7163_v33, %v5495_v19  ;;  %v5557_v22 = vld [vmem:[#allocation2 + $0xc8] sm:$0xf]  ;;  %v7180_v35 = vld [vmem:[#allocation2 + $0xcc] sm:$0xf] }
 0x558   :  { %4593 = vmatmul.bf16.gmra.mxu3 %v7130_v3  ;;  %v7190_v33 = vld [vmem:[#allocation2 + $0x114] sm:$0xf0]  ;;  %v7181_v19 = vld [vmem:[#allocation2 + $0xd4] sm:$0xf] }
 0x559   :  { %4851 = vmatmul.bf16.gmra.mxu1 %v7138_v23  ;;  %v8989_v56 = vadd.f32 %v4809_v30, %v4681_v42  ;;  %v5490_v23 = vor.u32 %v7162_v55, %v5487_v61  ;;  %v7189_v55 = vld [vmem:[#allocation2 + $0x10c] sm:$0xf0] }
 0x55a   :  { %v4425_v10 = vpop.f32.mrf.mxu2  ;;  %v5565_v61 = vld [vmem:[#allocation2 + $0xd0] sm:$0xf] }
 0x55b   :  { %v4426_v6 = vadd.f32 %v4425_v10, %v8680_v24  ;;  %v4554_v58 = vpop.f32.mrf.mxu3  ;;  %v5486_v24 = vor.u32 %v7171_v28, %v5485_v26 }
 0x55c   :  { %v4685_v14 = vpop.f32.mrf.mxu0 }
 0x55d   :  { %v4555_v38 = vadd.f32 %v4554_v58, %v4426_v6 }
 0x55e   :  { %v4814_v44 = vpop.f32.mrf.mxu1 }
 0x55f   :  { %v4684_v52 = vadd.f32 %v4683_v9, %v4555_v38 }
 0x561   :  { %v8992_v16 = vadd.f32 %v4812_v40, %v4684_v52 }
 0x562   :  { %v4427_v30 = vpop.f32.mrf.mxu2 }
 0x563   :  { %v4428_v48 = vadd.f32 %v4427_v30, %v8683_v0  ;;  %v4556_v8 = vpop.f32.mrf.mxu3  ;;  %v5567_v30 = vld [vmem:[#allocation2 + $0x118] sm:$0xf0] }
 0x564   :  { %v4688_v3 = vpop.f32.mrf.mxu0 }
 0x565   :  { %v4557_v9 = vadd.f32 %v4556_v8, %v4428_v48 }
 0x566   :  { %v4817_v42 = vpop.f32.mrf.mxu1 }
 0x567   :  { %v4686_v10 = vadd.f32 %v4685_v14, %v4557_v9  ;;  %4865 = vmatmul.bf16.vlgmr.msra.gmra.mxu2 %v5486_v24  ;;  %5123 = vmatmul.bf16.vlgmr.msra.gmra.mxu0 %v5494_v13  ;;  %v5559_v14 = vld [vmem:[#allocation2 + $0x110] sm:$0xf0]  ;;  %v5566_v13 = vor.u32 %v7190_v33, %v5565_v61  ;;  %v5570_v9 = vor.u32 %v7181_v19, %v5567_v30  ;;  %v5629_v61 = vld [vmem:[#allocation2 + $0x158] sm:$0xf]  ;;  %v7198_v33 = vld [vmem:[#allocation2 + $0x15c] sm:$0xf] }
 0x568   :  { %4994 = vmatmul.bf16.vlgmr.msra.gmra.mxu3 %v5490_v23  ;;  %v7208_v19 = vld [vmem:[#allocation2 + $0x1a4] sm:$0xf0]  ;;  %v7199_v30 = vld [vmem:[#allocation2 + $0x164] sm:$0xf] }
 0x569   :  { %5252 = vmatmul.bf16.vlgmr.msra.gmra.mxu1 %v5498_v59  ;;  %v8995_v6 = vadd.f32 %v4814_v44, %v4686_v10  ;;  %v5562_v59 = vor.u32 %v7180_v35, %v5559_v14  ;;  %v7207_v35 = vld [vmem:[#allocation2 + $0x19c] sm:$0xf0] }
 0x56a   :  { %v4430_v40 = vpop.f32.mrf.mxu2  ;;  %v5637_v14 = vld [vmem:[#allocation2 + $0x160] sm:$0xf] }
 0x56b   :  { %v4431_v58 = vadd.f32 %v4430_v40, %v8686_v49  ;;  %v4559_v38 = vpop.f32.mrf.mxu3  ;;  %v5558_v49 = vor.u32 %v7189_v55, %v5557_v22 }
 0x56c   :  { %v4690_v0 = vpop.f32.mrf.mxu0 }
 0x56d   :  { %v4560_v52 = vadd.f32 %v4559_v38, %v4431_v58 }
 0x56e   :  { %v4819_v26 = vpop.f32.mrf.mxu1 }
 0x56f   :  { %v4689_v28 = vadd.f32 %v4688_v3, %v4560_v52 }
 0x571   :  { %v8998_v48 = vadd.f32 %v4817_v42, %v4689_v28 }
 0x572   :  { %v4432_v44 = vpop.f32.mrf.mxu2 }
 0x573   :  { %v4433_v8 = vadd.f32 %v4432_v44, %v8701_v36  ;;  %v4561_v24 = vpop.f32.mrf.mxu3  ;;  %v5639_v44 = vld [vmem:[#allocation2 + $0x1a8] sm:$0xf0] }
 0x574   :  { %v4693_v23 = vpop.f32.mrf.mxu0 }
 0x575   :  { %v4562_v3 = vadd.f32 %v4561_v24, %v4433_v8 }
 0x576   :  { %v4822_v10 = vpop.f32.mrf.mxu1 }
 0x577   :  { %v4691_v40 = vadd.f32 %v4690_v0, %v4562_v3  ;;  %4870 = vmatmul.bf16.gmra.mxu2 %v5558_v49  ;;  %5128 = vmatmul.bf16.gmra.mxu0 %v5566_v13  ;;  %v5631_v0 = vld [vmem:[#allocation2 + $0x1a0] sm:$0xf0]  ;;  %v5638_v13 = vor.u32 %v7208_v19, %v5637_v14  ;;  %v5642_v3 = vor.u32 %v7199_v30, %v5639_v44  ;;  %v5701_v14 = vld [vmem:[#allocation2 + $0x1e8] sm:$0xf]  ;;  %v7216_v19 = vld [vmem:[#allocation2 + $0x1ec] sm:$0xf] }
 0x578   :  { %4999 = vmatmul.bf16.gmra.mxu3 %v5562_v59  ;;  %v7226_v30 = vld [vmem:[#allocation2 + $0x234] sm:$0xf0]  ;;  %v7217_v44 = vld [vmem:[#allocation2 + $0x1f4] sm:$0xf] }
 0x579   :  { %5257 = vmatmul.bf16.gmra.mxu1 %v5570_v9  ;;  %v9001_v58 = vadd.f32 %v4819_v26, %v4691_v40  ;;  %v5634_v9 = vor.u32 %v7198_v33, %v5631_v0  ;;  %v7225_v33 = vld [vmem:[#allocation2 + $0x22c] sm:$0xf0] }
 0x57a   :  { %v4435_v42 = vpop.f32.mrf.mxu2  ;;  %v5709_v0 = vld [vmem:[#allocation2 + $0x1f0] sm:$0xf] }
 0x57b   :  { %v4436_v38 = vadd.f32 %v4435_v42, %v8710_v54  ;;  %v4564_v52 = vpop.f32.mrf.mxu3  ;;  %v5630_v54 = vor.u32 %v7207_v35, %v5629_v61 }
 0x57c   :  { %v4695_v36 = vpop.f32.mrf.mxu0 }
 0x57d   :  { %v4565_v28 = vadd.f32 %v4564_v52, %v4436_v38  ;;  %v9339_v52 = vld [vmem:[#allocation13_spill] sm:$0xff] }
 0x57e   :  { %v4824_v22 = vpop.f32.mrf.mxu1 }
 0x57f   :  { %v4694_v55 = vadd.f32 %v4693_v23, %v4565_v28 }
 0x581   :  { %v9004_v8 = vadd.f32 %v4822_v10, %v4694_v55 }
 0x582   :  { %v4437_v26 = vpop.f32.mrf.mxu2 }
 0x583   :  { %v4438_v24 = vadd.f32 %v4437_v26, %v8719_v57  ;;  %v4566_v49 = vpop.f32.mrf.mxu3 }
 0x584   :  { %v4698_v59 = vpop.f32.mrf.mxu0 }
 0x585   :  { %v4567_v23 = vadd.f32 %v4566_v49, %v4438_v24  ;;  %v5711_v24 = vld [vmem:[#allocation2 + $0x238] sm:$0xf0] }
 0x586   :  { %v4827_v40 = vpop.f32.mrf.mxu1 }
 0x587   :  { %v4696_v42 = vadd.f32 %v4695_v36, %v4567_v23  ;;  %4875 = vmatmul.bf16.gmra.mxu2 %v5630_v54  ;;  %5133 = vmatmul.bf16.gmra.mxu0 %v5638_v13  ;;  %v5703_v36 = vld [vmem:[#allocation2 + $0x230] sm:$0xf0]  ;;  %v9341_v54 = vld [vmem:[#allocation14_spill] sm:$0xff]  ;;  %v5710_v23 = vor.u32 %v7226_v30, %v5709_v0  ;;  %v5773_v0 = vld [vmem:[#allocation2 + $0x278] sm:$0xf] }
 0x588   :  { %5004 = vmatmul.bf16.gmra.mxu3 %v5634_v9  ;;  %v7234_v30 = vld [vmem:[#allocation2 + $0x27c] sm:$0xf] }
 0x589   :  { %5262 = vmatmul.bf16.gmra.mxu1 %v5642_v3  ;;  %v9007_v38 = vadd.f32 %v4824_v22, %v4696_v42  ;;  %v5702_v3 = vor.u32 %v7225_v33, %v5701_v14 }
 0x58a   :  { %v4440_v10 = vpop.f32.mrf.mxu2 }
 0x58b   :  { %9338 = vst [vmem:[#allocation11_spill] sm:$0xff] %v9007_v38  ;;  %v4441_v28 = vadd.f32 %v4440_v10, %v9339_v52  ;;  %v4569_v55 = vpop.f32.mrf.mxu3  ;;  %v5706_v10 = vor.u32 %v7216_v19, %v5703_v36  ;;  %v5714_v52 = vor.u32 %v7217_v44, %v5711_v24  ;;  %v7243_v19 = vld [vmem:[#allocation2 + $0x2bc] sm:$0xf0]  ;;  %v7244_v44 = vld [vmem:[#allocation2 + $0x2c4] sm:$0xf0] }
 0x58c   :  { %v4700_v57 = vpop.f32.mrf.mxu0  ;;  %v5781_v36 = vld [vmem:[#allocation2 + $0x280] sm:$0xf]  ;;  %v7235_v24 = vld [vmem:[#allocation2 + $0x284] sm:$0xf] }
 0x58d   :  { %v4570_v26 = vadd.f32 %v4569_v55, %v4441_v28 }
 0x58e   :  { %v4829_v61 = vpop.f32.mrf.mxu1 }
 0x58f   :  { %v4699_v35 = vadd.f32 %v4698_v59, %v4570_v26 }
 0x591   :  { %v9010_v49 = vadd.f32 %v4827_v40, %v4699_v35  ;;  %v9342_v35 = vld [vmem:[#allocation15_spill] sm:$0xff] }
 0x592   :  { %v4442_v22 = vpop.f32.mrf.mxu2 }
 0x593   :  { %9340 = vst [vmem:[#allocation12_spill] sm:$0xff] %v9010_v49  ;;  %v4443_v13 = vadd.f32 %v4442_v22, %v9341_v54  ;;  %v4571_v9 = vpop.f32.mrf.mxu3 }
 0x594   :  { %v4703_v42 = vpop.f32.mrf.mxu0 }
 0x595   :  { %v4572_v59 = vadd.f32 %v4571_v9, %v4443_v13  ;;  %v5783_v13 = vld [vmem:[#allocation2 + $0x2c8] sm:$0xf0] }
 0x596   :  { %v4832_v28 = vpop.f32.mrf.mxu1 }
 0x597   :  { %v4701_v55 = vadd.f32 %v4700_v57, %v4572_v59  ;;  %4880 = vmatmul.bf16.gmra.mxu2 %v5702_v3  ;;  %5138 = vmatmul.bf16.gmra.mxu0 %v5710_v23  ;;  %v5775_v57 = vld [vmem:[#allocation2 + $0x2c0] sm:$0xf0]  ;;  %v9344_v3 = vld [vmem:[#allocation16_spill] sm:$0xff]  ;;  %v5782_v59 = vor.u32 %v7244_v44, %v5781_v36  ;;  %v5845_v36 = vld [vmem:[#allocation2 + $0x308] sm:$0xf] }
 0x598   :  { %5009 = vmatmul.bf16.gmra.mxu3 %v5706_v10  ;;  %v7252_v44 = vld [vmem:[#allocation2 + $0x30c] sm:$0xf] }
 0x599   :  { %5267 = vmatmul.bf16.gmra.mxu1 %v5714_v52  ;;  %v9013_v26 = vadd.f32 %v4829_v61, %v4701_v55  ;;  %v5774_v52 = vor.u32 %v7243_v19, %v5773_v0 }
 0x59a   :  { %v4445_v40 = vpop.f32.mrf.mxu2 }
 0x59b   :  { %v4446_v49 = vadd.f32 %v4445_v40, %v9342_v35  ;;  %v4574_v38 = vpop.f32.mrf.mxu3 }
 0x59c   :  { %v4705_v22 = vpop.f32.mrf.mxu0 }
 0x59d   :  { %v4575_v54 = vadd.f32 %v4574_v38, %v4446_v49  ;;  %v5778_v38 = vor.u32 %v7234_v30, %v5775_v57  ;;  %v5786_v49 = vor.u32 %v7235_v24, %v5783_v13  ;;  %v7261_v30 = vld [vmem:[#allocation2 + $0x34c] sm:$0xf0]  ;;  %v7262_v24 = vld [vmem:[#allocation2 + $0x354] sm:$0xf0]  ;;  %v7253_v13 = vld [vmem:[#allocation2 + $0x314] sm:$0xf] }
 0x59e   :  { %v4834_v14 = vpop.f32.mrf.mxu1  ;;  %v5853_v57 = vld [vmem:[#allocation2 + $0x310] sm:$0xf] }
 0x59f   :  { %v4704_v33 = vadd.f32 %v4703_v42, %v4575_v54 }
 0x5a1   :  { %v9016_v9 = vadd.f32 %v4832_v28, %v4704_v33 }
 0x5a2   :  { %v4447_v61 = vpop.f32.mrf.mxu2 }
 0x5a3   :  { %9343 = vst [vmem:[#allocation13_spill] sm:$0xff] %v9016_v9  ;;  %v4448_v23 = vadd.f32 %v4447_v61, %v9344_v3  ;;  %v4576_v10 = vpop.f32.mrf.mxu3 }
 0x5a4   :  { %v4708_v55 = vpop.f32.mrf.mxu0 }
 0x5a5   :  { %v4577_v42 = vadd.f32 %v4576_v10, %v4448_v23  ;;  %v5855_v23 = vld [vmem:[#allocation2 + $0x358] sm:$0xf0] }
 0x5a6   :  { %v4837_v40 = vpop.f32.mrf.mxu1 }
 0x5a7   :  { %v4706_v35 = vadd.f32 %v4705_v22, %v4577_v42  ;;  %4885 = vmatmul.bf16.gmra.mxu2 %v5774_v52  ;;  %5143 = vmatmul.bf16.gmra.mxu0 %v5782_v59  ;;  %v5847_v22 = vld [vmem:[#allocation2 + $0x350] sm:$0xf0]  ;;  %v9347_v52 = vld [vmem:[#allocation5_spill] sm:$0xff] }
 0x5a8   :  { %5014 = vmatmul.bf16.gmra.mxu3 %v5778_v38 }
 0x5a9   :  { %5272 = vmatmul.bf16.gmra.mxu1 %v5786_v49  ;;  %v9019_v54 = vadd.f32 %v4834_v14, %v4706_v35  ;;  %v5854_v49 = vor.u32 %v7262_v24, %v5853_v57  ;;  %v5858_v35 = vor.u32 %v7253_v13, %v5855_v23  ;;  %v5917_v57 = vld [vmem:[#allocation2 + $0x398] sm:$0xf]  ;;  %v7270_v24 = vld [vmem:[#allocation2 + $0x39c] sm:$0xf]  ;;  %v7280_v13 = vld [vmem:[#allocation2 + $0x3e4] sm:$0xf0] }
 0x5aa   :  { %v4450_v28 = vpop.f32.mrf.mxu2  ;;  %v7271_v23 = vld [vmem:[#allocation2 + $0x3a4] sm:$0xf] }
 0x5ab   :  { %9345 = vst [vmem:[#allocation14_spill] sm:$0xff] %v9019_v54  ;;  %v4451_v33 = vadd.f32 %v4450_v28, %v8752_v25  ;;  %v4579_v9 = vpop.f32.mrf.mxu3  ;;  %v5846_v25 = vor.u32 %v7261_v30, %v5845_v36 }
 0x5ac   :  { %v4710_v61 = vpop.f32.mrf.mxu0 }
 0x5ad   :  { %v4580_v3 = vadd.f32 %v4579_v9, %v4451_v33  ;;  %v5850_v9 = vor.u32 %v7252_v44, %v5847_v22  ;;  %v7279_v44 = vld [vmem:[#allocation2 + $0x3dc] sm:$0xf0] }
 0x5ae   :  { %v4839_v0 = vpop.f32.mrf.mxu1  ;;  %v5925_v22 = vld [vmem:[#allocation2 + $0x3a0] sm:$0xf] }
 0x5af   :  { %v4709_v19 = vadd.f32 %v4708_v55, %v4580_v3 }
 0x5b1   :  { %v9022_v10 = vadd.f32 %v4837_v40, %v4709_v19  ;;  %v9348_v19 = vld [vmem:[#allocation6_spill] sm:$0xff] }
 0x5b2   :  { %v4452_v14 = vpop.f32.mrf.mxu2 }
 0x5b3   :  { %9346 = vst [vmem:[#allocation15_spill] sm:$0xff] %v9022_v10  ;;  %v4453_v59 = vadd.f32 %v4452_v14, %v9347_v52  ;;  %v4581_v38 = vpop.f32.mrf.mxu3 }
 0x5b4   :  { %v4713_v42 = vpop.f32.mrf.mxu0 }
 0x5b5   :  { %v4582_v55 = vadd.f32 %v4581_v38, %v4453_v59  ;;  %v5927_v59 = vld [vmem:[#allocation2 + $0x3e8] sm:$0xf0] }
 0x5b6   :  { %v4842_v28 = vpop.f32.mrf.mxu1 }
 0x5b7   :  { %v4711_v33 = vadd.f32 %v4710_v61, %v4582_v55  ;;  %4890 = vmatmul.bf16.gmra.mxu2 %v5846_v25  ;;  %5148 = vmatmul.bf16.gmra.mxu0 %v5854_v49  ;;  %v5919_v61 = vld [vmem:[#allocation2 + $0x3e0] sm:$0xf0] }
 0x5b8   :  { %5019 = vmatmul.bf16.gmra.mxu3 %v5850_v9  ;;  %v5918_v9 = vor.u32 %v7279_v44, %v5917_v57 }
 0x5b9   :  { %5277 = vmatmul.bf16.gmra.mxu1 %v5858_v35  ;;  %v9025_v3 = vadd.f32 %v4839_v0, %v4711_v33  ;;  %v5926_v35 = vor.u32 %v7280_v13, %v5925_v22  ;;  %v5989_v22 = vld [vmem:[#allocation2 + $0x428] sm:$0xf]  ;;  %v7288_v13 = vld [vmem:[#allocation2 + $0x42c] sm:$0xf] }
 0x5ba   :  { %v4455_v40 = vpop.f32.mrf.mxu2 }
 0x5bb   :  { %v4456_v10 = vadd.f32 %v4455_v40, %v9348_v19  ;;  %v4584_v54 = vpop.f32.mrf.mxu3 }
 0x5bc   :  { %v4715_v14 = vpop.f32.mrf.mxu0 }
 0x5bd   :  { %v4585_v52 = vadd.f32 %v4584_v54, %v4456_v10  ;;  %v5922_v54 = vor.u32 %v7270_v24, %v5919_v61  ;;  %v5930_v10 = vor.u32 %v7271_v23, %v5927_v59  ;;  %v7297_v24 = vld [vmem:[#allocation2 + $0x46c] sm:$0xf0]  ;;  %v7298_v23 = vld [vmem:[#allocation2 + $0x474] sm:$0xf0]  ;;  %v7289_v59 = vld [vmem:[#allocation2 + $0x434] sm:$0xf] }
 0x5be   :  { %v4844_v36 = vpop.f32.mrf.mxu1  ;;  %v5997_v61 = vld [vmem:[#allocation2 + $0x430] sm:$0xf] }
 0x5bf   :  { %v4714_v30 = vadd.f32 %v4713_v42, %v4585_v52  ;;  %v9350_v52 = vld [vmem:[#allocation7_spill] sm:$0xff] }
 0x5c1   :  { %v9028_v38 = vadd.f32 %v4842_v28, %v4714_v30 }
 0x5c2   :  { %v4457_v0 = vpop.f32.mrf.mxu2 }
 0x5c3   :  { %9349 = vst [vmem:[#allocation16_spill] sm:$0xff] %v9028_v38  ;;  %v4458_v25 = vadd.f32 %v4457_v0, %v8767_v60  ;;  %v4586_v49 = vpop.f32.mrf.mxu3 }
 0x5c4   :  { %v4718_v55 = vpop.f32.mrf.mxu0 }
 0x5c5   :  { %v4587_v42 = vadd.f32 %v4586_v49, %v4458_v25  ;;  %v5999_v25 = vld [vmem:[#allocation2 + $0x478] sm:$0xf0] }
 0x5c6   :  { %v4847_v33 = vpop.f32.mrf.mxu1 }
 0x5c7   :  { %v4716_v40 = vadd.f32 %v4715_v14, %v4587_v42  ;;  %4895 = vmatmul.bf16.gmra.mxu2 %v5918_v9  ;;  %5153 = vmatmul.bf16.gmra.mxu0 %v5926_v35  ;;  %v5991_v14 = vld [vmem:[#allocation2 + $0x470] sm:$0xf0]  ;;  %v9352_v9 = vld [vmem:[#allocation8_spill] sm:$0xff]  ;;  %v5998_v42 = vor.u32 %v7298_v23, %v5997_v61 }
 0x5c8   :  { %5024 = vmatmul.bf16.gmra.mxu3 %v5922_v54  ;;  %v6061_v61 = vld [vmem:[#allocation2 + $0x4b8] sm:$0xf]  ;;  %v7306_v23 = vld [vmem:[#allocation2 + $0x4bc] sm:$0xf] }
 0x5c9   :  { %5282 = vmatmul.bf16.gmra.mxu1 %v5930_v10  ;;  %v9031_v19 = vadd.f32 %v4844_v36, %v4716_v40  ;;  %v5990_v10 = vor.u32 %v7297_v24, %v5989_v22 }
 0x5ca   :  { %v4460_v28 = vpop.f32.mrf.mxu2 }
 0x5cb   :  { %v4461_v30 = vadd.f32 %v4460_v28, %v9350_v52  ;;  %v4589_v38 = vpop.f32.mrf.mxu3  ;;  %v6002_v28 = vor.u32 %v7289_v59, %v5999_v25  ;;  %v7316_v59 = vld [vmem:[#allocation2 + $0x504] sm:$0xf0]  ;;  %v7307_v25 = vld [vmem:[#allocation2 + $0x4c4] sm:$0xf] }
 0x5cc   :  { %v4720_v60 = vpop.f32.mrf.mxu0 }
 0x5cd   :  { %v4590_v0 = vadd.f32 %v4589_v38, %v4461_v30  ;;  %v5994_v38 = vor.u32 %v7288_v13, %v5991_v14  ;;  %v7315_v13 = vld [vmem:[#allocation2 + $0x4fc] sm:$0xf0] }
 0x5ce   :  { %v4849_v57 = vpop.f32.mrf.mxu1  ;;  %v6069_v14 = vld [vmem:[#allocation2 + $0x4c0] sm:$0xf] }
 0x5cf   :  { %v4719_v44 = vadd.f32 %v4718_v55, %v4590_v0 }
 0x5d1   :  { %v9034_v49 = vadd.f32 %v4847_v33, %v4719_v44 }
 0x5d2   :  { %v4462_v36 = vpop.f32.mrf.mxu2 }
 0x5d3   :  { %9351 = vst [vmem:[#allocation5_spill] sm:$0xff] %v9034_v49  ;;  %v4463_v35 = vadd.f32 %v4462_v36, %v9352_v9  ;;  %v4591_v54 = vpop.f32.mrf.mxu3 }
 0x5d4   :  { %v4723_v40 = vpop.f32.mrf.mxu0 }
 0x5d5   :  { %v4592_v55 = vadd.f32 %v4591_v54, %v4463_v35  ;;  %v6071_v35 = vld [vmem:[#allocation2 + $0x508] sm:$0xf0] }
 0x5d6   :  { %v4852_v52 = vpop.f32.mrf.mxu1 }
 0x5d7   :  { %v4721_v30 = vadd.f32 %v4720_v60, %v4592_v55  ;;  %4900 = vmatmul.bf16.gmra.mxu2 %v5990_v10  ;;  %5158 = vmatmul.bf16.gmra.mxu0 %v5998_v42  ;;  %v6063_v60 = vld [vmem:[#allocation2 + $0x500] sm:$0xf0]  ;;  %v6074_v55 = vor.u32 %v7307_v25, %v6071_v35  ;;  %v6135_v35 = vld [vmem:[#allocation2 + $0x590] sm:$0xf0] }
 0x5d8   :  { %5029 = vmatmul.bf16.gmra.mxu3 %v5994_v38  ;;  %v6070_v38 = vor.u32 %v7316_v59, %v6069_v14  ;;  %v7333_v14 = vld [vmem:[#allocation2 + $0x58c] sm:$0xf0]  ;;  %v7324_v59 = vld [vmem:[#allocation2 + $0x54c] sm:$0xf] }
 0x5d9   :  { %5287 = vmatmul.bf16.gmra.mxu1 %v6002_v28  ;;  %v9037_v0 = vadd.f32 %v4849_v57, %v4721_v30 }
 0x5da   :  { %v4465_v33 = vpop.f32.mrf.mxu2 }
 0x5db   :  { %v4466_v44 = vadd.f32 %v4465_v33, %v8794_v53  ;;  %v4594_v49 = vpop.f32.mrf.mxu3  ;;  %v6062_v53 = vor.u32 %v7315_v13, %v6061_v61 }
 0x5dc   :  { %v4725_v36 = vpop.f32.mrf.mxu0 }
 0x5dd   :  { %v4595_v9 = vadd.f32 %v4594_v49, %v4466_v44  ;;  %v6066_v49 = vor.u32 %v7306_v23, %v6063_v60  ;;  %v6133_v23 = vld [vmem:[#allocation2 + $0x548] sm:$0xf]  ;;  %v6141_v60 = vld [vmem:[#allocation2 + $0x550] sm:$0xf] }
 0x5de   :  { %v4854_v22 = vpop.f32.mrf.mxu1 }
 0x5df   :  { %v4724_v24 = vadd.f32 %v4723_v40, %v4595_v9 }
 0x5e1   :  { %v9040_v54 = vadd.f32 %v4852_v52, %v4724_v24 }
 0x5e2   :  { %v4467_v57 = vpop.f32.mrf.mxu2 }
 0x5e3   :  { %v4468_v10 = vadd.f32 %v4467_v57, %v8803_v34  ;;  %v4596_v42 = vpop.f32.mrf.mxu3 }
 0x5e4   :  { %v5124_v28 = vpop.f32.mrf.mxu0 }
 0x5e5   :  { %v4597_v40 = vadd.f32 %v4596_v42, %v4468_v10  ;;  %v7325_v10 = vld [vmem:[#allocation2 + $0x554] sm:$0xf]  ;;  %v6143_v42 = vld [vmem:[#allocation2 + $0x598] sm:$0xf0] }
 0x5e6   :  { %v5253_v30 = vpop.f32.mrf.mxu1 }
 0x5e7   :  { %v4726_v33 = vadd.f32 %v4725_v36, %v4597_v40  ;;  %4905 = vmatmul.bf16.gmra.mxu2 %v6062_v53  ;;  %5163 = vmatmul.bf16.gmra.mxu0 %v6070_v38  ;;  %v7334_v36 = vld [vmem:[#allocation2 + $0x594] sm:$0xf0]  ;;  %v6134_v38 = vor.u32 %v7333_v14, %v6133_v23  ;;  %v6146_v40 = vor.u32 %v7325_v10, %v6143_v42  ;;  %v7352_v10 = vld [vmem:[#allocation2 + $0x624] sm:$0xf0] }
 0x5e8   :  { %5034 = vmatmul.bf16.gmra.mxu3 %v6066_v49 }
 0x5e9   :  { %5292 = vmatmul.bf16.gmra.mxu1 %v6074_v55  ;;  %v9043_v44 = vadd.f32 %v4854_v22, %v4726_v33  ;;  %v6138_v55 = vor.u32 %v7324_v59, %v6135_v35  ;;  %v6213_v35 = vld [vmem:[#allocation2 + $0x5e0] sm:$0xf] }
 0x5ea   :  { %v4866_v52 = vpop.f32.mrf.mxu2 }
 0x5eb   :  { %v4867_v9 = vadd.f32 %v4866_v52, %v8806_v51  ;;  %v4995_v24 = vpop.f32.mrf.mxu3 }
 0x5ec   :  { %v5126_v34 = vpop.f32.mrf.mxu0 }
 0x5ed   :  { %v4996_v57 = vadd.f32 %v4995_v24, %v4867_v9 }
 0x5ee   :  { %v5255_v61 = vpop.f32.mrf.mxu1 }
 0x5ef   :  { %v5125_v13 = vadd.f32 %v5124_v28, %v4996_v57  ;;  %v6142_v28 = vor.u32 %v7334_v36, %v6141_v60  ;;  %v6205_v36 = vld [vmem:[#allocation2 + $0x5d8] sm:$0xf] }
 0x5f1   :  { %v5254_v25 = vadd.f32 %v5253_v30, %v5125_v13 }
 0x5f2   :  { %v4868_v22 = vpop.f32.mrf.mxu2 }
 0x5f3   :  { %5374 = vst.msk [vmem:[%s9287_s2] sm:$0xff] %vm5373_vm0, %v5254_v25  ;;  %v4869_v51 = vadd.f32 %v4868_v22, %v8809_v1  ;;  %v4997_v53 = vpop.f32.mrf.mxu3  ;;  %v9353_v1 = vld [vmem:[#allocation9_spill] sm:$0xff]  ;;  %v7342_v25 = vld [vmem:[#allocation2 + $0x5dc] sm:$0xf] }
 0x5f4   :  { %v5129_v49 = vpop.f32.mrf.mxu0  ;;  %v7343_v22 = vld [vmem:[#allocation2 + $0x5e4] sm:$0xf] }
 0x5f5   :  { %v4998_v33 = vadd.f32 %v4997_v53, %v4869_v51  ;;  %v6215_v51 = vld [vmem:[#allocation2 + $0x628] sm:$0xf0] }
 0x5f6   :  { %v5258_v52 = vpop.f32.mrf.mxu1 }
 0x5f7   :  { %v5127_v30 = vadd.f32 %v5126_v34, %v4998_v33  ;;  %4910 = vmatmul.bf16.gmra.mxu2 %v6134_v38  ;;  %5168 = vmatmul.bf16.gmra.mxu0 %v6142_v28  ;;  %v7351_v34 = vld [vmem:[#allocation2 + $0x61c] sm:$0xf0]  ;;  %v9354_v38 = vld [vmem:[#allocation10_spill] sm:$0xff] }
 0x5f8   :  { %5039 = vmatmul.bf16.gmra.mxu3 %v6138_v55 }
 0x5f9   :  { %5297 = vmatmul.bf16.gmra.mxu1 %v6146_v40  ;;  %v5256_v9 = vadd.f32 %v5255_v61, %v5127_v30  ;;  %v6207_v61 = vld [vmem:[#allocation2 + $0x620] sm:$0xf0]  ;;  %v6206_v40 = vor.u32 %v7351_v34, %v6205_v36 }
 0x5fa   :  { %v4871_v24 = vpop.f32.mrf.mxu2  ;;  %v6210_v30 = vor.u32 %v7342_v25, %v6207_v61  ;;  %v6285_v61 = vld [vmem:[#allocation2 + $0x670] sm:$0xf] }
 0x5fb   :  { %5375 = vst.msk [vmem:[%s9287_s2 + $0x8] sm:$0xff] %vm5373_vm0, %v5256_v9  ;;  %v4872_v57 = vadd.f32 %v4871_v24, %v9353_v1  ;;  %v5000_v13 = vpop.f32.mrf.mxu3  ;;  %v6218_v9 = vor.u32 %v7343_v22, %v6215_v51  ;;  %v7370_v22 = vld [vmem:[#allocation2 + $0x6b4] sm:$0xf0] }
 0x5fc   :  { %v5131_v23 = vpop.f32.mrf.mxu0 }
 0x5fd   :  { %v5001_v14 = vadd.f32 %v5000_v13, %v4872_v57 }
 0x5fe   :  { %v5260_v59 = vpop.f32.mrf.mxu1 }
 0x5ff   :  { %v5130_v60 = vadd.f32 %v5129_v49, %v5001_v14  ;;  %v6214_v49 = vor.u32 %v7352_v10, %v6213_v35  ;;  %v6277_v10 = vld [vmem:[#allocation2 + $0x668] sm:$0xf] }
 0x601   :  { %v5259_v42 = vadd.f32 %v5258_v52, %v5130_v60 }
 0x602   :  { %v4873_v53 = vpop.f32.mrf.mxu2 }
 0x603   :  { %5376 = vst.msk [vmem:[%s9287_s2 + $0x10] sm:$0xff] %vm5373_vm0, %v5259_v42  ;;  %v4874_v28 = vadd.f32 %v4873_v53, %v9354_v38  ;;  %v5002_v55 = vpop.f32.mrf.mxu3  ;;  %v7360_v42 = vld [vmem:[#allocation2 + $0x66c] sm:$0xf]  ;;  %v7361_v53 = vld [vmem:[#allocation2 + $0x674] sm:$0xf] }
 0x604   :  { %v5134_v33 = vpop.f32.mrf.mxu0  ;;  %v6287_v38 = vld [vmem:[#allocation2 + $0x6b8] sm:$0xf0] }
 0x605   :  { %v5003_v24 = vadd.f32 %v5002_v55, %v4874_v28 }
 0x606   :  { %v5263_v1 = vpop.f32.mrf.mxu1 }
 0x607   :  { %v5132_v52 = vadd.f32 %v5131_v23, %v5003_v24  ;;  %4915 = vmatmul.bf16.gmra.mxu2 %v6206_v40  ;;  %5173 = vmatmul.bf16.gmra.mxu0 %v6214_v49  ;;  %v7369_v23 = vld [vmem:[#allocation2 + $0x6ac] sm:$0xf0]  ;;  %v6286_v49 = vor.u32 %v7370_v22, %v6285_v61  ;;  %v6357_v61 = vld [vmem:[#allocation2 + $0x700] sm:$0xf]  ;;  %v7388_v22 = vld [vmem:[#allocation2 + $0x744] sm:$0xf0] }
 0x608   :  { %5044 = vmatmul.bf16.gmra.mxu3 %v6210_v30  ;;  %v6278_v40 = vor.u32 %v7369_v23, %v6277_v10  ;;  %v6349_v23 = vld [vmem:[#allocation2 + $0x6f8] sm:$0xf] }
 0x609   :  { %5302 = vmatmul.bf16.gmra.mxu1 %v6218_v9  ;;  %v5261_v57 = vadd.f32 %v5260_v59, %v5132_v52  ;;  %v6279_v59 = vld [vmem:[#allocation2 + $0x6b0] sm:$0xf0]  ;;  %v6290_v9 = vor.u32 %v7361_v53, %v6287_v38  ;;  %v6359_v53 = vld [vmem:[#allocation2 + $0x748] sm:$0xf0] }
 0x60a   :  { %v4876_v13 = vpop.f32.mrf.mxu2  ;;  %v6282_v30 = vor.u32 %v7360_v42, %v6279_v59  ;;  %v7378_v42 = vld [vmem:[#allocation2 + $0x6fc] sm:$0xf]  ;;  %v7379_v59 = vld [vmem:[#allocation2 + $0x704] sm:$0xf] }
 0x60b   :  { %5377 = vst.msk [vmem:[%s9287_s2 + $0x18] sm:$0xff] %vm5373_vm0, %v5261_v57  ;;  %v4877_v14 = vadd.f32 %v4876_v13, %v8836_v43  ;;  %v5005_v60 = vpop.f32.mrf.mxu3 }
 0x60c   :  { %v5136_v36 = vpop.f32.mrf.mxu0 }
 0x60d   :  { %v5006_v34 = vadd.f32 %v5005_v60, %v4877_v14 }
 0x60e   :  { %v5265_v25 = vpop.f32.mrf.mxu1 }
 0x60f   :  { %v5135_v35 = vadd.f32 %v5134_v33, %v5006_v34 }
 0x611   :  { %v5264_v51 = vadd.f32 %v5263_v1, %v5135_v35 }
 0x612   :  { %v4878_v28 = vpop.f32.mrf.mxu2 }
 0x613   :  { %5378 = vst.msk [vmem:[%s9287_s2 + $0x20] sm:$0xff] %vm5373_vm0, %v5264_v51  ;;  %v4879_v43 = vadd.f32 %v4878_v28, %v8845_v39  ;;  %v5007_v55 = vpop.f32.mrf.mxu3 }
 0x614   :  { %v5139_v33 = vpop.f32.mrf.mxu0 }
 0x615   :  { %v5008_v24 = vadd.f32 %v5007_v55, %v4879_v43  ;;  %v6358_v55 = vor.u32 %v7388_v22, %v6357_v61  ;;  %v7397_v22 = vld [vmem:[#allocation2 + $0x794] sm:$0xf] }
 0x616   :  { %v5268_v52 = vpop.f32.mrf.mxu1 }
 0x617   :  { %v5137_v1 = vadd.f32 %v5136_v36, %v5008_v24  ;;  %4920 = vmatmul.bf16.gmra.mxu2 %v6278_v40  ;;  %5178 = vmatmul.bf16.gmra.mxu0 %v6286_v49  ;;  %v7387_v36 = vld [vmem:[#allocation2 + $0x73c] sm:$0xf0] }
 0x618   :  { %5049 = vmatmul.bf16.gmra.mxu3 %v6282_v30  ;;  %v6350_v43 = vor.u32 %v7387_v36, %v6349_v23  ;;  %v7396_v23 = vld [vmem:[#allocation2 + $0x78c] sm:$0xf]  ;;  %v6429_v36 = vld [vmem:[#allocation2 + $0x790] sm:$0xf] }
 0x619   :  { %5307 = vmatmul.bf16.gmra.mxu1 %v6290_v9  ;;  %v5266_v57 = vadd.f32 %v5265_v25, %v5137_v1  ;;  %v6351_v25 = vld [vmem:[#allocation2 + $0x740] sm:$0xf0] }
 0x61a   :  { %v4881_v13 = vpop.f32.mrf.mxu2  ;;  %v6354_v49 = vor.u32 %v7378_v42, %v6351_v25  ;;  %v7406_v42 = vld [vmem:[#allocation2 + $0x7d4] sm:$0xf0] }
 0x61b   :  { %5379 = vst.msk [vmem:[%s9287_s2 + $0x28] sm:$0xff] %vm5373_vm0, %v5266_v57  ;;  %v4882_v39 = vadd.f32 %v4881_v13, %v8848_v27  ;;  %v5010_v14 = vpop.f32.mrf.mxu3 }
 0x61c   :  { %v5141_v60 = vpop.f32.mrf.mxu0 }
 0x61d   :  { %v5011_v34 = vadd.f32 %v5010_v14, %v4882_v39 }
 0x61e   :  { %v5270_v35 = vpop.f32.mrf.mxu1 }
 0x61f   :  { %v5140_v10 = vadd.f32 %v5139_v33, %v5011_v34  ;;  %v6362_v33 = vor.u32 %v7379_v59, %v6359_v53 }
 0x621   :  { %v5269_v51 = vadd.f32 %v5268_v52, %v5140_v10  ;;  %v6421_v10 = vld [vmem:[#allocation2 + $0x788] sm:$0xf] }
 0x622   :  { %v4883_v38 = vpop.f32.mrf.mxu2 }
 0x623   :  { %5380 = vst.msk [vmem:[%s9287_s2 + $0x30] sm:$0xff] %vm5373_vm0, %v5269_v51  ;;  %v4884_v27 = vadd.f32 %v4883_v38, %v8851_v18  ;;  %v5012_v28 = vpop.f32.mrf.mxu3  ;;  %v6431_v51 = vld [vmem:[#allocation2 + $0x7d8] sm:$0xf0]  ;;  %v6430_v38 = vor.u32 %v7406_v42, %v6429_v36  ;;  %v6503_v36 = vld [vmem:[#allocation2 + $0x868] sm:$0xf0] }
 0x624   :  { %v5144_v40 = vpop.f32.mrf.mxu0 }
 0x625   :  { %v5013_v30 = vadd.f32 %v5012_v28, %v4884_v27 }
 0x626   :  { %v5273_v9 = vpop.f32.mrf.mxu1 }
 0x627   :  { %v5142_v24 = vadd.f32 %v5141_v60, %v5013_v30  ;;  %4925 = vmatmul.bf16.gmra.mxu2 %v6350_v43  ;;  %5183 = vmatmul.bf16.gmra.mxu0 %v6358_v55  ;;  %v7405_v60 = vld [vmem:[#allocation2 + $0x7cc] sm:$0xf0]  ;;  %v6434_v43 = vor.u32 %v7397_v22, %v6431_v51 }
 0x628   :  { %5054 = vmatmul.bf16.gmra.mxu3 %v6354_v49  ;;  %v6422_v53 = vor.u32 %v7405_v60, %v6421_v10  ;;  %v7424_v10 = vld [vmem:[#allocation2 + $0x864] sm:$0xf0] }
 0x629   :  { %5312 = vmatmul.bf16.gmra.mxu1 %v6362_v33  ;;  %v5271_v52 = vadd.f32 %v5270_v35, %v5142_v24  ;;  %v6423_v35 = vld [vmem:[#allocation2 + $0x7d0] sm:$0xf0] }
 0x62a   :  { %v4886_v1 = vpop.f32.mrf.mxu2  ;;  %v6426_v28 = vor.u32 %v7396_v23, %v6423_v35  ;;  %v7415_v23 = vld [vmem:[#allocation2 + $0x824] sm:$0xf] }
 0x62b   :  { %5381 = vst.msk [vmem:[%s9287_s2 + $0x38] sm:$0xff] %vm5373_vm0, %v5271_v52  ;;  %v4887_v18 = vadd.f32 %v4886_v1, %v8854_v41  ;;  %v5015_v57 = vpop.f32.mrf.mxu3 }
 0x62c   :  { %v5146_v13 = vpop.f32.mrf.mxu0 }
 0x62d   :  { %v5016_v39 = vadd.f32 %v5015_v57, %v4887_v18  ;;  %v6493_v57 = vld [vmem:[#allocation2 + $0x818] sm:$0xf] }
 0x62e   :  { %v5275_v14 = vpop.f32.mrf.mxu1 }
 0x62f   :  { %v5145_v34 = vadd.f32 %v5144_v40, %v5016_v39  ;;  %v7414_v39 = vld [vmem:[#allocation2 + $0x81c] sm:$0xf] }
 0x631   :  { %v5274_v61 = vadd.f32 %v5273_v9, %v5145_v34  ;;  %v6501_v34 = vld [vmem:[#allocation2 + $0x820] sm:$0xf] }
 0x632   :  { %v4888_v25 = vpop.f32.mrf.mxu2  ;;  %v6502_v22 = vor.u32 %v7424_v10, %v6501_v34 }
 0x633   :  { %5382 = vst.msk [vmem:[%s9287_s2 + $0x40] sm:$0xff] %vm5373_vm0, %v5274_v61  ;;  %v4889_v41 = vadd.f32 %v4888_v25, %v8869_v15  ;;  %v5017_v59 = vpop.f32.mrf.mxu3 }
 0x634   :  { %v5149_v27 = vpop.f32.mrf.mxu0 }
 0x635   :  { %v5018_v55 = vadd.f32 %v5017_v59, %v4889_v41  ;;  %v6506_v41 = vor.u32 %v7415_v23, %v6503_v36 }
 0x636   :  { %v5278_v40 = vpop.f32.mrf.mxu1 }
 0x637   :  { %v5147_v49 = vadd.f32 %v5146_v13, %v5018_v55  ;;  %4930 = vmatmul.bf16.gmra.mxu2 %v6422_v53  ;;  %5188 = vmatmul.bf16.gmra.mxu0 %v6430_v38  ;;  %v7423_v13 = vld [vmem:[#allocation2 + $0x85c] sm:$0xf0] }
 0x638   :  { %5059 = vmatmul.bf16.gmra.mxu3 %v6426_v28  ;;  %v6494_v35 = vor.u32 %v7423_v13, %v6493_v57  ;;  %v7433_v57 = vld [vmem:[#allocation2 + $0x8b4] sm:$0xf]  ;;  %v6575_v13 = vld [vmem:[#allocation2 + $0x8f8] sm:$0xf0] }
 0x639   :  { %5317 = vmatmul.bf16.gmra.mxu1 %v6434_v43  ;;  %v5276_v33 = vadd.f32 %v5275_v14, %v5147_v49  ;;  %v6495_v14 = vld [vmem:[#allocation2 + $0x860] sm:$0xf0]  ;;  %v6578_v36 = vor.u32 %v7433_v57, %v6575_v13 }
 0x63a   :  { %v4891_v30 = vpop.f32.mrf.mxu2  ;;  %v6498_v25 = vor.u32 %v7414_v39, %v6495_v14 }
 0x63b   :  { %5383 = vst.msk [vmem:[%s9287_s2 + $0x48] sm:$0xff] %vm5373_vm0, %v5276_v33  ;;  %v4892_v15 = vadd.f32 %v4891_v30, %v8878_v47  ;;  %v5020_v9 = vpop.f32.mrf.mxu3  ;;  %v6565_v30 = vld [vmem:[#allocation2 + $0x8a8] sm:$0xf] }
 0x63c   :  { %v5151_v24 = vpop.f32.mrf.mxu0 }
 0x63d   :  { %v5021_v52 = vadd.f32 %v5020_v9, %v4892_v15  ;;  %v7441_v15 = vld [vmem:[#allocation2 + $0x8ec] sm:$0xf0]  ;;  %v7432_v9 = vld [vmem:[#allocation2 + $0x8ac] sm:$0xf] }
 0x63e   :  { %v5280_v1 = vpop.f32.mrf.mxu1  ;;  %v6566_v10 = vor.u32 %v7441_v15, %v6565_v30 }
 0x63f   :  { %v5150_v18 = vadd.f32 %v5149_v27, %v5021_v52  ;;  %v7442_v52 = vld [vmem:[#allocation2 + $0x8f4] sm:$0xf0] }
 0x641   :  { %v5279_v60 = vadd.f32 %v5278_v40, %v5150_v18 }
 0x642   :  { %v4893_v42 = vpop.f32.mrf.mxu2 }
 0x643   :  { %5384 = vst.msk [vmem:[%s9287_s2 + $0x50] sm:$0xff] %vm5373_vm0, %v5279_v60  ;;  %v4894_v47 = vadd.f32 %v4893_v42, %v8887_v31  ;;  %v5022_v61 = vpop.f32.mrf.mxu3 }
 0x644   :  { %v5154_v51 = vpop.f32.mrf.mxu0 }
 0x645   :  { %v5023_v59 = vadd.f32 %v5022_v61, %v4894_v47 }
 0x646   :  { %v5283_v53 = vpop.f32.mrf.mxu1 }
 0x647   :  { %v5152_v38 = vadd.f32 %v5151_v24, %v5023_v59  ;;  %4935 = vmatmul.bf16.gmra.mxu2 %v6494_v35  ;;  %5193 = vmatmul.bf16.gmra.mxu0 %v6502_v22  ;;  %v6573_v24 = vld [vmem:[#allocation2 + $0x8b0] sm:$0xf] }
 0x648   :  { %5064 = vmatmul.bf16.gmra.mxu3 %v6498_v25  ;;  %v6574_v60 = vor.u32 %v7442_v52, %v6573_v24 }
 0x649   :  { %5322 = vmatmul.bf16.gmra.mxu1 %v6506_v41  ;;  %v5281_v27 = vadd.f32 %v5280_v1, %v5152_v38  ;;  %v6567_v1 = vld [vmem:[#allocation2 + $0x8f0] sm:$0xf0]  ;;  %v6637_v38 = vld [vmem:[#allocation2 + $0x938] sm:$0xf] }
 0x64a   :  { %v4896_v28 = vpop.f32.mrf.mxu2  ;;  %v6570_v23 = vor.u32 %v7432_v9, %v6567_v1 }
 0x64b   :  { %5385 = vst.msk [vmem:[%s9287_s2 + $0x58] sm:$0xff] %vm5373_vm0, %v5281_v27  ;;  %v4897_v31 = vadd.f32 %v4896_v28, %v8890_v2  ;;  %v5025_v43 = vpop.f32.mrf.mxu3  ;;  %v7459_v27 = vld [vmem:[#allocation2 + $0x97c] sm:$0xf0]  ;;  %v7450_v28 = vld [vmem:[#allocation2 + $0x93c] sm:$0xf] }
 0x64c   :  { %v5156_v55 = vpop.f32.mrf.mxu0  ;;  %v6638_v9 = vor.u32 %v7459_v27, %v6637_v38 }
 0x64d   :  { %v5026_v40 = vadd.f32 %v5025_v43, %v4897_v31  ;;  %v6645_v31 = vld [vmem:[#allocation2 + $0x940] sm:$0xf]  ;;  %v7460_v43 = vld [vmem:[#allocation2 + $0x984] sm:$0xf0] }
 0x64e   :  { %v5285_v49 = vpop.f32.mrf.mxu1  ;;  %v6646_v24 = vor.u32 %v7460_v43, %v6645_v31 }
 0x64f   :  { %v5155_v33 = vadd.f32 %v5154_v51, %v5026_v40  ;;  %v6639_v40 = vld [vmem:[#allocation2 + $0x980] sm:$0xf0] }
 0x651   :  { %v5284_v18 = vadd.f32 %v5283_v53, %v5155_v33  ;;  %v6647_v33 = vld [vmem:[#allocation2 + $0x988] sm:$0xf0] }
 0x652   :  { %v4898_v39 = vpop.f32.mrf.mxu2 }
 0x653   :  { %5386 = vst.msk [vmem:[%s9287_s2 + $0x60] sm:$0xff] %vm5373_vm0, %v5284_v18  ;;  %v4899_v2 = vadd.f32 %v4898_v39, %v8893_v62  ;;  %v5027_v34 = vpop.f32.mrf.mxu3  ;;  %v6642_v18 = vor.u32 %v7450_v28, %v6639_v40 }
 0x654   :  { %v5159_v14 = vpop.f32.mrf.mxu0 }
 0x655   :  { %v5028_v42 = vadd.f32 %v5027_v34, %v4899_v2 }
 0x656   :  { %v5288_v47 = vpop.f32.mrf.mxu1 }
 0x657   :  { %v5157_v61 = vadd.f32 %v5156_v55, %v5028_v42  ;;  %4940 = vmatmul.bf16.gmra.mxu2 %v6566_v10  ;;  %5198 = vmatmul.bf16.gmra.mxu0 %v6574_v60  ;;  %v6709_v42 = vld [vmem:[#allocation2 + $0x9c8] sm:$0xf] }
 0x658   :  { %5069 = vmatmul.bf16.gmra.mxu3 %v6570_v23 }
 0x659   :  { %5327 = vmatmul.bf16.gmra.mxu1 %v6578_v36  ;;  %v5286_v35 = vadd.f32 %v5285_v49, %v5157_v61  ;;  %v7451_v49 = vld [vmem:[#allocation2 + $0x944] sm:$0xf]  ;;  %v7468_v61 = vld [vmem:[#allocation2 + $0x9cc] sm:$0xf] }
 0x65a   :  { %v4901_v22 = vpop.f32.mrf.mxu2  ;;  %v6650_v1 = vor.u32 %v7451_v49, %v6647_v33 }
 0x65b   :  { %5387 = vst.msk [vmem:[%s9287_s2 + $0x68] sm:$0xff] %vm5373_vm0, %v5286_v35  ;;  %v4902_v62 = vadd.f32 %v4901_v22, %v8896_v50  ;;  %v5030_v51 = vpop.f32.mrf.mxu3  ;;  %v6717_v35 = vld [vmem:[#allocation2 + $0x9d0] sm:$0xf]  ;;  %v7478_v22 = vld [vmem:[#allocation2 + $0xa14] sm:$0xf0] }
 0x65c   :  { %v5161_v25 = vpop.f32.mrf.mxu0  ;;  %v6718_v27 = vor.u32 %v7478_v22, %v6717_v35 }
 0x65d   :  { %v5031_v41 = vadd.f32 %v5030_v51, %v4902_v62  ;;  %v6711_v51 = vld [vmem:[#allocation2 + $0xa10] sm:$0xf0] }
 0x65e   :  { %v5290_v59 = vpop.f32.mrf.mxu1  ;;  %v6714_v31 = vor.u32 %v7468_v61, %v6711_v51 }
 0x65f   :  { %v5160_v53 = vadd.f32 %v5159_v14, %v5031_v41  ;;  %v6719_v41 = vld [vmem:[#allocation2 + $0xa18] sm:$0xf0] }
 0x661   :  { %v5289_v55 = vadd.f32 %v5288_v47, %v5160_v53  ;;  %v7477_v47 = vld [vmem:[#allocation2 + $0xa0c] sm:$0xf0] }
 0x662   :  { %v4903_v30 = vpop.f32.mrf.mxu2  ;;  %v6710_v38 = vor.u32 %v7477_v47, %v6709_v42 }
 0x663   :  { %5388 = vst.msk [vmem:[%s9287_s2 + $0x70] sm:$0xff] %vm5373_vm0, %v5289_v55  ;;  %v4904_v50 = vadd.f32 %v4903_v30, %v8911_v63  ;;  %v5032_v15 = vpop.f32.mrf.mxu3 }
 0x664   :  { %v5164_v52 = vpop.f32.mrf.mxu0 }
 0x665   :  { %v5033_v57 = vadd.f32 %v5032_v15, %v4904_v50 }
 0x666   :  { %v5293_v13 = vpop.f32.mrf.mxu1 }
 0x667   :  { %v5162_v39 = vadd.f32 %v5161_v25, %v5033_v57  ;;  %4945 = vmatmul.bf16.gmra.mxu2 %v6638_v9  ;;  %5203 = vmatmul.bf16.gmra.mxu0 %v6646_v24  ;;  %v7469_v25 = vld [vmem:[#allocation2 + $0x9d4] sm:$0xf]  ;;  %v7486_v57 = vld [vmem:[#allocation2 + $0xa5c] sm:$0xf] }
 0x668   :  { %5074 = vmatmul.bf16.gmra.mxu3 %v6642_v18  ;;  %v6722_v43 = vor.u32 %v7469_v25, %v6719_v41  ;;  %v6781_v18 = vld [vmem:[#allocation2 + $0xa58] sm:$0xf] }
 0x669   :  { %5332 = vmatmul.bf16.gmra.mxu1 %v6650_v1  ;;  %v5291_v2 = vadd.f32 %v5290_v59, %v5162_v39  ;;  %v7495_v1 = vld [vmem:[#allocation2 + $0xa9c] sm:$0xf0]  ;;  %v7496_v39 = vld [vmem:[#allocation2 + $0xaa4] sm:$0xf0] }
 0x66a   :  { %v4906_v34 = vpop.f32.mrf.mxu2 }
 0x66b   :  { %5389 = vst.msk [vmem:[%s9287_s2 + $0x78] sm:$0xff] %vm5373_vm0, %v5291_v2  ;;  %v4907_v63 = vadd.f32 %v4906_v34, %v8920_v32  ;;  %v5035_v10 = vpop.f32.mrf.mxu3  ;;  %v6783_v34 = vld [vmem:[#allocation2 + $0xaa0] sm:$0xf0] }
 0x66c   :  { %v5166_v60 = vpop.f32.mrf.mxu0  ;;  %v6786_v47 = vor.u32 %v7486_v57, %v6783_v34 }
 0x66d   :  { %v5036_v14 = vadd.f32 %v5035_v10, %v4907_v63  ;;  %v7487_v63 = vld [vmem:[#allocation2 + $0xa64] sm:$0xf]  ;;  %v6791_v10 = vld [vmem:[#allocation2 + $0xaa8] sm:$0xf0] }
 0x66e   :  { %v5295_v23 = vpop.f32.mrf.mxu1  ;;  %v6794_v61 = vor.u32 %v7487_v63, %v6791_v10 }
 0x66f   :  { %v5165_v36 = vadd.f32 %v5164_v52, %v5036_v14 }
 0x671   :  { %v5294_v62 = vadd.f32 %v5293_v13, %v5165_v36  ;;  %v6789_v13 = vld [vmem:[#allocation2 + $0xa60] sm:$0xf] }
 0x672   :  { %v4908_v59 = vpop.f32.mrf.mxu2  ;;  %v6790_v36 = vor.u32 %v7496_v39, %v6789_v13 }
 0x673   :  { %5390 = vst.msk [vmem:[%s9287_s2 + $0x80] sm:$0xff] %vm5373_vm0, %v5294_v62  ;;  %v4909_v32 = vadd.f32 %v4908_v59, %v8929_v7  ;;  %v5037_v53 = vpop.f32.mrf.mxu3 }
 0x674   :  { %v5169_v28 = vpop.f32.mrf.mxu0 }
 0x675   :  { %v5038_v55 = vadd.f32 %v5037_v53, %v4909_v32 }
 0x676   :  { %v5298_v40 = vpop.f32.mrf.mxu1 }
 0x677   :  { %v5167_v49 = vadd.f32 %v5166_v60, %v5038_v55  ;;  %4950 = vmatmul.bf16.gmra.mxu2 %v6710_v38  ;;  %5208 = vmatmul.bf16.gmra.mxu0 %v6718_v27  ;;  %v6853_v27 = vld [vmem:[#allocation2 + $0xae8] sm:$0xf]  ;;  %v7514_v55 = vld [vmem:[#allocation2 + $0xb34] sm:$0xf0] }
 0x678   :  { %5079 = vmatmul.bf16.gmra.mxu3 %v6714_v31  ;;  %v7504_v31 = vld [vmem:[#allocation2 + $0xaec] sm:$0xf] }
 0x679   :  { %5337 = vmatmul.bf16.gmra.mxu1 %v6722_v43  ;;  %v5296_v33 = vadd.f32 %v5295_v23, %v5167_v49  ;;  %v6782_v23 = vor.u32 %v7495_v1, %v6781_v18  ;;  %v6861_v43 = vld [vmem:[#allocation2 + $0xaf0] sm:$0xf]  ;;  %v6855_v49 = vld [vmem:[#allocation2 + $0xb30] sm:$0xf0] }
 0x67a   :  { %v4911_v30 = vpop.f32.mrf.mxu2 }
 0x67b   :  { %5391 = vst.msk [vmem:[%s9287_s2 + $0x88] sm:$0xff] %vm5373_vm0, %v5296_v33  ;;  %v4912_v7 = vadd.f32 %v4911_v30, %v8932_v12  ;;  %v5040_v50 = vpop.f32.mrf.mxu3  ;;  %v7505_v33 = vld [vmem:[#allocation2 + $0xaf4] sm:$0xf]  ;;  %v6863_v30 = vld [vmem:[#allocation2 + $0xb38] sm:$0xf0] }
 0x67c   :  { %v5171_v15 = vpop.f32.mrf.mxu0  ;;  %v6866_v18 = vor.u32 %v7505_v33, %v6863_v30 }
 0x67d   :  { %v5041_v9 = vadd.f32 %v5040_v50, %v4912_v7 }
 0x67e   :  { %v5300_v24 = vpop.f32.mrf.mxu1 }
 0x67f   :  { %v5170_v52 = vadd.f32 %v5169_v28, %v5041_v9  ;;  %v7513_v28 = vld [vmem:[#allocation2 + $0xb2c] sm:$0xf0]  ;;  %v6862_v9 = vor.u32 %v7514_v55, %v6861_v43 }
 0x681   :  { %v5299_v2 = vadd.f32 %v5298_v40, %v5170_v52  ;;  %v6858_v52 = vor.u32 %v7504_v31, %v6855_v49 }
 0x682   :  { %v4913_v60 = vpop.f32.mrf.mxu2 }
 0x683   :  { %5392 = vst.msk [vmem:[%s9287_s2 + $0x90] sm:$0xff] %vm5373_vm0, %v5299_v2  ;;  %v4914_v12 = vadd.f32 %v4913_v60, %v8935_v17  ;;  %v5042_v14 = vpop.f32.mrf.mxu3 }
 0x684   :  { %v5174_v42 = vpop.f32.mrf.mxu0 }
 0x685   :  { %v5043_v35 = vadd.f32 %v5042_v14, %v4914_v12  ;;  %v6925_v14 = vld [vmem:[#allocation2 + $0xb78] sm:$0xf] }
 0x686   :  { %v5303_v22 = vpop.f32.mrf.mxu1 }
 0x687   :  { %v5172_v62 = vadd.f32 %v5171_v15, %v5043_v35  ;;  %4955 = vmatmul.bf16.gmra.mxu2 %v6782_v23  ;;  %5213 = vmatmul.bf16.gmra.mxu0 %v6790_v36  ;;  %v6854_v15 = vor.u32 %v7513_v28, %v6853_v27  ;;  %v7531_v23 = vld [vmem:[#allocation2 + $0xbbc] sm:$0xf0]  ;;  %v7522_v36 = vld [vmem:[#allocation2 + $0xb7c] sm:$0xf]  ;;  %v6927_v35 = vld [vmem:[#allocation2 + $0xbc0] sm:$0xf0] }
 0x688   :  { %5084 = vmatmul.bf16.gmra.mxu3 %v6786_v47  ;;  %v7532_v47 = vld [vmem:[#allocation2 + $0xbc4] sm:$0xf0] }
 0x689   :  { %5342 = vmatmul.bf16.gmra.mxu1 %v6794_v61  ;;  %v5301_v51 = vadd.f32 %v5300_v24, %v5172_v62  ;;  %v6935_v62 = vld [vmem:[#allocation2 + $0xbc8] sm:$0xf0] }
 0x68a   :  { %v4916_v25 = vpop.f32.mrf.mxu2 }
 0x68b   :  { %5393 = vst.msk [vmem:[%s9287_s2 + $0x98] sm:$0xff] %vm5373_vm0, %v5301_v51  ;;  %v4917_v17 = vadd.f32 %v4916_v25, %v8938_v5  ;;  %v5045_v41 = vpop.f32.mrf.mxu3 }
 0x68c   :  { %v5176_v59 = vpop.f32.mrf.mxu0 }
 0x68d   :  { %v5046_v32 = vadd.f32 %v5045_v41, %v4917_v17  ;;  %v6926_v17 = vor.u32 %v7531_v23, %v6925_v14 }
 0x68e   :  { %v5305_v53 = vpop.f32.mrf.mxu1 }
 0x68f   :  { %v5175_v38 = vadd.f32 %v5174_v42, %v5046_v32  ;;  %v6933_v42 = vld [vmem:[#allocation2 + $0xb80] sm:$0xf]  ;;  %v6930_v32 = vor.u32 %v7522_v36, %v6927_v35 }
 0x690   :  { %v6934_v41 = vor.u32 %v7532_v47, %v6933_v42 }
 0x691   :  { %v5304_v40 = vadd.f32 %v5303_v22, %v5175_v38  ;;  %v7523_v22 = vld [vmem:[#allocation2 + $0xb84] sm:$0xf] }
 0x692   :  { %v4918_v7 = vpop.f32.mrf.mxu2 }
 0x693   :  { %5394 = vst.msk [vmem:[%s9287_s2 + $0xa0] sm:$0xff] %vm5373_vm0, %v5304_v40  ;;  %v4919_v5 = vadd.f32 %v4918_v7, %v8953_v4  ;;  %v5047_v50 = vpop.f32.mrf.mxu3  ;;  %v6997_v7 = vld [vmem:[#allocation2 + $0xc08] sm:$0xf] }
 0x694   :  { %v5179_v24 = vpop.f32.mrf.mxu0 }
 0x695   :  { %v5048_v1 = vadd.f32 %v5047_v50, %v4919_v5  ;;  %v7549_v5 = vld [vmem:[#allocation2 + $0xc4c] sm:$0xf0]  ;;  %v7540_v50 = vld [vmem:[#allocation2 + $0xc0c] sm:$0xf] }
 0x696   :  { %v5308_v57 = vpop.f32.mrf.mxu1 }
 0x697   :  { %v5177_v13 = vadd.f32 %v5176_v59, %v5048_v1  ;;  %4960 = vmatmul.bf16.gmra.mxu2 %v6854_v15  ;;  %5218 = vmatmul.bf16.gmra.mxu0 %v6862_v9  ;;  %v7005_v15 = vld [vmem:[#allocation2 + $0xc10] sm:$0xf]  ;;  %v7550_v9 = vld [vmem:[#allocation2 + $0xc54] sm:$0xf0]  ;;  %v7007_v1 = vld [vmem:[#allocation2 + $0xc58] sm:$0xf0] }
 0x698   :  { %5089 = vmatmul.bf16.gmra.mxu3 %v6858_v52  ;;  %v6999_v52 = vld [vmem:[#allocation2 + $0xc50] sm:$0xf0] }
 0x699   :  { %5347 = vmatmul.bf16.gmra.mxu1 %v6866_v18  ;;  %v5306_v39 = vadd.f32 %v5305_v53, %v5177_v13  ;;  %v6938_v53 = vor.u32 %v7523_v22, %v6935_v62  ;;  %v7541_v18 = vld [vmem:[#allocation2 + $0xc14] sm:$0xf]  ;;  %v7069_v22 = vld [vmem:[#allocation2 + $0xc98] sm:$0xf]  ;;  %v7567_v62 = vld [vmem:[#allocation2 + $0xcdc] sm:$0xf0] }
 0x69a   :  { %v4921_v2 = vpop.f32.mrf.mxu2 }
 0x69b   :  { %5395 = vst.msk [vmem:[%s9287_s2 + $0xa8] sm:$0xff] %vm5373_vm0, %v5306_v39  ;;  %v4922_v4 = vadd.f32 %v4921_v2, %v8962_v45  ;;  %v5050_v34 = vpop.f32.mrf.mxu3  ;;  %v6998_v39 = vor.u32 %v7549_v5, %v6997_v7  ;;  %v7006_v2 = vor.u32 %v7550_v9, %v7005_v15 }
 0x69c   :  { %v5181_v63 = vpop.f32.mrf.mxu0 }
 0x69d   :  { %v5051_v10 = vadd.f32 %v5050_v34, %v4922_v4  ;;  %v7002_v34 = vor.u32 %v7540_v50, %v6999_v52  ;;  %v7585_v52 = vld [vmem:[#allocation2 + $0xd6c] sm:$0xf0] }
 0x69e   :  { %v5310_v60 = vpop.f32.mrf.mxu1 }
 0x69f   :  { %v5180_v12 = vadd.f32 %v5179_v24, %v5051_v10 }
 0x6a1   :  { %v5309_v61 = vadd.f32 %v5308_v57, %v5180_v12 }
 0x6a2   :  { %v4923_v51 = vpop.f32.mrf.mxu2 }
 0x6a3   :  { %5396 = vst.msk [vmem:[%s9287_s2 + $0xb0] sm:$0xff] %vm5373_vm0, %v5309_v61  ;;  %v4924_v45 = vadd.f32 %v4923_v51, %v8971_v37  ;;  %v5052_v25 = vpop.f32.mrf.mxu3  ;;  %v7558_v51 = vld [vmem:[#allocation2 + $0xc9c] sm:$0xf] }
 0x6a4   :  { %v5184_v59 = vpop.f32.mrf.mxu0 }
 0x6a5   :  { %v5053_v38 = vadd.f32 %v5052_v25, %v4924_v45  ;;  %v7077_v45 = vld [vmem:[#allocation2 + $0xca0] sm:$0xf]  ;;  %v7568_v25 = vld [vmem:[#allocation2 + $0xce4] sm:$0xf0] }
 0x6a6   :  { %v5313_v27 = vpop.f32.mrf.mxu1 }
 0x6a7   :  { %v5182_v28 = vadd.f32 %v5181_v63, %v5053_v38  ;;  %4965 = vmatmul.bf16.gmra.mxu2 %v6926_v17  ;;  %5223 = vmatmul.bf16.gmra.mxu0 %v6934_v41  ;;  %v7010_v63 = vor.u32 %v7541_v18, %v7007_v1  ;;  %v7071_v41 = vld [vmem:[#allocation2 + $0xce0] sm:$0xf0]  ;;  %v7576_v18 = vld [vmem:[#allocation2 + $0xd2c] sm:$0xf]  ;;  %v7149_v1 = vld [vmem:[#allocation2 + $0xd30] sm:$0xf] }
 0x6a8   :  { %5094 = vmatmul.bf16.gmra.mxu3 %v6930_v32  ;;  %v7079_v32 = vld [vmem:[#allocation2 + $0xce8] sm:$0xf0] }
 0x6a9   :  { %5352 = vmatmul.bf16.gmra.mxu1 %v6938_v53  ;;  %v5311_v31 = vadd.f32 %v5310_v60, %v5182_v28  ;;  %v7078_v28 = vor.u32 %v7568_v25, %v7077_v45 }
 0x6aa   :  { %v4926_v43 = vpop.f32.mrf.mxu2 }
 0x6ab   :  { %5397 = vst.msk [vmem:[%s9287_s2 + $0xb8] sm:$0xff] %vm5373_vm0, %v5311_v31  ;;  %v4927_v37 = vadd.f32 %v4926_v43, %v8974_v11  ;;  %v5055_v55 = vpop.f32.mrf.mxu3  ;;  %v7074_v43 = vor.u32 %v7558_v51, %v7071_v41 }
 0x6ac   :  { %v5186_v40 = vpop.f32.mrf.mxu0 }
 0x6ad   :  { %v5056_v49 = vadd.f32 %v5055_v55, %v4927_v37 }
 0x6ae   :  { %v5315_v33 = vpop.f32.mrf.mxu1 }
 0x6af   :  { %v5185_v30 = vadd.f32 %v5184_v59, %v5056_v49  ;;  %v7559_v59 = vld [vmem:[#allocation2 + $0xca4] sm:$0xf] }
 0x6b0   :  { %v7082_v37 = vor.u32 %v7559_v59, %v7079_v32 }
 0x6b1   :  { %v5314_v24 = vadd.f32 %v5313_v27, %v5185_v30  ;;  %v7070_v27 = vor.u32 %v7567_v62, %v7069_v22 }
 0x6b2   :  { %v4928_v57 = vpop.f32.mrf.mxu2 }
 0x6b3   :  { %5398 = vst.msk [vmem:[%s9287_s2 + $0xc0] sm:$0xff] %vm5373_vm0, %v5314_v24  ;;  %v4929_v11 = vadd.f32 %v4928_v57, %v8977_v29  ;;  %v5057_v13 = vpop.f32.mrf.mxu3  ;;  %v7141_v24 = vld [vmem:[#allocation2 + $0xd28] sm:$0xf]  ;;  %v7586_v57 = vld [vmem:[#allocation2 + $0xd74] sm:$0xf0] }
 0x6b4   :  { %v5189_v4 = vpop.f32.mrf.mxu0 }
 0x6b5   :  { %v5058_v10 = vadd.f32 %v5057_v13, %v4929_v11  ;;  %v7143_v13 = vld [vmem:[#allocation2 + $0xd70] sm:$0xf0] }
 0x6b6   :  { %v5318_v60 = vpop.f32.mrf.mxu1 }
 0x6b7   :  { %v5187_v12 = vadd.f32 %v5186_v40, %v5058_v10  ;;  %4970 = vmatmul.bf16.gmra.mxu2 %v6998_v39  ;;  %5228 = vmatmul.bf16.gmra.mxu0 %v7006_v2  ;;  %v7577_v39 = vld [vmem:[#allocation2 + $0xd34] sm:$0xf]  ;;  %v7151_v2 = vld [vmem:[#allocation2 + $0xd78] sm:$0xf0]  ;;  %v7150_v10 = vor.u32 %v7586_v57, %v7149_v1 }
 0x6b8   :  { %5099 = vmatmul.bf16.gmra.mxu3 %v7002_v34 }
 0x6b9   :  { %5357 = vmatmul.bf16.gmra.mxu1 %v7010_v63  ;;  %v5316_v14 = vadd.f32 %v5315_v33, %v5187_v12  ;;  %v7142_v63 = vor.u32 %v7585_v52, %v7141_v24  ;;  %v7146_v12 = vor.u32 %v7576_v18, %v7143_v13 }
 0x6ba   :  { %v4931_v23 = vpop.f32.mrf.mxu2 }
 0x6bb   :  { %5399 = vst.msk [vmem:[%s9287_s2 + $0xc8] sm:$0xff] %vm5373_vm0, %v5316_v14  ;;  %v4932_v29 = vadd.f32 %v4931_v23, %v8980_v20  ;;  %v5060_v36 = vpop.f32.mrf.mxu3  ;;  %v7154_v14 = vor.u32 %v7577_v39, %v7151_v2 }
 0x6bc   :  { %v5191_v42 = vpop.f32.mrf.mxu0 }
 0x6bd   :  { %v5061_v47 = vadd.f32 %v5060_v36, %v4932_v29 }
 0x6be   :  { %v5320_v61 = vpop.f32.mrf.mxu1 }
 0x6bf   :  { %v5190_v35 = vadd.f32 %v5189_v4, %v5061_v47 }
 0x6c1   :  { %v5319_v17 = vadd.f32 %v5318_v60, %v5190_v35 }
 0x6c2   :  { %v4933_v53 = vpop.f32.mrf.mxu2 }
 0x6c3   :  { %5400 = vst.msk [vmem:[%s9287_s2 + $0xd0] sm:$0xff] %vm5373_vm0, %v5319_v17  ;;  %v4934_v20 = vadd.f32 %v4933_v53, %v8983_v46  ;;  %v5062_v38 = vpop.f32.mrf.mxu3 }
 0x6c4   :  { %v5194_v31 = vpop.f32.mrf.mxu0 }
 0x6c5   :  { %v5063_v55 = vadd.f32 %v5062_v38, %v4934_v20 }
 0x6c6   :  { %v5323_v40 = vpop.f32.mrf.mxu1 }
 0x6c7   :  { %v5192_v49 = vadd.f32 %v5191_v42, %v5063_v55  ;;  %4975 = vmatmul.bf16.gmra.mxu2 %v7070_v27  ;;  %5233 = vmatmul.bf16.gmra.mxu0 %v7078_v28 }
 0x6c8   :  { %5104 = vmatmul.bf16.gmra.mxu3 %v7074_v43 }
 0x6c9   :  { %5362 = vmatmul.bf16.gmra.mxu1 %v7082_v37  ;;  %v5321_v33 = vadd.f32 %v5320_v61, %v5192_v49 }
 0x6ca   :  { %v4936_v30 = vpop.f32.mrf.mxu2 }
 0x6cb   :  { %5401 = vst.msk [vmem:[%s9287_s2 + $0xd8] sm:$0xff] %vm5373_vm0, %v5321_v33  ;;  %v4937_v46 = vadd.f32 %v4936_v30, %v8986_v21  ;;  %v5065_v7 = vpop.f32.mrf.mxu3 }
 0x6cc   :  { %v5196_v5 = vpop.f32.mrf.mxu0 }
 0x6cd   :  { %v5066_v50 = vadd.f32 %v5065_v7, %v4937_v46 }
 0x6ce   :  { %v5325_v15 = vpop.f32.mrf.mxu1 }
 0x6cf   :  { %v5195_v9 = vadd.f32 %v5194_v31, %v5066_v50 }
 0x6d1   :  { %v5324_v11 = vadd.f32 %v5323_v40, %v5195_v9 }
 0x6d2   :  { %v4938_v4 = vpop.f32.mrf.mxu2 }
 0x6d3   :  { %5402 = vst.msk [vmem:[%s9287_s2 + $0xe0] sm:$0xff] %vm5373_vm0, %v5324_v11  ;;  %v4939_v21 = vadd.f32 %v4938_v4, %v8989_v56  ;;  %v5067_v34 = vpop.f32.mrf.mxu3  ;;  %v9355_v11 = vld [vmem:[#allocation11_spill] sm:$0xff] }
 0x6d4   :  { %v5199_v60 = vpop.f32.mrf.mxu0 }
 0x6d5   :  { %v5068_v23 = vadd.f32 %v5067_v34, %v4939_v21 }
 0x6d6   :  { %v5328_v29 = vpop.f32.mrf.mxu1 }
 0x6d7   :  { %v5197_v36 = vadd.f32 %v5196_v5, %v5068_v23  ;;  %4980 = vmatmul.bf16.gmra.mxu2 %v7142_v63  ;;  %5238 = vmatmul.bf16.gmra.mxu0 %v7150_v10  ;;  %v9356_v10 = vld [vmem:[#allocation12_spill] sm:$0xff] }
 0x6d8   :  { %5109 = vmatmul.bf16.gmra.mxu3 %v7146_v12 }
 0x6d9   :  { %5367 = vmatmul.bf16.gmra.mxu1 %v7154_v14  ;;  %v5326_v42 = vadd.f32 %v5325_v15, %v5197_v36 }
 0x6da   :  { %v4941_v47 = vpop.f32.mrf.mxu2 }
 0x6db   :  { %5403 = vst.msk [vmem:[%s9287_s2 + $0xe8] sm:$0xff] %vm5373_vm0, %v5326_v42  ;;  %v4942_v56 = vadd.f32 %v4941_v47, %v8992_v16  ;;  %v5070_v61 = vpop.f32.mrf.mxu3 }
 0x6dc   :  { %v5201_v35 = vpop.f32.mrf.mxu0 }
 0x6dd   :  { %v5071_v22 = vadd.f32 %v5070_v61, %v4942_v56 }
 0x6de   :  { %v5330_v62 = vpop.f32.mrf.mxu1 }
 0x6df   :  { %v5200_v51 = vadd.f32 %v5199_v60, %v5071_v22 }
 0x6e1   :  { %v5329_v45 = vadd.f32 %v5328_v29, %v5200_v51 }
 0x6e2   :  { %v4943_v25 = vpop.f32.mrf.mxu2 }
 0x6e3   :  { %5404 = vst.msk [vmem:[%s9287_s2 + $0xf0] sm:$0xff] %vm5373_vm0, %v5329_v45  ;;  %v4944_v17 = vadd.f32 %v4943_v25, %v8995_v6  ;;  %v5072_v41 = vpop.f32.mrf.mxu3 }
 0x6e4   :  { %v5204_v59 = vpop.f32.mrf.mxu0 }
 0x6e5   :  { %v5073_v32 = vadd.f32 %v5072_v41, %v4944_v17  ;;  %v9357_v17 = vld [vmem:[#allocation13_spill] sm:$0xff] }
 0x6e6   :  { %v5333_v53 = vpop.f32.mrf.mxu1 }
 0x6e7   :  { %v5202_v20 = vadd.f32 %v5201_v35, %v5073_v32 }
 0x6e9   :  { %v5331_v16 = vadd.f32 %v5330_v62, %v5202_v20 }
 0x6ea   :  { %v4946_v38 = vpop.f32.mrf.mxu2 }
 0x6eb   :  { %5405 = vst.msk [vmem:[%s9287_s2 + $0xf8] sm:$0xff] %vm5373_vm0, %v5331_v16  ;;  %v4947_v27 = vadd.f32 %v4946_v38, %v8998_v48  ;;  %v5075_v28 = vpop.f32.mrf.mxu3 }
 0x6ec   :  { %v5206_v31 = vpop.f32.mrf.mxu0 }
 0x6ed   :  { %v5076_v43 = vadd.f32 %v5075_v28, %v4947_v27  ;;  %v9358_v27 = vld [vmem:[#allocation14_spill] sm:$0xff] }
 0x6ee   :  { %v5335_v37 = vpop.f32.mrf.mxu1 }
 0x6ef   :  { %v5205_v55 = vadd.f32 %v5204_v59, %v5076_v43 }
 0x6f1   :  { %v5334_v6 = vadd.f32 %v5333_v53, %v5205_v55 }
 0x6f2   :  { %v4948_v40 = vpop.f32.mrf.mxu2 }
 0x6f3   :  { %5406 = vst.msk [vmem:[%s9287_s2 + $0x100] sm:$0xff] %vm5373_vm0, %v5334_v6  ;;  %v4949_v49 = vadd.f32 %v4948_v40, %v9001_v58  ;;  %v5077_v33 = vpop.f32.mrf.mxu3 }
 0x6f4   :  { %v5209_v30 = vpop.f32.mrf.mxu0 }
 0x6f5   :  { %v5078_v46 = vadd.f32 %v5077_v33, %v4949_v49  ;;  %v9359_v33 = vld [vmem:[#allocation15_spill] sm:$0xff] }
 0x6f6   :  { %v5338_v7 = vpop.f32.mrf.mxu1 }
 0x6f7   :  { %v5207_v5 = vadd.f32 %v5206_v31, %v5078_v46 }
 0x6f9   :  { %v5336_v48 = vadd.f32 %v5335_v37, %v5207_v5 }
 0x6fa   :  { %v4951_v50 = vpop.f32.mrf.mxu2 }
 0x6fb   :  { %5407 = vst.msk [vmem:[%s9287_s2 + $0x108] sm:$0xff] %vm5373_vm0, %v5336_v48  ;;  %v4952_v15 = vadd.f32 %v4951_v50, %v9004_v8  ;;  %v5080_v9 = vpop.f32.mrf.mxu3 }
 0x6fc   :  { %v5211_v24 = vpop.f32.mrf.mxu0 }
 0x6fd   :  { %v5081_v52 = vadd.f32 %v5080_v9, %v4952_v15 }
 0x6fe   :  { %v5340_v18 = vpop.f32.mrf.mxu1 }
 0x6ff   :  { %v5210_v1 = vadd.f32 %v5209_v30, %v5081_v52 }
 0x701   :  { %v5339_v58 = vadd.f32 %v5338_v7, %v5210_v1 }
 0x702   :  { %v4953_v57 = vpop.f32.mrf.mxu2 }
 0x703   :  { %5408 = vst.msk [vmem:[%s9287_s2 + $0x110] sm:$0xff] %vm5373_vm0, %v5339_v58  ;;  %v4954_v13 = vadd.f32 %v4953_v57, %v9355_v11  ;;  %v5082_v39 = vpop.f32.mrf.mxu3 }
 0x704   :  { %v5214_v2 = vpop.f32.mrf.mxu0 }
 0x705   :  { %v5083_v4 = vadd.f32 %v5082_v39, %v4954_v13  ;;  %v9360_v39 = vld [vmem:[#allocation16_spill] sm:$0xff] }
 0x706   :  { %v5343_v21 = vpop.f32.mrf.mxu1 }
 0x707   :  { %v5212_v34 = vadd.f32 %v5211_v24, %v5083_v4 }
 0x709   :  { %v5341_v8 = vadd.f32 %v5340_v18, %v5212_v34 }
 0x70a   :  { %v4956_v63 = vpop.f32.mrf.mxu2 }
 0x70b   :  { %5409 = vst.msk [vmem:[%s9287_s2 + $0x118] sm:$0xff] %vm5373_vm0, %v5341_v8  ;;  %v4957_v60 = vadd.f32 %v4956_v63, %v9356_v10  ;;  %v5085_v12 = vpop.f32.mrf.mxu3 }
 0x70c   :  { %v5216_v14 = vpop.f32.mrf.mxu0 }
 0x70d   :  { %v5086_v23 = vadd.f32 %v5085_v12, %v4957_v60 }
 0x70e   :  { %v5345_v29 = vpop.f32.mrf.mxu1 }
 0x70f   :  { %v5215_v36 = vadd.f32 %v5214_v2, %v5086_v23 }
 0x711   :  { %v5344_v42 = vadd.f32 %v5343_v21, %v5215_v36 }
 0x712   :  { %v4958_v47 = vpop.f32.mrf.mxu2 }
 0x713   :  { %5410 = vst.msk [vmem:[%s9287_s2 + $0x120] sm:$0xff] %vm5373_vm0, %v5344_v42  ;;  %v4959_v56 = vadd.f32 %v4958_v47, %v9013_v26  ;;  %v5087_v61 = vpop.f32.mrf.mxu3 }
 0x714   :  { %v5219_v35 = vpop.f32.mrf.mxu0 }
 0x715   :  { %v5088_v22 = vadd.f32 %v5087_v61, %v4959_v56  ;;  %v9361_v56 = vld [vmem:[#allocation5_spill] sm:$0xff] }
 0x716   :  { %v5348_v62 = vpop.f32.mrf.mxu1 }
 0x717   :  { %v5217_v51 = vadd.f32 %v5216_v14, %v5088_v22 }
 0x719   :  { %v5346_v45 = vadd.f32 %v5345_v29, %v5217_v51 }
 0x71a   :  { %v4961_v25 = vpop.f32.mrf.mxu2 }
 0x71b   :  { %5411 = vst.msk [vmem:[%s9287_s2 + $0x128] sm:$0xff] %vm5373_vm0, %v5346_v45  ;;  %v4962_v41 = vadd.f32 %v4961_v25, %v9357_v17  ;;  %v5090_v59 = vpop.f32.mrf.mxu3 }
 0x71c   :  { %v5221_v32 = vpop.f32.mrf.mxu0 }
 0x71d   :  { %v5091_v53 = vadd.f32 %v5090_v59, %v4962_v41 }
 0x71e   :  { %v5350_v20 = vpop.f32.mrf.mxu1 }
 0x71f   :  { %v5220_v16 = vadd.f32 %v5219_v35, %v5091_v53 }
 0x721   :  { %v5349_v26 = vadd.f32 %v5348_v62, %v5220_v16 }
 0x722   :  { %v4963_v38 = vpop.f32.mrf.mxu2 }
 0x723   :  { %5412 = vst.msk [vmem:[%s9287_s2 + $0x130] sm:$0xff] %vm5373_vm0, %v5349_v26  ;;  %v4964_v28 = vadd.f32 %v4963_v38, %v9358_v27  ;;  %v5092_v31 = vpop.f32.mrf.mxu3 }
 0x724   :  { %v5224_v43 = vpop.f32.mrf.mxu0 }
 0x725   :  { %v5093_v37 = vadd.f32 %v5092_v31, %v4964_v28 }
 0x726   :  { %v5353_v55 = vpop.f32.mrf.mxu1 }
 0x727   :  { %v5222_v6 = vadd.f32 %v5221_v32, %v5093_v37 }
 0x729   :  { %v5351_v40 = vadd.f32 %v5350_v20, %v5222_v6 }
 0x72a   :  { %v4966_v49 = vpop.f32.mrf.mxu2 }
 0x72b   :  { %5413 = vst.msk [vmem:[%s9287_s2 + $0x138] sm:$0xff] %vm5373_vm0, %v5351_v40  ;;  %v4967_v30 = vadd.f32 %v4966_v49, %v9359_v33  ;;  %v5095_v46 = vpop.f32.mrf.mxu3 }
 0x72c   :  { %v5226_v7 = vpop.f32.mrf.mxu0 }
 0x72d   :  { %v5096_v5 = vadd.f32 %v5095_v46, %v4967_v30 }
 0x72e   :  { %v5355_v48 = vpop.f32.mrf.mxu1 }
 0x72f   :  { %v5225_v50 = vadd.f32 %v5224_v43, %v5096_v5 }
 0x731   :  { %v5354_v15 = vadd.f32 %v5353_v55, %v5225_v50 }
 0x732   :  { %v4968_v9 = vpop.f32.mrf.mxu2 }
 0x733   :  { %5414 = vst.msk [vmem:[%s9287_s2 + $0x140] sm:$0xff] %vm5373_vm0, %v5354_v15  ;;  %v4969_v24 = vadd.f32 %v4968_v9, %v9025_v3  ;;  %v5097_v52 = vpop.f32.mrf.mxu3 }
 0x734   :  { %v5229_v18 = vpop.f32.mrf.mxu0 }
 0x735   :  { %v5098_v1 = vadd.f32 %v5097_v52, %v4969_v24 }
 0x736   :  { %v5358_v58 = vpop.f32.mrf.mxu1 }
 0x737   :  { %v5227_v57 = vadd.f32 %v5226_v7, %v5098_v1 }
 0x739   :  { %v5356_v11 = vadd.f32 %v5355_v48, %v5227_v57 }
 0x73a   :  { %v4971_v13 = vpop.f32.mrf.mxu2 }
 0x73b   :  { %5415 = vst.msk [vmem:[%s9287_s2 + $0x148] sm:$0xff] %vm5373_vm0, %v5356_v11  ;;  %v4972_v2 = vadd.f32 %v4971_v13, %v9360_v39  ;;  %v5100_v4 = vpop.f32.mrf.mxu3 }
 0x73c   :  { %v5231_v34 = vpop.f32.mrf.mxu0 }
 0x73d   :  { %v5101_v21 = vadd.f32 %v5100_v4, %v4972_v2 }
 0x73e   :  { %v5360_v63 = vpop.f32.mrf.mxu1 }
 0x73f   :  { %v5230_v8 = vadd.f32 %v5229_v18, %v5101_v21 }
 0x741   :  { %v5359_v3 = vadd.f32 %v5358_v58, %v5230_v8 }
 0x742   :  { %v4973_v10 = vpop.f32.mrf.mxu2 }
 0x743   :  { %5416 = vst.msk [vmem:[%s9287_s2 + $0x150] sm:$0xff] %vm5373_vm0, %v5359_v3  ;;  %v4974_v60 = vadd.f32 %v4973_v10, %v9031_v19  ;;  %v5102_v12 = vpop.f32.mrf.mxu3 }
 0x744   :  { %v5234_v29 = vpop.f32.mrf.mxu0 }
 0x745   :  { %v5103_v14 = vadd.f32 %v5102_v12, %v4974_v60 }
 0x746   :  { %v5363_v42 = vpop.f32.mrf.mxu1 }
 0x747   :  { %v5232_v23 = vadd.f32 %v5231_v34, %v5103_v14 }
 0x749   :  { %v5361_v36 = vadd.f32 %v5360_v63, %v5232_v23 }
 0x74a   :  { %v4976_v47 = vpop.f32.mrf.mxu2 }
 0x74b   :  { %5417 = vst.msk [vmem:[%s9287_s2 + $0x158] sm:$0xff] %vm5373_vm0, %v5361_v36  ;;  %v4977_v61 = vadd.f32 %v4976_v47, %v9361_v56  ;;  %v5105_v35 = vpop.f32.mrf.mxu3 }
 0x74c   :  { %v5236_v45 = vpop.f32.mrf.mxu0 }
 0x74d   :  { %v5106_v22 = vadd.f32 %v5105_v35, %v4977_v61 }
 0x74e   :  { %v5365_v41 = vpop.f32.mrf.mxu1 }
 0x74f   :  { %v5235_v62 = vadd.f32 %v5234_v29, %v5106_v22 }
 0x751   :  { %v5364_v51 = vadd.f32 %v5363_v42, %v5235_v62 }
 0x752   :  { %v4978_v19 = vpop.f32.mrf.mxu2 }
 0x753   :  { %5418 = vst.msk [vmem:[%s9287_s2 + $0x160] sm:$0xff] %vm5373_vm0, %v5364_v51  ;;  %v4979_v25 = vadd.f32 %v4978_v19, %v9037_v0  ;;  %v5107_v17 = vpop.f32.mrf.mxu3 }
 0x754   :  { %v5239_v38 = vpop.f32.mrf.mxu0 }
 0x755   :  { %v5108_v59 = vadd.f32 %v5107_v17, %v4979_v25 }
 0x756   :  { %v5368_v28 = vpop.f32.mrf.mxu1 }
 0x757   :  { %v5237_v32 = vadd.f32 %v5236_v45, %v5108_v59 }
 0x759   :  { %v5366_v53 = vadd.f32 %v5365_v41, %v5237_v32 }
 0x75a   :  { %v4981_v20 = vpop.f32.mrf.mxu2 }
 0x75b   :  { %5419 = vst.msk [vmem:[%s9287_s2 + $0x168] sm:$0xff] %vm5373_vm0, %v5366_v53  ;;  %v4982_v16 = vadd.f32 %v4981_v20, %v9040_v54  ;;  %v5110_v26 = vpop.f32.mrf.mxu3 }
 0x75c   :  { %v5241_v40 = vpop.f32.mrf.mxu0 }
 0x75d   :  { %v5111_v27 = vadd.f32 %v5110_v26, %v4982_v16 }
 0x75e   :  { %v5370_v33 = vpop.f32.mrf.mxu1 }
 0x75f   :  { %v5240_v31 = vadd.f32 %v5239_v38, %v5111_v27 }
 0x761   :  { %v5369_v43 = vadd.f32 %v5368_v28, %v5240_v31 }
 0x762   :  { %v4983_v0 = vpop.f32.mrf.mxu2 }
 0x763   :  { %5420 = vst.msk [vmem:[%s9287_s2 + $0x170] sm:$0xff] %vm5373_vm0, %v5369_v43  ;;  %v4984_v37 = vadd.f32 %v4983_v0, %v9043_v44  ;;  %v5112_v55 = vpop.f32.mrf.mxu3 }
 0x765   :  { %v5113_v6 = vadd.f32 %v5112_v55, %v4984_v37 }
 0x767   :  { %v5242_v49 = vadd.f32 %v5241_v40, %v5113_v6 }
 0x769   :  { %v5371_v54 = vadd.f32 %v5370_v33, %v5242_v49 }
 0x76b   :  { %5421 = vst.msk [vmem:[%s9287_s2 + $0x178] sm:$0xff] %vm5373_vm0, %v5371_v54 }
 0x76c   :  { %5426 = vsyncpa [#allocation3], 1 }

</bundles_post_ra>
